<compile_context>
chip_gen: v7x
topology: tpu7x:2x2x1
jax: 0.10.0
libtpu: 0.0.40
codegen_flags: <defaults>
</compile_context>

<pallas_src>
import functools

import jax
import jax.numpy as jnp
from jax.experimental import pallas as pl
from jax.experimental.pallas import tpu as pltpu


def convl_hparams(k=None, s=None, p=None):
    """Replicates ConvL.__init__ default logic."""
    if k is None:
        k, s, p = 3, 1, 1
    elif s is None:
        s = 1
    elif p is None:
        p = 0
    return k, s, p


# ----------------------------------------------------------------------------
# Fused ConvL kernel: conv(k,s,p) + bias + BN(train) + LeakyReLU in one pass.
# ----------------------------------------------------------------------------
def _convl_fused_kernel(xp_ref, w_ref, b_ref, g_ref, bt_ref, o_ref,
                        *, k, s, ho, wo, eps, slope):
    # xp_ref : (B, Hp, Wp, Cin)  f32   padded NHWC input (VMEM resident)
    # w_ref  : (k*k, Cin, Cout)  bf16  conv weight, taps ordered (kh, kw)
    # b_ref  : (1, Cout) f32 ; g_ref/bt_ref : (1, Cout) f32 (BN gamma / beta)
    # o_ref  : (B*Ho*Wo, Cout) f32
    B = xp_ref.shape[0]
    cin = xp_ref.shape[3]
    cout = w_ref.shape[2]
    M = B * ho * wo

    xp = xp_ref[...]                                      # single VMEM load

    # ---- convolution: sum of k*k shifted matmuls (im2col fused in-kernel) ---
    acc = jnp.zeros((M, cout), jnp.float32)
    for di in range(k):
        for dj in range(k):
            win = xp[:, di:di + (ho - 1) * s + 1:s,
                       dj:dj + (wo - 1) * s + 1:s, :]     # (B, Ho, Wo, Cin)
            lhs = win.reshape(M, cin).astype(jnp.bfloat16)
            acc = acc + jnp.dot(lhs, w_ref[di * k + dj],  # bf16 MXU, f32 acc
                                preferred_element_type=jnp.float32)

    y = acc + b_ref[...]                                  # conv output, f32

    # ---- BatchNorm (training mode, biased variance) + LeakyReLU -------------
    inv_m = 1.0 / M
    mean = jnp.sum(y, axis=0, keepdims=True) * inv_m
    var = jnp.sum(y * y, axis=0, keepdims=True) * inv_m - mean * mean
    var = jnp.maximum(var, 0.0)                           # one-pass cancellation guard
    inv_std = jax.lax.rsqrt(var + eps)
    scale = g_ref[...] * inv_std
    shift = bt_ref[...] - mean * scale
    z = y * scale + shift
    o_ref[...] = jnp.where(z >= 0, z, slope * z).astype(o_ref.dtype)


def convl_forward(params, x_nchw, *, k=3, s=1, p=1, eps=1e-5, slope=0.01):
    """ConvL forward. Accepts NCHW like PyTorch, returns NCHW."""
    w, b = params["w"], params["b"]                       # w: (k, k, Cin, Cout)
    gamma, beta = params["gamma"], params["beta"]
    B, cin, H, W = x_nchw.shape
    cout = w.shape[-1]
    Ho = (H + 2 * p - k) // s + 1
    Wo = (W + 2 * p - k) // s + 1
    M = B * Ho * Wo

    # Layout plumbing (tiny): NCHW -> NHWC and spatial zero-pad. No k*k patch
    # matrix is ever written to HBM.
    x = jnp.transpose(x_nchw, (0, 2, 3, 1)).astype(jnp.float32)
    xp = jnp.pad(x, ((0, 0), (p, p), (p, p), (0, 0)))
    w3 = w.reshape(k * k, cin, cout).astype(jnp.bfloat16)

    kernel = functools.partial(_convl_fused_kernel, k=k, s=s, ho=Ho, wo=Wo,
                               eps=eps, slope=slope)
    vmem = pl.BlockSpec(memory_space=pltpu.MemorySpace.VMEM)
    y2d = pl.pallas_call(
        kernel,
        out_shape=jax.ShapeDtypeStruct((M, cout), jnp.float32),
        in_specs=[vmem, vmem, vmem, vmem, vmem],
        out_specs=vmem,
    )(xp, w3, b.reshape(1, cout).astype(jnp.float32),
      gamma.reshape(1, cout).astype(jnp.float32),
      beta.reshape(1, cout).astype(jnp.float32))

    y = y2d.reshape(B, Ho, Wo, cout)
    return jnp.transpose(y, (0, 3, 1, 2))                 # back to NCHW


# ----------------------------------------------------------------------------
# Pure-JAX reference (for correctness check only)
# ----------------------------------------------------------------------------
def convl_reference(params, x_nchw, *, k=3, s=1, p=1, eps=1e-5, slope=0.01):
    x = jnp.transpose(x_nchw, (0, 2, 3, 1)).astype(jnp.float32)
    y = jax.lax.conv_general_dilated(
        x, params["w"].astype(jnp.float32),
        window_strides=(s, s), padding=[(p, p), (p, p)],
        dimension_numbers=("NHWC", "HWIO", "NHWC"))
    y = y + params["b"].reshape(1, 1, 1, -1)
    mean = jnp.mean(y, axis=(0, 1, 2), keepdims=True)
    var = jnp.mean((y - mean) ** 2, axis=(0, 1, 2), keepdims=True)   # biased
    z = params["gamma"].reshape(1, 1, 1, -1) * (y - mean) * jax.lax.rsqrt(var + eps) \
        + params["beta"].reshape(1, 1, 1, -1)
    z = jnp.where(z >= 0, z, slope * z)
    return jnp.transpose(z, (0, 3, 1, 2))


if __name__ == "__main__":
    key = jax.random.PRNGKey(0)
    kx, kw, kb = jax.random.split(key, 3)

    # Small shapes consistent with ConvL: batch=2, inp_ch=4, out_ch=8, 16x16.
    B, Cin, H, W, Cout = 2, 4, 16, 16, 8
    K, S, P = convl_hparams()                              # defaults: 3, 1, 1

    x = jax.random.normal(kx, (B, Cin, H, W), jnp.float32)
    fan_in = Cin * K * K
    params = dict(
        w=jax.random.normal(kw, (K, K, Cin, Cout), jnp.float32) / jnp.sqrt(fan_in),
        b=jax.random.normal(kb, (Cout,), jnp.float32) * 0.05,
        gamma=jnp.ones((Cout,), jnp.float32),              # BN affine defaults
        beta=jnp.zeros((Cout,), jnp.float32),
    )

    fwd = jax.jit(functools.partial(convl_forward, k=K, s=S, p=P))
    out = jax.block_until_ready(fwd(params, x))
    assert out.shape == (B, Cout, H, W), out.shape

    ref = convl_reference(params, x, k=K, s=S, p=P)
    err = float(jnp.max(jnp.abs(out - ref)))
    assert err < 5e-2, f"max abs err vs reference: {err}"

    print("KERNEL_OK")
</pallas_src>

<mosaic_0001>
module attributes {stable_mosaic.version = 11 : i64} {
  func.func @_convl_fused_kernel(%arg0: memref<2x18x18x4xf32, #tpu.memory_space<vmem>>, %arg1: memref<9x4x8xbf16, #tpu.memory_space<vmem>>, %arg2: memref<1x8xf32, #tpu.memory_space<vmem>>, %arg3: memref<1x8xf32, #tpu.memory_space<vmem>>, %arg4: memref<1x8xf32, #tpu.memory_space<vmem>>, %arg5: memref<512x8xf32, #tpu.memory_space<vmem>>) attributes {dimension_semantics = [], scalar_prefetch = 0 : i64, scratch_operands = 0 : i64, tpu.core_type = #tpu.core_type<tc>} {
    %c0 = arith.constant 0 : index
    %c0_0 = arith.constant 0 : index
    %c0_1 = arith.constant 0 : index
    %c0_2 = arith.constant 0 : index
    %0 = vector.load %arg0[%c0, %c0_0, %c0_1, %c0_2] : memref<2x18x18x4xf32, #tpu.memory_space<vmem>>, vector<2x18x18x4xf32>
    %cst = arith.constant 0.000000e+00 : f32
    %1 = vector.broadcast %cst : f32 to vector<512x8xf32>
    %2 = vector.extract_strided_slice %0 {offsets = [0, 0, 0, 0], sizes = [2, 16, 16, 4], strides = [1, 1, 1, 1]} : vector<2x18x18x4xf32> to vector<2x16x16x4xf32>
    %3 = vector.shape_cast %2 : vector<2x16x16x4xf32> to vector<512x4xf32>
    %4 = arith.truncf %3 : vector<512x4xf32> to vector<512x4xbf16>
    %c0_3 = arith.constant 0 : index
    %c0_4 = arith.constant 0 : index
    %c0_5 = arith.constant 0 : index
    %5 = vector.load %arg1[%c0_3, %c0_4, %c0_5] : memref<9x4x8xbf16, #tpu.memory_space<vmem>>, vector<1x4x8xbf16>
    %6 = vector.shape_cast %5 : vector<1x4x8xbf16> to vector<4x8xbf16>
    %cst_6 = arith.constant dense<0.000000e+00> : vector<512x8xf32>
    %7 = tpu.matmul %4, %6, %cst_6 {dimension_numbers = #tpu.dot_dimension_numbers<[1], [0], [0], [1], [0, 0, 1, 1], [], []>} : vector<512x4xbf16>, vector<4x8xbf16>, vector<512x8xf32> -> vector<512x8xf32>
    %8 = arith.addf %1, %7 : vector<512x8xf32>
    %9 = vector.extract_strided_slice %0 {offsets = [0, 0, 1, 0], sizes = [2, 16, 16, 4], strides = [1, 1, 1, 1]} : vector<2x18x18x4xf32> to vector<2x16x16x4xf32>
    %10 = vector.shape_cast %9 : vector<2x16x16x4xf32> to vector<512x4xf32>
    %11 = arith.truncf %10 : vector<512x4xf32> to vector<512x4xbf16>
    %c1 = arith.constant 1 : index
    %c0_7 = arith.constant 0 : index
    %c0_8 = arith.constant 0 : index
    %12 = vector.load %arg1[%c1, %c0_7, %c0_8] : memref<9x4x8xbf16, #tpu.memory_space<vmem>>, vector<1x4x8xbf16>
    %13 = vector.shape_cast %12 : vector<1x4x8xbf16> to vector<4x8xbf16>
    %cst_9 = arith.constant dense<0.000000e+00> : vector<512x8xf32>
    %14 = tpu.matmul %11, %13, %cst_9 {dimension_numbers = #tpu.dot_dimension_numbers<[1], [0], [0], [1], [0, 0, 1, 1], [], []>} : vector<512x4xbf16>, vector<4x8xbf16>, vector<512x8xf32> -> vector<512x8xf32>
    %15 = arith.addf %8, %14 : vector<512x8xf32>
    %16 = vector.extract_strided_slice %0 {offsets = [0, 0, 2, 0], sizes = [2, 16, 16, 4], strides = [1, 1, 1, 1]} : vector<2x18x18x4xf32> to vector<2x16x16x4xf32>
    %17 = vector.shape_cast %16 : vector<2x16x16x4xf32> to vector<512x4xf32>
    %18 = arith.truncf %17 : vector<512x4xf32> to vector<512x4xbf16>
    %c2 = arith.constant 2 : index
    %c0_10 = arith.constant 0 : index
    %c0_11 = arith.constant 0 : index
    %19 = vector.load %arg1[%c2, %c0_10, %c0_11] : memref<9x4x8xbf16, #tpu.memory_space<vmem>>, vector<1x4x8xbf16>
    %20 = vector.shape_cast %19 : vector<1x4x8xbf16> to vector<4x8xbf16>
    %cst_12 = arith.constant dense<0.000000e+00> : vector<512x8xf32>
    %21 = tpu.matmul %18, %20, %cst_12 {dimension_numbers = #tpu.dot_dimension_numbers<[1], [0], [0], [1], [0, 0, 1, 1], [], []>} : vector<512x4xbf16>, vector<4x8xbf16>, vector<512x8xf32> -> vector<512x8xf32>
    %22 = arith.addf %15, %21 : vector<512x8xf32>
    %23 = vector.extract_strided_slice %0 {offsets = [0, 1, 0, 0], sizes = [2, 16, 16, 4], strides = [1, 1, 1, 1]} : vector<2x18x18x4xf32> to vector<2x16x16x4xf32>
    %24 = vector.shape_cast %23 : vector<2x16x16x4xf32> to vector<512x4xf32>
    %25 = arith.truncf %24 : vector<512x4xf32> to vector<512x4xbf16>
    %c3 = arith.constant 3 : index
    %c0_13 = arith.constant 0 : index
    %c0_14 = arith.constant 0 : index
    %26 = vector.load %arg1[%c3, %c0_13, %c0_14] : memref<9x4x8xbf16, #tpu.memory_space<vmem>>, vector<1x4x8xbf16>
    %27 = vector.shape_cast %26 : vector<1x4x8xbf16> to vector<4x8xbf16>
    %cst_15 = arith.constant dense<0.000000e+00> : vector<512x8xf32>
    %28 = tpu.matmul %25, %27, %cst_15 {dimension_numbers = #tpu.dot_dimension_numbers<[1], [0], [0], [1], [0, 0, 1, 1], [], []>} : vector<512x4xbf16>, vector<4x8xbf16>, vector<512x8xf32> -> vector<512x8xf32>
    %29 = arith.addf %22, %28 : vector<512x8xf32>
    %30 = vector.extract_strided_slice %0 {offsets = [0, 1, 1, 0], sizes = [2, 16, 16, 4], strides = [1, 1, 1, 1]} : vector<2x18x18x4xf32> to vector<2x16x16x4xf32>
    %31 = vector.shape_cast %30 : vector<2x16x16x4xf32> to vector<512x4xf32>
    %32 = arith.truncf %31 : vector<512x4xf32> to vector<512x4xbf16>
    %c4 = arith.constant 4 : index
    %c0_16 = arith.constant 0 : index
    %c0_17 = arith.constant 0 : index
    %33 = vector.load %arg1[%c4, %c0_16, %c0_17] : memref<9x4x8xbf16, #tpu.memory_space<vmem>>, vector<1x4x8xbf16>
    %34 = vector.shape_cast %33 : vector<1x4x8xbf16> to vector<4x8xbf16>
    %cst_18 = arith.constant dense<0.000000e+00> : vector<512x8xf32>
    %35 = tpu.matmul %32, %34, %cst_18 {dimension_numbers = #tpu.dot_dimension_numbers<[1], [0], [0], [1], [0, 0, 1, 1], [], []>} : vector<512x4xbf16>, vector<4x8xbf16>, vector<512x8xf32> -> vector<512x8xf32>
    %36 = arith.addf %29, %35 : vector<512x8xf32>
    %37 = vector.extract_strided_slice %0 {offsets = [0, 1, 2, 0], sizes = [2, 16, 16, 4], strides = [1, 1, 1, 1]} : vector<2x18x18x4xf32> to vector<2x16x16x4xf32>
    %38 = vector.shape_cast %37 : vector<2x16x16x4xf32> to vector<512x4xf32>
    %39 = arith.truncf %38 : vector<512x4xf32> to vector<512x4xbf16>
    %c5 = arith.constant 5 : index
    %c0_19 = arith.constant 0 : index
    %c0_20 = arith.constant 0 : index
    %40 = vector.load %arg1[%c5, %c0_19, %c0_20] : memref<9x4x8xbf16, #tpu.memory_space<vmem>>, vector<1x4x8xbf16>
    %41 = vector.shape_cast %40 : vector<1x4x8xbf16> to vector<4x8xbf16>
    %cst_21 = arith.constant dense<0.000000e+00> : vector<512x8xf32>
    %42 = tpu.matmul %39, %41, %cst_21 {dimension_numbers = #tpu.dot_dimension_numbers<[1], [0], [0], [1], [0, 0, 1, 1], [], []>} : vector<512x4xbf16>, vector<4x8xbf16>, vector<512x8xf32> -> vector<512x8xf32>
    %43 = arith.addf %36, %42 : vector<512x8xf32>
    %44 = vector.extract_strided_slice %0 {offsets = [0, 2, 0, 0], sizes = [2, 16, 16, 4], strides = [1, 1, 1, 1]} : vector<2x18x18x4xf32> to vector<2x16x16x4xf32>
    %45 = vector.shape_cast %44 : vector<2x16x16x4xf32> to vector<512x4xf32>
    %46 = arith.truncf %45 : vector<512x4xf32> to vector<512x4xbf16>
    %c6 = arith.constant 6 : index
    %c0_22 = arith.constant 0 : index
    %c0_23 = arith.constant 0 : index
    %47 = vector.load %arg1[%c6, %c0_22, %c0_23] : memref<9x4x8xbf16, #tpu.memory_space<vmem>>, vector<1x4x8xbf16>
    %48 = vector.shape_cast %47 : vector<1x4x8xbf16> to vector<4x8xbf16>
    %cst_24 = arith.constant dense<0.000000e+00> : vector<512x8xf32>
    %49 = tpu.matmul %46, %48, %cst_24 {dimension_numbers = #tpu.dot_dimension_numbers<[1], [0], [0], [1], [0, 0, 1, 1], [], []>} : vector<512x4xbf16>, vector<4x8xbf16>, vector<512x8xf32> -> vector<512x8xf32>
    %50 = arith.addf %43, %49 : vector<512x8xf32>
    %51 = vector.extract_strided_slice %0 {offsets = [0, 2, 1, 0], sizes = [2, 16, 16, 4], strides = [1, 1, 1, 1]} : vector<2x18x18x4xf32> to vector<2x16x16x4xf32>
    %52 = vector.shape_cast %51 : vector<2x16x16x4xf32> to vector<512x4xf32>
    %53 = arith.truncf %52 : vector<512x4xf32> to vector<512x4xbf16>
    %c7 = arith.constant 7 : index
    %c0_25 = arith.constant 0 : index
    %c0_26 = arith.constant 0 : index
    %54 = vector.load %arg1[%c7, %c0_25, %c0_26] : memref<9x4x8xbf16, #tpu.memory_space<vmem>>, vector<1x4x8xbf16>
    %55 = vector.shape_cast %54 : vector<1x4x8xbf16> to vector<4x8xbf16>
    %cst_27 = arith.constant dense<0.000000e+00> : vector<512x8xf32>
    %56 = tpu.matmul %53, %55, %cst_27 {dimension_numbers = #tpu.dot_dimension_numbers<[1], [0], [0], [1], [0, 0, 1, 1], [], []>} : vector<512x4xbf16>, vector<4x8xbf16>, vector<512x8xf32> -> vector<512x8xf32>
    %57 = arith.addf %50, %56 : vector<512x8xf32>
    %58 = vector.extract_strided_slice %0 {offsets = [0, 2, 2, 0], sizes = [2, 16, 16, 4], strides = [1, 1, 1, 1]} : vector<2x18x18x4xf32> to vector<2x16x16x4xf32>
    %59 = vector.shape_cast %58 : vector<2x16x16x4xf32> to vector<512x4xf32>
    %60 = arith.truncf %59 : vector<512x4xf32> to vector<512x4xbf16>
    %c8 = arith.constant 8 : index
    %c0_28 = arith.constant 0 : index
    %c0_29 = arith.constant 0 : index
    %61 = vector.load %arg1[%c8, %c0_28, %c0_29] : memref<9x4x8xbf16, #tpu.memory_space<vmem>>, vector<1x4x8xbf16>
    %62 = vector.shape_cast %61 : vector<1x4x8xbf16> to vector<4x8xbf16>
    %cst_30 = arith.constant dense<0.000000e+00> : vector<512x8xf32>
    %63 = tpu.matmul %60, %62, %cst_30 {dimension_numbers = #tpu.dot_dimension_numbers<[1], [0], [0], [1], [0, 0, 1, 1], [], []>} : vector<512x4xbf16>, vector<4x8xbf16>, vector<512x8xf32> -> vector<512x8xf32>
    %64 = arith.addf %57, %63 : vector<512x8xf32>
    %c0_31 = arith.constant 0 : index
    %c0_32 = arith.constant 0 : index
    %65 = vector.load %arg2[%c0_31, %c0_32] : memref<1x8xf32, #tpu.memory_space<vmem>>, vector<1x8xf32>
    %66 = vector.broadcast %65 : vector<1x8xf32> to vector<512x8xf32>
    %67 = arith.addf %64, %66 : vector<512x8xf32>
    %cst_33 = arith.constant dense<0.000000e+00> : vector<8xf32>
    %68 = vector.multi_reduction <add>, %67, %cst_33 [0] : vector<512x8xf32> to vector<8xf32>
    %69 = vector.shape_cast %68 : vector<8xf32> to vector<1x8xf32>
    %cst_34 = arith.constant 0.001953125 : f32
    %70 = vector.broadcast %cst_34 : f32 to vector<1x8xf32>
    %71 = arith.mulf %69, %70 : vector<1x8xf32>
    %72 = arith.mulf %67, %67 : vector<512x8xf32>
    %cst_35 = arith.constant dense<0.000000e+00> : vector<8xf32>
    %73 = vector.multi_reduction <add>, %72, %cst_35 [0] : vector<512x8xf32> to vector<8xf32>
    %74 = vector.shape_cast %73 : vector<8xf32> to vector<1x8xf32>
    %cst_36 = arith.constant 0.001953125 : f32
    %75 = vector.broadcast %cst_36 : f32 to vector<1x8xf32>
    %76 = arith.mulf %74, %75 : vector<1x8xf32>
    %77 = arith.mulf %71, %71 : vector<1x8xf32>
    %78 = arith.subf %76, %77 : vector<1x8xf32>
    %cst_37 = arith.constant 0.000000e+00 : f32
    %79 = vector.broadcast %cst_37 : f32 to vector<1x8xf32>
    %80 = arith.maximumf %78, %79 : vector<1x8xf32>
    %cst_38 = arith.constant 9.99999974E-6 : f32
    %81 = vector.broadcast %cst_38 : f32 to vector<1x8xf32>
    %82 = arith.addf %80, %81 : vector<1x8xf32>
    %83 = math.rsqrt %82 : vector<1x8xf32>
    %c0_39 = arith.constant 0 : index
    %c0_40 = arith.constant 0 : index
    %84 = vector.load %arg3[%c0_39, %c0_40] : memref<1x8xf32, #tpu.memory_space<vmem>>, vector<1x8xf32>
    %85 = arith.mulf %84, %83 : vector<1x8xf32>
    %c0_41 = arith.constant 0 : index
    %c0_42 = arith.constant 0 : index
    %86 = vector.load %arg4[%c0_41, %c0_42] : memref<1x8xf32, #tpu.memory_space<vmem>>, vector<1x8xf32>
    %87 = arith.mulf %71, %85 : vector<1x8xf32>
    %88 = arith.subf %86, %87 : vector<1x8xf32>
    %89 = vector.broadcast %85 : vector<1x8xf32> to vector<512x8xf32>
    %90 = arith.mulf %67, %89 : vector<512x8xf32>
    %91 = vector.broadcast %88 : vector<1x8xf32> to vector<512x8xf32>
    %92 = arith.addf %90, %91 : vector<512x8xf32>
    %cst_43 = arith.constant 0.000000e+00 : f32
    %93 = vector.broadcast %cst_43 : f32 to vector<512x8xf32>
    %94 = arith.cmpf oge, %92, %93 : vector<512x8xf32>
    %cst_44 = arith.constant 0.00999999977 : f32
    %95 = vector.broadcast %cst_44 : f32 to vector<512x8xf32>
    %96 = arith.mulf %95, %92 : vector<512x8xf32>
    %97 = arith.select %94, %92, %96 : vector<512x8xi1>, vector<512x8xf32>
    %c0_45 = arith.constant 0 : index
    %c0_46 = arith.constant 0 : index
    %98 = vector.load %arg5[%c0_45, %c0_46] : memref<512x8xf32, #tpu.memory_space<vmem>>, vector<512x8xf32>
    tpu.vector_store %arg5[%c0_45, %c0_46], %97 {strides = array<i32>} : memref<512x8xf32, #tpu.memory_space<vmem>>, vector<512x8xf32>,
    return
  }
}

</mosaic_0001>

<bundles_post_ra>
// kernel: convl_forward.1
= control target key start
LH: loop header
LB: loop body
LE: loop exit
PB: predicated region body
PF: predicated region fallthrough
CT: control target
= control target key end

     0   :  { %vm614_vm0 = vcmask 1041408   ;;  %vm258_vm1 = vcmask 1046528   ;;  %vm517_vm2 = vcmask 31744   ;;  %vm1295_vm3 = vcmask 1045504   ;;  %s10533_s1 = inlined_call_operand.vmem [shape: bf16[9,4,8], index: 1, kind: input, shape index: {}]   ;;  %s10534_s0 = inlined_call_operand.vmem [shape: f32[2,18,18,4], index: 0, kind: input, shape index: {}]   ;;  %s10535_s2 = inlined_call_operand.vmem [shape: f32[1,8], index: 2, kind: input, shape index: {}]   ;;  %s10536_s3 = inlined_call_operand.vmem [shape: f32[1,8], index: 3, kind: input, shape index: {}]   ;;  %s10537_s4 = inlined_call_operand.vmem [shape: f32[1,8], index: 4, kind: input, shape index: {}]   ;;  %s10538_s5 = inlined_call_operand.vmem [shape: f32[512,8], index: 5, kind: output, shape index: {}]  }
   0x1   :  { %v5084_v0 = vld [vmem:[%s10533_s1 + $0x2] sm:$0x3]  ;;  %v5215_v1 = vld [vmem:[%s10533_s1 + $0x8] sm:$0x3]  ;;  %v23_v6 = vld [vmem:[%s10534_s0 + $0x10] sm:$0x3] }
   0x2   :  { %v21_v2 = vld [vmem:[%s10534_s0] sm:$0xff]  ;;  %6786 = vmatprep.subr.msk.bf16.mxu1 %vm614_vm0, %v5084_v0  ;;  %6790 = vmatprep.subr.msk.bf16.mxu0 %vm614_vm0, %v5215_v1  ;;  %v616_v3 = vsel %vm614_vm0, %v5084_v0, 0  ;;  %v6857_v4 = vsel %vm614_vm0, %v5215_v1, 0  ;;  %v22_v5 = vld [vmem:[%s10534_s0 + $0x8] sm:$0xff]  ;;  %v262_v9 = vrot.slane %v23_v6, 1  ;;  %v6873_v11 = vld [vmem:[%s10534_s0 + $0x18] sm:$0xff] }
   0x3   :  { %10717 = vst [vmem:[#allocation2_spill] sm:$0xff] %v6857_v4  ;;  %v259_v7 = vrot.slane %v21_v2, 1  ;;  %5679 = vmatpush3.bf16.msra.mxu1 %v616_v3  ;;  %5943 = vmatpush3.bf16.msra.mxu0 %v6857_v4  ;;  %v260_v8 = vrot.slane %v22_v5, 1  ;;  %v161_v10 = vld [vmem:[%s10533_s1] sm:$0x3]  ;;  %v264_v17 = vrot.slane %v6873_v11, 1 }
   0x4   :  { %6787 = vmatprep.subr.msk.bf16.mxu1 %vm614_vm0, %v161_v10  ;;  %v6878_v12 = vld [vmem:[%s10534_s0 + $0x20] sm:$0xff]  ;;  %v6883_v13 = vld [vmem:[%s10534_s0 + $0x28] sm:$0x3]  ;;  %v5248_v18 = vld [vmem:[%s10533_s1 + $0xa] sm:$0x3]  ;;  %v1004_v36 = vsel %vm614_vm0, %v161_v10, 0 }
   0x5   :  { %v261_v14 = vsel %vm258_vm1, %v259_v7, %v260_v8  ;;  %v263_v15 = vsel %vm258_vm1, %v260_v8, %v262_v9  ;;  %v6889_v16 = vpack.c.bf16 %v6878_v12, %v6873_v11  ;;  %v6898_v19 = vld [vmem:[%s10534_s0 + $0x30] sm:$0xff]  ;;  %v6903_v20 = vld [vmem:[%s10534_s0 + $0x38] sm:$0xff]  ;;  %v265_v22 = vrot.slane %v6878_v12, 1  ;;  %6792 = vmatprep.subr.msk.bf16.mxu0 %vm614_vm0, %v5248_v18  ;;  %v6911_v24 = vld [vmem:[%s10534_s0 + $0x40] sm:$0x3] }
   0x6   :  { %v483_v21 = vpack.c.bf16 %v263_v15, %v261_v14  ;;  %v267_v23 = vrot.slane %v6883_v13, 1  ;;  %v269_v25 = vrot.slane %v6898_v19, 1  ;;  %v270_v26 = vrot.slane %v6903_v20, 1  ;;  %v6918_v27 = vld [vmem:[%s10534_s0 + $0x48] sm:$0xff]  ;;  %v6923_v28 = vld [vmem:[%s10534_s0 + $0x50] sm:$0xff]  ;;  %v6937_v33 = vld [vmem:[%s10534_s0 + $0x60] sm:$0xff] }
   0x7   :  { %10718 = vst [vmem:[#allocation3_spill] sm:$0xff] %v6889_v16  ;;  %v266_v29 = vsel %vm258_vm1, %v264_v17, %v265_v22  ;;  %v272_v31 = vrot.slane %v6911_v24, 1  ;;  %v6932_v32 = vld [vmem:[%s10534_s0 + $0x58] sm:$0x3]  ;;  %v6942_v34 = vld [vmem:[%s10534_s0 + $0x68] sm:$0xff]  ;;  %v6959_v40 = vld [vmem:[%s10534_s0 + $0x80] sm:$0xff] }
   0x8   :  { %5680 = vmatprep.mubr.msk.bf16.mxu1 %vm517_vm2, %v483_v21  ;;  %v268_v30 = vsel %vm258_vm1, %v265_v22, %v267_v23  ;;  %v271_v37 = vsel %vm258_vm1, %v269_v25, %v270_v26  ;;  %v6949_v38 = vld [vmem:[%s10534_s0 + $0x70] sm:$0x3]  ;;  %v6954_v39 = vld [vmem:[%s10534_s0 + $0x78] sm:$0xff]  ;;  %v2783_v42 = vsel %vm614_vm0, %v5248_v18, 0  ;;  %v274_v43 = vrot.slane %v6918_v27, 1  ;;  %v7013_v0 = vld [vmem:[%s10534_s0 + $0xa8] sm:$0xff] }
   0x9   :  { %v484_v35 = vpack.c.bf16 %v268_v30, %v266_v29  ;;  %v273_v41 = vsel %vm258_vm1, %v270_v26, %v272_v31  ;;  %v275_v44 = vrot.slane %v6923_v28, 1  ;;  %v6968_v45 = vld [vmem:[%s10534_s0 + $0x88] sm:$0x3]  ;;  %v277_v47 = vrot.slane %v6932_v32, 1  ;;  %v6996_v61 = vld [vmem:[%s10534_s0 + $0x90] sm:$0xff]  ;;  %v7001_v62 = vld [vmem:[%s10534_s0 + $0x98] sm:$0xff] }
   0xa   :  { %v6972_v46 = vpack.c.bf16 %v273_v41, %v271_v37  ;;  %v279_v48 = vrot.slane %v6937_v33, 1  ;;  %v280_v49 = vrot.slane %v6942_v34, 1  ;;  %v282_v51 = vrot.slane %v6949_v38, 1  ;;  %10721 = vst [vmem:[#allocation6_spill] sm:$0xff] %v6996_v61  ;;  %10722 = vst [vmem:[#allocation7_spill] sm:$0xff] %v7001_v62  ;;  %v7018_v1 = vld [vmem:[%s10534_s0 + $0xb0] sm:$0xff] }
   0xb   :  { %5944 = vmatprep.mubr.msk.bf16.mxu0 %vm517_vm2, %v484_v35  ;;  %5681 = vmatmul.mubr.msk.bf16.vlgmr.msra.gmra.mrb[0].mxu1 %vm517_vm2, %v484_v35  ;;  %v276_v50 = vsel %vm258_vm1, %v274_v43, %v275_v44  ;;  %v284_v52 = vrot.slane %v6954_v39, 1  ;;  %v285_v53 = vrot.slane %v6959_v40, 1  ;;  %v278_v54 = vsel %vm258_vm1, %v275_v44, %v277_v47  ;;  %v7006_v63 = vld [vmem:[%s10534_s0 + $0xa0] sm:$0x3]  ;;  %10723 = vst [vmem:[#allocation8_spill] sm:$0xff] %v7013_v0  ;;  %v7055_v23 = vld [vmem:[%s10534_s0 + $0xc8] sm:$0xff] }
   0xc   :  { %10719 = vst [vmem:[#allocation4_spill] sm:$0xff] %v6972_v46  ;;  %5745 = vmatpush3.bf16.msra.mxu1 %v1004_v36  ;;  %5945 = vmatmul.mubr.msk.bf16.vlgmr.msra.gmra.mrb[0].mxu0 %vm517_vm2, %v6972_v46  ;;  %v287_v55 = vrot.slane %v6968_v45, 1  ;;  %v6987_v56 = vpack.c.bf16 %v278_v54, %v276_v50  ;;  %v281_v57 = vsel %vm258_vm1, %v279_v48, %v280_v49  ;;  %10724 = vst [vmem:[#allocation9_spill] sm:$0xff] %v7018_v1  ;;  %v7023_v2 = vld [vmem:[%s10534_s0 + $0xb8] sm:$0x3]  ;;  %v7048_v18 = vld [vmem:[%s10534_s0 + $0xc0] sm:$0xff] }
   0xd   :  { %5684 = vmatprep.mubr.msk.bf16.mxu1 %vm517_vm2, %v6972_v46  ;;  %6009 = vmatpush3.bf16.msra.mxu0 %v2783_v42  ;;  %v283_v58 = vsel %vm258_vm1, %v280_v49, %v282_v51  ;;  %v286_v59 = vsel %vm258_vm1, %v284_v52, %v285_v53  ;;  %v289_v6 = vrot.slane %v6996_v61, 1  ;;  %v290_v7 = vrot.slane %v7001_v62, 1  ;;  %10727 = vst [vmem:[#allocation12_spill] sm:$0xff] %v7048_v18  ;;  %v7060_v25 = vld [vmem:[%s10534_s0 + $0xd0] sm:$0x3]  ;;  %v7070_v29 = vld [vmem:[%s10534_s0 + $0xd8] sm:$0xff] }
   0xe   :  { %10720 = vst [vmem:[#allocation5_spill] sm:$0xff] %v6987_v56  ;;  %v288_v60 = vsel %vm258_vm1, %v285_v53, %v287_v55  ;;  %5948 = vmatprep.mubr.msk.bf16.mxu0 %vm517_vm2, %v6987_v56  ;;  %v7025_v3 = vpack.c.bf16 %v283_v58, %v281_v57  ;;  %v292_v8 = vrot.slane %v7006_v63, 1  ;;  %v294_v9 = vrot.slane %v7013_v0, 1  ;;  %10728 = vst [vmem:[#allocation13_spill] sm:$0xff] %v7055_v23  ;;  %v7065_v26 = vld [vmem:[%s10533_s1 + $0xc] sm:$0x3] }
   0xf   :  { %v7027_v5 = vpack.c.bf16 %v288_v60, %v286_v59  ;;  %v295_v10 = vrot.slane %v7018_v1, 1  ;;  %v297_v14 = vrot.slane %v7023_v2, 1  ;;  %v291_v15 = vsel %vm258_vm1, %v289_v6, %v290_v7  ;;  %10729 = vst [vmem:[#allocation14_spill] sm:$0xff] %v7070_v29  ;;  %v7075_v30 = vld [vmem:[%s10534_s0 + $0xe0] sm:$0xff]  ;;  %v7080_v31 = vld [vmem:[%s10534_s0 + $0xe8] sm:$0x3]  ;;  %6793 = vmatprep.subr.msk.bf16.mxu0 %vm614_vm0, %v7065_v26 }
  0x10   :  { %10725 = vst [vmem:[#allocation10_spill] sm:$0xff] %v7025_v3  ;;  %v293_v17 = vsel %vm258_vm1, %v290_v7, %v292_v8  ;;  %10730 = vst [vmem:[#allocation15_spill] sm:$0xff] %v7075_v30  ;;  %v299_v37 = vrot.slane %v7048_v18, 1  ;;  %v300_v41 = vrot.slane %v7055_v23, 1  ;;  %v302_v42 = vrot.slane %v7060_v25, 1  ;;  %v7109_v52 = vld [vmem:[%s10534_s0 + $0xf0] sm:$0xff] }
  0x11   :  { %10726 = vst [vmem:[#allocation11_spill] sm:$0xff] %v7027_v5  ;;  %v296_v21 = vsel %vm258_vm1, %v294_v9, %v295_v10  ;;  %v298_v22 = vsel %vm258_vm1, %v295_v10, %v297_v14  ;;  %v7084_v35 = vpack.c.bf16 %v293_v17, %v291_v15  ;;  %v304_v43 = vrot.slane %v7070_v29, 1  ;;  %10733 = vst [vmem:[#allocation18_spill] sm:$0xff] %v7109_v52  ;;  %v7114_v53 = vld [vmem:[%s10534_s0 + $0xf8] sm:$0xff]  ;;  %v7119_v54 = vld [vmem:[%s10534_s0 + $0x100] sm:$0x3] }
  0x12   :  { %v7086_v36 = vpack.c.bf16 %v298_v22, %v296_v21  ;;  %v305_v44 = vrot.slane %v7075_v30, 1  ;;  %v307_v47 = vrot.slane %v7080_v31, 1  ;;  %v301_v48 = vsel %vm258_vm1, %v299_v37, %v300_v41  ;;  %10734 = vst [vmem:[#allocation19_spill] sm:$0xff] %v7114_v53  ;;  %v7124_v55 = vld [vmem:[%s10534_s0 + $0x108] sm:$0xff]  ;;  %v7129_v57 = vld [vmem:[%s10534_s0 + $0x110] sm:$0xff]  ;;  %v7159_v21 = vld [vmem:[%s10534_s0 + $0x120] sm:$0xff] }
  0x13   :  { %5685 = vmatmul.mubr.msk.bf16.gmra.mrb[4].mxu1 %vm517_vm2, %v6987_v56  ;;  %10731 = vst [vmem:[#allocation16_spill] sm:$0xff] %v7084_v35  ;;  %v303_v49 = vsel %vm258_vm1, %v300_v41, %v302_v42  ;;  %10735 = vst [vmem:[#allocation20_spill] sm:$0xff] %v7124_v55  ;;  %v7134_v58 = vld [vmem:[%s10534_s0 + $0x118] sm:$0x3]  ;;  %v309_v6 = vrot.slane %v7109_v52, 1  ;;  %v310_v7 = vrot.slane %v7114_v53, 1 }
  0x14   :  { %5688 = vmatprep.mubr.msk.bf16.mxu1 %vm517_vm2, %v7025_v3  ;;  %5949 = vmatmul.mubr.msk.bf16.gmra.mrb[4].mxu0 %vm517_vm2, %v7025_v3  ;;  %10732 = vst [vmem:[#allocation17_spill] sm:$0xff] %v7086_v36  ;;  %v306_v50 = vsel %vm258_vm1, %v304_v43, %v305_v44  ;;  %v308_v51 = vsel %vm258_vm1, %v305_v44, %v307_v47  ;;  %10736 = vst [vmem:[#allocation21_spill] sm:$0xff] %v7129_v57  ;;  %v312_v8 = vrot.slane %v7119_v54, 1  ;;  %v7166_v41 = vld [vmem:[%s10534_s0 + $0x128] sm:$0xff]  ;;  %v7171_v42 = vld [vmem:[%s10534_s0 + $0x130] sm:$0x3] }
  0x15   :  { %5952 = vmatprep.mubr.msk.bf16.mxu0 %vm517_vm2, %v7027_v5  ;;  %v7136_v59 = vpack.c.bf16 %v303_v49, %v301_v48  ;;  %v7138_v60 = vpack.c.bf16 %v308_v51, %v306_v50  ;;  %v314_v9 = vrot.slane %v7124_v55, 1  ;;  %v315_v10 = vrot.slane %v7129_v57, 1  ;;  %v7176_v43 = vld [vmem:[%s10534_s0 + $0x138] sm:$0xff]  ;;  %v7181_v44 = vld [vmem:[%s10534_s0 + $0x140] sm:$0xff]  ;;  %v7186_v47 = vld [vmem:[%s10534_s0 + $0x148] sm:$0x3] }
  0x16   :  { %v317_v14 = vrot.slane %v7134_v58, 1  ;;  %v311_v15 = vsel %vm258_vm1, %v309_v6, %v310_v7  ;;  %v313_v17 = vsel %vm258_vm1, %v310_v7, %v312_v8  ;;  %v7191_v48 = vld [vmem:[%s10533_s1 + $0x4] sm:$0x3]  ;;  %v319_v51 = vrot.slane %v7159_v21, 1  ;;  %v7225_v4 = vld [vmem:[%s10534_s0 + $0x158] sm:$0xff]  ;;  %v7290_v46 = vld [vmem:[%s10534_s0 + $0x188] sm:$0xff] }
  0x17   :  { %10737 = vst [vmem:[#allocation22_spill] sm:$0xff] %v7136_v59  ;;  %10738 = vst [vmem:[#allocation23_spill] sm:$0xff] %v7138_v60  ;;  %v316_v22 = vsel %vm258_vm1, %v314_v9, %v315_v10  ;;  %v7193_v49 = vpack.c.bf16 %v313_v17, %v311_v15  ;;  %6788 = vmatprep.subr.msk.bf16.mxu1 %vm614_vm0, %v7191_v48  ;;  %v320_v6 = vrot.slane %v7166_v41, 1  ;;  %v322_v7 = vrot.slane %v7171_v42, 1  ;;  %v7285_v56 = vld [vmem:[%s10534_s0 + $0x180] sm:$0xff] }
  0x18   :  { %v318_v37 = vsel %vm258_vm1, %v315_v10, %v317_v14  ;;  %10739 = vst [vmem:[#allocation24_spill] sm:$0xff] %v7191_v48  ;;  %v324_v8 = vrot.slane %v7176_v43, 1  ;;  %v325_v9 = vrot.slane %v7181_v44, 1  ;;  %v327_v10 = vrot.slane %v7186_v47, 1  ;;  %10742 = vst [vmem:[#allocation27_spill] sm:$0xff] %v7225_v4 }
  0x19   :  { %10740 = vst [vmem:[#allocation25_spill] sm:$0xff] %v7193_v49  ;;  %v7197_v50 = vpack.c.bf16 %v318_v37, %v316_v22  ;;  %v321_v14 = vsel %vm258_vm1, %v319_v51, %v320_v6  ;;  %v323_v15 = vsel %vm258_vm1, %v320_v6, %v322_v7  ;;  %v7220_v37 = vld [vmem:[%s10534_s0 + $0x150] sm:$0xff]  ;;  %v7230_v51 = vld [vmem:[%s10534_s0 + $0x160] sm:$0x3]  ;;  %v7235_v6 = vld [vmem:[%s10534_s0 + $0x168] sm:$0xff]  ;;  %vm4341_vm4 = vcmask 64512  }
  0x1a   :  { %v326_v17 = vsel %vm258_vm1, %v324_v8, %v325_v9  ;;  %v328_v22 = vsel %vm258_vm1, %v325_v9, %v327_v10  ;;  %10743 = vst [vmem:[#allocation28_spill] sm:$0xff] %v7230_v51  ;;  %10744 = vst [vmem:[#allocation29_spill] sm:$0xff] %v7235_v6  ;;  %v7240_v7 = vld [vmem:[%s10534_s0 + $0x170] sm:$0xff]  ;;  %v7245_v8 = vld [vmem:[%s10534_s0 + $0x178] sm:$0x3]  ;;  %v7247_v9 = vpack.c.bf16 %v323_v15, %v321_v14 }
  0x1b   :  { %5689 = vmatmul.mubr.msk.bf16.gmra.mrb[8].mxu1 %vm517_vm2, %v7027_v5  ;;  %10741 = vst [vmem:[#allocation26_spill] sm:$0xff] %v7197_v50  ;;  %10745 = vst [vmem:[#allocation30_spill] sm:$0xff] %v7240_v7  ;;  %v7249_v10 = vpack.c.bf16 %v328_v22, %v326_v17  ;;  %v337_v5 = vrot.slane %v7245_v8, 1  ;;  %v7266_v14 = vld [vmem:[%s10534_s0 + $0x1b0] sm:$0xff]  ;;  %v7271_v15 = vld [vmem:[%s10534_s0 + $0x1b8] sm:$0xff] }
  0x1c   :  { %5692 = vmatprep.mubr.msk.bf16.mxu1 %vm517_vm2, %v7084_v35  ;;  %5953 = vmatmul.mubr.msk.bf16.gmra.mrb[8].mxu0 %vm517_vm2, %v7084_v35  ;;  %10746 = vst [vmem:[#allocation31_spill] sm:$0xff] %v7245_v8  ;;  %10747 = vst [vmem:[#allocation32_spill] sm:$0xff] %v7247_v9  ;;  %v335_v35 = vrot.slane %v7240_v7, 1  ;;  %v77_v17 = vld [vmem:[%s10534_s0 + $0x1c0] sm:$0x3]  ;;  %v2378_v8 = vrot.slane %v7285_v56, 1 }
  0x1d   :  { %5956 = vmatprep.mubr.msk.bf16.mxu0 %vm517_vm2, %v7086_v36  ;;  %10748 = vst [vmem:[#allocation33_spill] sm:$0xff] %v7249_v10  ;;  %10749 = vst [vmem:[#allocation34_spill] sm:$0xff] %v7266_v14  ;;  %v2379_v7 = vrot.slane %v7290_v46, 1 }
  0x1e   :  { %10750 = vst [vmem:[#allocation35_spill] sm:$0xff] %v7271_v15  ;;  %v338_v3 = vsel %vm258_vm1, %v335_v35, %v337_v5  ;;  %10751 = vst [vmem:[#allocation36_spill] sm:$0xff] %v7285_v56  ;;  %v342_v5 = vrot.slane %v77_v17, 1  ;;  %v1307_v17 = vrot.slane %v6903_v20, 2 }
  0x1f   :  { %10752 = vst [vmem:[#allocation37_spill] sm:$0xff] %v7290_v46  ;;  %v2380_v20 = vsel %vm258_vm1, %v2378_v8, %v2379_v7 }
  0x23   :  { %5693 = vmatmul.mubr.msk.bf16.gmra.mrb[12].mxu1 %vm517_vm2, %v7086_v36  ;;  %v334_v36 = vrot.slane %v7235_v6, 1 }
  0x24   :  { %5696 = vmatprep.mubr.msk.bf16.mxu1 %vm517_vm2, %v7136_v59  ;;  %5957 = vmatmul.mubr.msk.bf16.gmra.mrb[12].mxu0 %vm517_vm2, %v7136_v59  ;;  %v332_v59 = vrot.slane %v7230_v51, 1  ;;  %v1304_v51 = vrot.slane %v6883_v13, 2  ;;  %v7323_v13 = vld [vmem:[%s10534_s0 + $0x1d0] sm:$0xff] }
  0x25   :  { %5960 = vmatprep.mubr.msk.bf16.mxu0 %vm517_vm2, %v7138_v60 }
  0x2b   :  { %5697 = vmatmul.mubr.msk.bf16.gmra.mrb[16].mxu1 %vm517_vm2, %v7138_v60  ;;  %v330_v60 = vrot.slane %v7225_v4, 1 }
  0x2c   :  { %5700 = vmatprep.mubr.msk.bf16.mxu1 %vm517_vm2, %v7193_v49  ;;  %5961 = vmatmul.mubr.msk.bf16.gmra.mrb[16].mxu0 %vm517_vm2, %v7193_v49  ;;  %v329_v49 = vrot.slane %v7220_v37, 1 }
  0x2d   :  { %5964 = vmatprep.mubr.msk.bf16.mxu0 %vm517_vm2, %v7197_v50 }
  0x2e   :  { %v331_v22 = vsel %vm258_vm1, %v329_v49, %v330_v60  ;;  %v7295_v49 = vld [vmem:[%s10534_s0 + $0x190] sm:$0x3] }
  0x2f   :  { %10753 = vst [vmem:[#allocation38_spill] sm:$0xff] %v7295_v49  ;;  %v2381_v6 = vrot.slane %v7295_v49, 1  ;;  %v345_v49 = vrot.slane %v7323_v13, 1 }
  0x33   :  { %5701 = vmatmul.mubr.msk.bf16.gmra.mrb[20].mxu1 %vm517_vm2, %v7197_v50  ;;  %v336_v50 = vsel %vm258_vm1, %v334_v36, %v335_v35  ;;  %v340_v36 = vrot.slane %v7271_v15, 1  ;;  %v1301_v35 = vrot.slane %v6873_v11, 2 }
  0x34   :  { %5704 = vmatprep.mubr.msk.bf16.mxu1 %vm517_vm2, %v7247_v9  ;;  %5965 = vmatmul.mubr.msk.bf16.gmra.mrb[20].mxu0 %vm517_vm2, %v7247_v9  ;;  %v333_v9 = vsel %vm258_vm1, %v330_v60, %v332_v59  ;;  %v339_v59 = vrot.slane %v7266_v14, 1  ;;  %v1302_v60 = vrot.slane %v6878_v12, 2  ;;  %v7303_v48 = vpack.c.bf16 %v338_v3, %v336_v50  ;;  %v7318_v3 = vld [vmem:[%s10534_s0 + $0x1c8] sm:$0xff]  ;;  %v7328_v50 = vld [vmem:[%s10534_s0 + $0x1d8] sm:$0x3] }
  0x35   :  { %5968 = vmatprep.mubr.msk.bf16.mxu0 %vm517_vm2, %v7249_v10  ;;  %v7301_v16 = vpack.c.bf16 %v333_v9, %v331_v22  ;;  %v343_v12 = vsel %vm258_vm1, %v340_v36, %v342_v5  ;;  %v1306_v9 = vrot.slane %v6898_v19, 2  ;;  %v7337_v22 = vld [vmem:[%s10534_s0 + $0x1e0] sm:$0xff]  ;;  %v1309_v19 = vrot.slane %v6911_v24, 2 }
  0x36   :  { %10755 = vst [vmem:[#allocation40_spill] sm:$0xff] %v7303_v48  ;;  %v341_v11 = vsel %vm258_vm1, %v339_v59, %v340_v36  ;;  %v7342_v59 = vld [vmem:[%s10534_s0 + $0x1e8] sm:$0xff]  ;;  %v7347_v36 = vld [vmem:[%s10534_s0 + $0x1f0] sm:$0x3]  ;;  %v2382_v5 = vsel %vm258_vm1, %v2379_v7, %v2381_v6  ;;  %v1305_v15 = vsel %vm1295_vm3, %v1302_v60, %v1304_v51  ;;  %v344_v14 = vrot.slane %v7318_v3, 1 }
  0x37   :  { %10754 = vst [vmem:[#allocation39_spill] sm:$0xff] %v7301_v16  ;;  %v347_v46 = vrot.slane %v7328_v50, 1  ;;  %v349_v24 = vrot.slane %v7337_v22, 1  ;;  %v350_v56 = vrot.slane %v7342_v59, 1  ;;  %v352_v4 = vrot.slane %v7347_v36, 1 }
  0x38   :  { %v7362_v8 = vpack.c.bf16 %v2382_v5, %v2380_v20  ;;  %v1311_v6 = vrot.slane %v6918_v27, 2  ;;  %v1312_v7 = vrot.slane %v6923_v28, 2  ;;  %v1314_v51 = vrot.slane %v6932_v32, 2  ;;  %v7382_v27 = vld [vmem:[%s10534_s0 + $0x208] sm:$0x3]  ;;  %v7396_v5 = vld [vmem:[%s10534_s0 + $0x210] sm:$0xff] }
  0x39   :  { %10759 = vst [vmem:[#allocation44_spill] sm:$0xff] %v7382_v27  ;;  %v1310_v28 = vsel %vm1295_vm3, %v1307_v17, %v1309_v19  ;;  %v346_v32 = vsel %vm258_vm1, %v344_v14, %v345_v49  ;;  %v353_v20 = vsel %vm258_vm1, %v350_v56, %v352_v4  ;;  %v7407_v4 = vld [vmem:[%s10534_s0 + $0x218] sm:$0xff]  ;;  %v1317_v19 = vrot.slane %v6942_v34, 2 }
  0x3a   :  { %10756 = vst [vmem:[#allocation41_spill] sm:$0xff] %v7362_v8 }
  0x3b   :  { %5705 = vmatmul.mubr.msk.bf16.gmra.mrb[24].mxu1 %vm517_vm2, %v7249_v10  ;;  %v499_v10 = vpack.c.bf16 %v343_v12, %v341_v11  ;;  %v7377_v11 = vld [vmem:[%s10534_s0 + $0x200] sm:$0xff]  ;;  %v351_v12 = vsel %vm258_vm1, %v349_v24, %v350_v56  ;;  %v1319_v24 = vrot.slane %v6949_v38, 2  ;;  %v3149_v38 = vsel %vm614_vm0, %v7065_v26, 0 }
  0x3c   :  { %5708 = vmatprep.mubr.msk.bf16.mxu1 %vm517_vm2, %v7301_v16  ;;  %5969 = vmatmul.mubr.msk.bf16.gmra.mrb[24].mxu0 %vm517_vm2, %v7301_v16  ;;  %v1303_v16 = vsel %vm1295_vm3, %v1301_v35, %v1302_v60  ;;  %v7372_v60 = vld [vmem:[%s10534_s0 + $0x1f8] sm:$0xff]  ;;  %10758 = vst [vmem:[#allocation43_spill] sm:$0xff] %v7377_v11  ;;  %v355_v14 = vrot.slane %v7377_v11, 1  ;;  %v7412_v56 = vld [vmem:[%s10534_s0 + $0x220] sm:$0x3] }
  0x3d   :  { %5972 = vmatprep.mubr.msk.bf16.mxu0 %vm517_vm2, %v7303_v48  ;;  %v7366_v35 = vpack.c.bf16 %v1305_v15, %v1303_v16  ;;  %v1308_v16 = vsel %vm1295_vm3, %v1306_v9, %v1307_v17  ;;  %v348_v15 = vsel %vm258_vm1, %v345_v49, %v347_v46  ;;  %v1313_v9 = vsel %vm1295_vm3, %v1311_v6, %v1312_v7  ;;  %v7456_v26 = vld [vmem:[%s10534_s0 + $0x240] sm:$0xff] }
  0x3e   :  { %v357_v46 = vrot.slane %v7382_v27, 1  ;;  %v1315_v49 = vsel %vm1295_vm3, %v1312_v7, %v1314_v51  ;;  %v1316_v17 = vrot.slane %v6937_v33, 2  ;;  %v7420_v6 = vpack.c.bf16 %v348_v15, %v346_v32  ;;  %v7430_v7 = vld [vmem:[%s10534_s0 + $0x228] sm:$0xff]  ;;  %v7435_v33 = vld [vmem:[%s10534_s0 + $0x230] sm:$0xff]  ;;  %v7447_v15 = vld [vmem:[%s10534_s0 + $0x238] sm:$0x3] }
  0x3f   :  { %10757 = vst [vmem:[#allocation42_spill] sm:$0xff] %v7366_v35  ;;  %v360_v27 = vrot.slane %v7407_v4, 1  ;;  %v362_v11 = vrot.slane %v7412_v56, 1  ;;  %v7437_v34 = vpack.c.bf16 %v1310_v28, %v1308_v16  ;;  %v7441_v51 = vpack.c.bf16 %v1315_v49, %v1313_v9  ;;  %10764 = vst [vmem:[#allocation49_spill] sm:$0xff] %v7447_v15  ;;  %v7461_v28 = vld [vmem:[%s10534_s0 + $0x248] sm:$0xff] }
  0x40   :  { %10760 = vst [vmem:[#allocation45_spill] sm:$0xff] %v7420_v6  ;;  %v1321_v16 = vrot.slane %v6954_v39, 2  ;;  %v1322_v9 = vrot.slane %v6959_v40, 2  ;;  %v365_v39 = vrot.slane %v7435_v33, 1  ;;  %v367_v40 = vrot.slane %v7447_v15, 1 }
  0x41   :  { %10762 = vst [vmem:[#allocation47_spill] sm:$0xff] %v7437_v34  ;;  %10763 = vst [vmem:[#allocation48_spill] sm:$0xff] %v7441_v51 }
  0x43   :  { %5709 = vmatmul.mubr.msk.bf16.gmra.mrb[28].mxu1 %vm517_vm2, %v7303_v48  ;;  %v359_v48 = vrot.slane %v7396_v5, 1 }
  0x44   :  { %5712 = vmatprep.mubr.msk.bf16.mxu1 %vm517_vm2, %v499_v10  ;;  %5973 = vmatmul.mubr.msk.bf16.gmra.mrb[28].mxu0 %vm517_vm2, %v7362_v8  ;;  %v354_v10 = vrot.slane %v7372_v60, 1  ;;  %v7422_v8 = vpack.c.bf16 %v353_v20, %v351_v12  ;;  %v358_v12 = vsel %vm258_vm1, %v355_v14, %v357_v46  ;;  %v1318_v20 = vsel %vm1295_vm3, %v1316_v17, %v1317_v19  ;;  %v7472_v46 = vld [vmem:[%s10534_s0 + $0x250] sm:$0x3] }
  0x45   :  { %6010 = vmatprep.mubr.msk.bf16.mxu0 %vm517_vm2, %v7366_v35  ;;  %v1320_v35 = vsel %vm1295_vm3, %v1317_v19, %v1319_v24  ;;  %v361_v49 = vsel %vm258_vm1, %v359_v48, %v360_v27  ;;  %v363_v17 = vsel %vm258_vm1, %v360_v27, %v362_v11  ;;  %v1326_v24 = vrot.slane %v6996_v61, 2 }
  0x46   :  { %10761 = vst [vmem:[#allocation46_spill] sm:$0xff] %v7422_v8  ;;  %v356_v32 = vsel %vm258_vm1, %v354_v10, %v355_v14  ;;  %v1324_v10 = vrot.slane %v6968_v45, 2  ;;  %v364_v14 = vrot.slane %v7430_v7, 1  ;;  %v7482_v45 = vld [vmem:[%s10533_s1 + $0xe] sm:$0x3]  ;;  %v1329_v48 = vrot.slane %v7006_v63, 2 }
  0x47   :  { %10765 = vst [vmem:[#allocation50_spill] sm:$0xff] %v7482_v45  ;;  %v7486_v19 = vpack.c.bf16 %v358_v12, %v356_v32  ;;  %v7493_v11 = vpack.c.bf16 %v1320_v35, %v1318_v20  ;;  %v369_v27 = vrot.slane %v7456_v26, 1  ;;  %v7501_v32 = vld [vmem:[%s10534_s0 + $0x258] sm:$0xff]  ;;  %v7506_v63 = vld [vmem:[%s10534_s0 + $0x260] sm:$0xff]  ;;  %v1323_v35 = vsel %vm1295_vm3, %v1321_v16, %v1322_v9 }
  0x48   :  { %v1325_v12 = vsel %vm1295_vm3, %v1322_v9, %v1324_v10  ;;  %v366_v20 = vsel %vm258_vm1, %v364_v14, %v365_v39  ;;  %v1331_v61 = vrot.slane %v7013_v0, 2  ;;  %v1334_v16 = vrot.slane %v7023_v2, 2 }
  0x49   :  { %10766 = vst [vmem:[#allocation51_spill] sm:$0xff] %v7486_v19  ;;  %10767 = vst [vmem:[#allocation52_spill] sm:$0xff] %v7493_v11  ;;  %v374_v14 = vrot.slane %v7501_v32, 1  ;;  %v7528_v15 = vpack.c.bf16 %v1325_v12, %v1323_v35  ;;  %v1337_v35 = vrot.slane %v7055_v23, 2  ;;  %v101_v12 = vld [vmem:[%s10534_s0 + $0x280] sm:$0x3] }
  0x4b   :  { %5713 = vmatmul.mubr.msk.bf16.gmra.mrb[32].mxu1 %vm517_vm2, %v7420_v6  ;;  %v1327_v6 = vrot.slane %v7001_v62, 2  ;;  %v368_v62 = vsel %vm258_vm1, %v365_v39, %v367_v40  ;;  %10769 = vst [vmem:[#allocation54_spill] sm:$0xff] %v7528_v15 }
  0x4c   :  { %5716 = vmatprep.mubr.msk.bf16.mxu1 %vm517_vm2, %v7422_v8  ;;  %6011 = vmatmul.mubr.msk.bf16.vlgmr.msra.gmra.mrb[0].mxu0 %vm517_vm2, %v7437_v34  ;;  %v370_v8 = vrot.slane %v7461_v28, 1  ;;  %v372_v34 = vrot.slane %v7472_v46, 1  ;;  %v7537_v2 = vpack.c.bf16 %v368_v62, %v366_v20 }
  0x4d   :  { %6075 = vmatpush3.bf16.msra.mxu0 %v3149_v38  ;;  %6014 = vmatprep.mubr.msk.bf16.mxu0 %vm517_vm2, %v7441_v51  ;;  %v7508_v38 = vpack.c.bf16 %v363_v17, %v361_v49  ;;  %v7516_v51 = vld [vmem:[%s10534_s0 + $0x268] sm:$0x3]  ;;  %v1332_v49 = vrot.slane %v7018_v1, 2  ;;  %v1328_v9 = vsel %vm1295_vm3, %v1326_v24, %v1327_v6  ;;  %v1330_v10 = vsel %vm1295_vm3, %v1327_v6, %v1329_v48 }
  0x4e   :  { %6794 = vmatprep.subr.msk.bf16.mxu0 %vm614_vm0, %v7482_v45  ;;  %v375_v17 = vrot.slane %v7506_v63, 1  ;;  %v371_v45 = vsel %vm258_vm1, %v369_v27, %v370_v8  ;;  %v373_v39 = vsel %vm258_vm1, %v370_v8, %v372_v34  ;;  %v377_v40 = vrot.slane %v7516_v51, 1  ;;  %10770 = vst [vmem:[#allocation55_spill] sm:$0xff] %v7537_v2  ;;  %v7546_v8 = vld [vmem:[%s10534_s0 + $0x270] sm:$0xff]  ;;  %v7551_v34 = vld [vmem:[%s10534_s0 + $0x278] sm:$0xff] }
  0x4f   :  { %10768 = vst [vmem:[#allocation53_spill] sm:$0xff] %v7508_v38  ;;  %v7539_v6 = vpack.c.bf16 %v1330_v10, %v1328_v9  ;;  %v1333_v24 = vsel %vm1295_vm3, %v1331_v61, %v1332_v49  ;;  %v1335_v48 = vsel %vm1295_vm3, %v1332_v49, %v1334_v16  ;;  %v7555_v62 = vpack.c.bf16 %v373_v39, %v371_v45 }
  0x50   :  { %v376_v27 = vsel %vm258_vm1, %v374_v14, %v375_v17  ;;  %v1336_v61 = vrot.slane %v7048_v18, 2  ;;  %v378_v20 = vsel %vm258_vm1, %v375_v17, %v377_v40  ;;  %v1339_v49 = vrot.slane %v7060_v25, 2  ;;  %v7579_v25 = vld [vmem:[%s10534_s0 + $0x288] sm:$0xff]  ;;  %v7584_v17 = vld [vmem:[%s10534_s0 + $0x290] sm:$0xff] }
  0x51   :  { %10771 = vst [vmem:[#allocation56_spill] sm:$0xff] %v7539_v6  ;;  %10772 = vst [vmem:[#allocation57_spill] sm:$0xff] %v7555_v62  ;;  %v1406_v45 = vrot.slane %v7456_v26, 2  ;;  %v1407_v16 = vrot.slane %v7461_v28, 2  ;;  %v7569_v9 = vpack.c.bf16 %v1335_v48, %v1333_v24  ;;  %v379_v10 = vrot.slane %v7546_v8, 1 }
  0x52   :  { %v380_v14 = vrot.slane %v7551_v34, 1  ;;  %v1409_v39 = vrot.slane %v7472_v46, 2  ;;  %v7587_v24 = vpack.c.bf16 %v378_v20, %v376_v27  ;;  %v1338_v46 = vsel %vm1295_vm3, %v1336_v61, %v1337_v35 }
  0x53   :  { %5717 = vmatmul.mubr.msk.bf16.gmra.mrb[36].mxu1 %vm517_vm2, %v7486_v19  ;;  %10773 = vst [vmem:[#allocation58_spill] sm:$0xff] %v7569_v9  ;;  %v1341_v19 = vrot.slane %v7070_v29, 2  ;;  %v1408_v40 = vsel %vm1295_vm3, %v1406_v45, %v1407_v16  ;;  %v1344_v48 = vrot.slane %v7080_v31, 2  ;;  %v1416_v23 = vrot.slane %v7546_v8, 2 }
  0x54   :  { %5720 = vmatprep.mubr.msk.bf16.mxu1 %vm517_vm2, %v7508_v38  ;;  %6015 = vmatmul.mubr.msk.bf16.gmra.mrb[4].mxu0 %vm517_vm2, %v7493_v11  ;;  %v382_v38 = vrot.slane %v101_v12, 1  ;;  %10774 = vst [vmem:[#allocation59_spill] sm:$0xff] %v7587_v24  ;;  %v1410_v11 = vsel %vm1295_vm3, %v1407_v16, %v1409_v39  ;;  %v1417_v18 = vrot.slane %v7551_v34, 2  ;;  %v1419_v45 = vrot.slane %v101_v12, 2  ;;  %v7614_v12 = vld [vmem:[%s10534_s0 + $0x2a0] sm:$0xff] }
  0x55   :  { %6018 = vmatprep.mubr.msk.bf16.mxu0 %vm517_vm2, %v7528_v15  ;;  %v1342_v15 = vrot.slane %v7075_v30, 2  ;;  %v7595_v30 = vld [vmem:[%s10534_s0 + $0x298] sm:$0x3]  ;;  %v7597_v29 = vpack.c.bf16 %v1410_v11, %v1408_v40  ;;  %v1340_v27 = vsel %vm1295_vm3, %v1337_v35, %v1339_v49  ;;  %v381_v31 = vsel %vm258_vm1, %v379_v10, %v380_v14 }
  0x56   :  { %v384_v61 = vrot.slane %v7579_v25, 1  ;;  %v385_v20 = vrot.slane %v7584_v17, 1  ;;  %v383_v11 = vsel %vm258_vm1, %v380_v14, %v382_v38  ;;  %v1418_v35 = vsel %vm1295_vm3, %v1416_v23, %v1417_v18  ;;  %v107_v38 = vld [vmem:[%s10534_s0 + $0x2b0] sm:$0x3] }
  0x57   :  { %10775 = vst [vmem:[#allocation60_spill] sm:$0xff] %v7597_v29  ;;  %v1343_v16 = vsel %vm1295_vm3, %v1341_v19, %v1342_v15  ;;  %v1420_v49 = vsel %vm1295_vm3, %v1417_v18, %v1419_v45  ;;  %v1345_v10 = vsel %vm1295_vm3, %v1342_v15, %v1344_v48  ;;  %v387_v39 = vrot.slane %v7595_v30, 1  ;;  %v7625_v19 = vld [vmem:[%s10534_s0 + $0x2a8] sm:$0xff] }
  0x58   :  { %v7630_v14 = vpack.c.bf16 %v1420_v49, %v1418_v35  ;;  %v1426_v18 = vrot.slane %v7614_v12, 2  ;;  %v1346_v23 = vrot.slane %v7109_v52, 2  ;;  %v1347_v15 = vrot.slane %v7114_v53, 2 }
  0x59   :  { %v1427_v40 = vrot.slane %v7625_v19, 2  ;;  %v1429_v48 = vrot.slane %v107_v38, 2  ;;  %v7638_v45 = vpack.c.bf16 %v1340_v27, %v1338_v46  ;;  %v1349_v35 = vrot.slane %v7119_v54, 2  ;;  %v7658_v54 = vld [vmem:[%s10534_s0 + $0x2d8] sm:$0xff] }
  0x5a   :  { %10776 = vst [vmem:[#allocation61_spill] sm:$0xff] %v7630_v14  ;;  %v7644_v49 = vpack.c.bf16 %v1345_v10, %v1343_v16  ;;  %v390_v27 = vrot.slane %v7625_v19, 1  ;;  %v388_v10 = vsel %vm258_vm1, %v385_v20, %v387_v39  ;;  %v7683_v39 = vld [vmem:[%s10534_s0 + $0x2c0] sm:$0xff] }
  0x5b   :  { %5721 = vmatmul.mubr.msk.bf16.gmra.mrb[40].mxu1 %vm517_vm2, %v7537_v2  ;;  %10777 = vst [vmem:[#allocation62_spill] sm:$0xff] %v7638_v45  ;;  %v386_v2 = vsel %vm258_vm1, %v384_v61, %v385_v20  ;;  %v1428_v53 = vsel %vm1295_vm3, %v1426_v18, %v1427_v40  ;;  %v1430_v46 = vsel %vm1295_vm3, %v1427_v40, %v1429_v48  ;;  %v113_v61 = vld [vmem:[%s10534_s0 + $0x2e0] sm:$0x3]  ;;  %v1437_v40 = vrot.slane %v7658_v54, 2 }
  0x5c   :  { %5724 = vmatprep.mubr.msk.bf16.mxu1 %vm517_vm2, %v7555_v62  ;;  %6019 = vmatmul.mubr.msk.bf16.gmra.mrb[8].mxu0 %vm517_vm2, %v7539_v6  ;;  %v7640_v62 = vpack.c.bf16 %v383_v11, %v381_v31  ;;  %10779 = vst [vmem:[#allocation64_spill] sm:$0xff] %v7644_v49  ;;  %v389_v6 = vrot.slane %v7614_v12, 1  ;;  %v392_v31 = vrot.slane %v107_v38, 1  ;;  %v7663_v11 = vpack.c.bf16 %v1430_v46, %v1428_v53  ;;  %v7671_v38 = vld [vmem:[%s10534_s0 + $0x2b8] sm:$0xff] }
  0x5d   :  { %6022 = vmatprep.mubr.msk.bf16.mxu0 %vm517_vm2, %v7569_v9  ;;  %v7650_v9 = vld [vmem:[%s10534_s0 + $0x2d0] sm:$0xff]  ;;  %v1348_v18 = vsel %vm1295_vm3, %v1346_v23, %v1347_v15  ;;  %v1439_v48 = vrot.slane %v113_v61, 2  ;;  %v1350_v53 = vsel %vm1295_vm3, %v1347_v15, %v1349_v35  ;;  %v1351_v46 = vrot.slane %v7124_v55, 2  ;;  %v7688_v23 = vld [vmem:[%s10534_s0 + $0x300] sm:$0xff]  ;;  %v7693_v15 = vld [vmem:[%s10534_s0 + $0x308] sm:$0xff] }
  0x5e   :  { %10778 = vst [vmem:[#allocation63_spill] sm:$0xff] %v7640_v62  ;;  %10780 = vst [vmem:[#allocation65_spill] sm:$0xff] %v7663_v11  ;;  %v1436_v16 = vrot.slane %v7650_v9, 2  ;;  %v1352_v11 = vrot.slane %v7129_v57, 2  ;;  %v1354_v20 = vrot.slane %v7134_v58, 2  ;;  %v1446_v55 = vrot.slane %v7688_v23, 2 }
  0x5f   :  { %v7700_v58 = vld [vmem:[%s10534_s0 + $0x2c8] sm:$0x3]  ;;  %v7705_v35 = vld [vmem:[%s10534_s0 + $0x310] sm:$0x3]  ;;  %v1440_v57 = vsel %vm1295_vm3, %v1437_v40, %v1439_v48  ;;  %v1447_v52 = vrot.slane %v7693_v15, 2  ;;  %v393_v14 = vsel %vm258_vm1, %v390_v27, %v392_v31  ;;  %v395_v48 = vrot.slane %v7683_v39, 1 }
  0x60   :  { %v1449_v0 = vrot.slane %v7705_v35, 2 }
  0x61   :  { %v1448_v29 = vsel %vm1295_vm3, %v1446_v55, %v1447_v52  ;;  %v400_v55 = vrot.slane %v7658_v54, 1 }
  0x63   :  { %5725 = vmatmul.mubr.msk.bf16.gmra.mrb[44].mxu1 %vm517_vm2, %v7587_v24  ;;  %v1438_v24 = vsel %vm1295_vm3, %v1436_v16, %v1437_v40  ;;  %v7720_v16 = vpack.c.bf16 %v388_v10, %v386_v2  ;;  %v394_v40 = vrot.slane %v7671_v38, 1  ;;  %v1356_v10 = vrot.slane %v7159_v21, 2 }
  0x64   :  { %5728 = vmatprep.mubr.msk.bf16.mxu1 %vm517_vm2, %v7640_v62  ;;  %6023 = vmatmul.mubr.msk.bf16.gmra.mrb[12].mxu0 %vm517_vm2, %v7638_v45  ;;  %v391_v62 = vsel %vm258_vm1, %v389_v6, %v390_v27  ;;  %v7715_v1 = vpack.c.bf16 %v1440_v57, %v1438_v24  ;;  %v1353_v45 = vsel %vm1295_vm3, %v1351_v46, %v1352_v11  ;;  %v397_v57 = vrot.slane %v7700_v58, 1 }
  0x65   :  { %6026 = vmatprep.mubr.msk.bf16.mxu0 %vm517_vm2, %v7644_v49  ;;  %10782 = vst [vmem:[#allocation67_spill] sm:$0xff] %v7720_v16  ;;  %v1355_v6 = vsel %vm1295_vm3, %v1352_v11, %v1354_v20  ;;  %v1450_v24 = vsel %vm1295_vm3, %v1447_v52, %v1449_v0  ;;  %v7729_v27 = vpack.c.bf16 %v1350_v53, %v1348_v18  ;;  %v399_v49 = vrot.slane %v7650_v9, 1 }
  0x66   :  { %10781 = vst [vmem:[#allocation66_spill] sm:$0xff] %v7715_v1  ;;  %v7731_v31 = vpack.c.bf16 %v393_v14, %v391_v62  ;;  %v7733_v2 = vpack.c.bf16 %v1450_v24, %v1448_v29  ;;  %v402_v1 = vrot.slane %v113_v61, 1  ;;  %v7738_v46 = vpack.c.bf16 %v1355_v6, %v1353_v45 }
  0x67   :  { %10783 = vst [vmem:[#allocation68_spill] sm:$0xff] %v7729_v27  ;;  %v396_v11 = vsel %vm258_vm1, %v394_v40, %v395_v48  ;;  %v1357_v20 = vrot.slane %v7166_v41, 2  ;;  %v1359_v0 = vrot.slane %v7171_v42, 2  ;;  %v398_v29 = vsel %vm258_vm1, %v395_v48, %v397_v57 }
  0x68   :  { %10784 = vst [vmem:[#allocation69_spill] sm:$0xff] %v7731_v31  ;;  %10785 = vst [vmem:[#allocation70_spill] sm:$0xff] %v7738_v46  ;;  %v1361_v52 = vrot.slane %v7176_v43, 2  ;;  %v1362_v62 = vrot.slane %v7181_v44, 2  ;;  %v1364_v14 = vrot.slane %v7186_v47, 2  ;;  %v7753_v45 = vpack.c.bf16 %v7435_v33, %v7430_v7 }
  0x69   :  { %v7757_v42 = vpack.c.bf16 %v7461_v28, %v7456_v26  ;;  %v7761_v61 = vpack.c.bf16 %v7506_v63, %v7501_v32  ;;  %v7765_v18 = vpack.c.bf16 %v7551_v34, %v7546_v8  ;;  %v401_v47 = vsel %vm258_vm1, %v399_v49, %v400_v55  ;;  %v7774_v26 = vld [vmem:[%s10534_s0 + $0x2e8] sm:$0xff]  ;;  %v7779_v28 = vld [vmem:[%s10534_s0 + $0x2f0] sm:$0xff]  ;;  %v7784_v8 = vld [vmem:[%s10534_s0 + $0x2f8] sm:$0x3] }
  0x6a   :  { %v403_v53 = vsel %vm258_vm1, %v400_v55, %v402_v1  ;;  %v7788_v34 = vpack.c.bf16 %v7584_v17, %v7579_v25  ;;  %v7792_v1 = vpack.c.bf16 %v7625_v19, %v7614_v12  ;;  %v1358_v49 = vsel %vm1295_vm3, %v1356_v10, %v1357_v20 }
  0x6b   :  { %5729 = vmatmul.mubr.msk.bf16.gmra.mrb[48].mxu1 %vm517_vm2, %v7720_v16  ;;  %10786 = vst [vmem:[#allocation71_spill] sm:$0xff] %v7765_v18  ;;  %v1360_v40 = vsel %vm1295_vm3, %v1357_v20, %v1359_v0  ;;  %v7800_v48 = vpack.c.bf16 %v7683_v39, %v7671_v38  ;;  %v7802_v6 = vpack.c.bf16 %v398_v29, %v396_v11  ;;  %v404_v12 = vrot.slane %v7774_v26, 1  ;;  %v10796_v16 = vld [vmem:[#allocation29_spill] sm:$0xff] }
  0x6c   :  { %5732 = vmatprep.mubr.msk.bf16.mxu1 %vm517_vm2, %v7731_v31  ;;  %6027 = vmatmul.mubr.msk.bf16.gmra.mrb[16].mxu0 %vm517_vm2, %v7729_v27  ;;  %10787 = vst [vmem:[#allocation72_spill] sm:$0xff] %v7788_v34  ;;  %10788 = vst [vmem:[#allocation73_spill] sm:$0xff] %v7792_v1  ;;  %v1363_v57 = vsel %vm1295_vm3, %v1361_v52, %v1362_v62  ;;  %v1365_v24 = vsel %vm1295_vm3, %v1362_v62, %v1364_v14  ;;  %v405_v19 = vrot.slane %v7779_v28, 1  ;;  %v10794_v62 = vld [vmem:[#allocation27_spill] sm:$0xff] }
  0x6d   :  { %6030 = vmatprep.mubr.msk.bf16.mxu0 %vm517_vm2, %v7738_v46  ;;  %10789 = vst [vmem:[#allocation74_spill] sm:$0xff] %v7800_v48  ;;  %10790 = vst [vmem:[#allocation75_spill] sm:$0xff] %v7802_v6  ;;  %v7806_v55 = vpack.c.bf16 %v403_v53, %v401_v47  ;;  %v407_v10 = vrot.slane %v7784_v8, 1  ;;  %v7811_v31 = vpack.c.bf16 %v1360_v40, %v1358_v49  ;;  %v409_v20 = vrot.slane %v7688_v23, 1  ;;  %v10795_v47 = vld [vmem:[#allocation28_spill] sm:$0xff]  ;;  %v10797_v40 = vld [vmem:[#allocation30_spill] sm:$0xff] }
  0x6e   :  { %v410_v0 = vrot.slane %v7693_v15, 1  ;;  %v412_v11 = vrot.slane %v7705_v35, 1  ;;  %v7816_v29 = vpack.c.bf16 %v1365_v24, %v1363_v57  ;;  %v1366_v52 = vrot.slane %v7220_v37, 2  ;;  %v10798_v27 = vld [vmem:[#allocation31_spill] sm:$0xff] }
  0x6f   :  { %10791 = vst [vmem:[#allocation76_spill] sm:$0xff] %v7806_v55  ;;  %10792 = vst [vmem:[#allocation77_spill] sm:$0xff] %v7811_v31  ;;  %v1367_v14 = vrot.slane %v10794_v62, 2  ;;  %v1369_v53 = vrot.slane %v10795_v47, 2  ;;  %v1371_v49 = vrot.slane %v10796_v16, 2  ;;  %v1372_v46 = vrot.slane %v10797_v40, 2 }
  0x70   :  { %10793 = vst [vmem:[#allocation78_spill] sm:$0xff] %v7816_v29  ;;  %v1374_v48 = vrot.slane %v10798_v27, 2  ;;  %v406_v35 = vsel %vm258_vm1, %v404_v12, %v405_v19  ;;  %v408_v57 = vsel %vm258_vm1, %v405_v19, %v407_v10  ;;  %v411_v24 = vsel %vm258_vm1, %v409_v20, %v410_v0  ;;  %v7842_v27 = vld [vmem:[%s10534_s0 + $0x320] sm:$0xff]  ;;  %v7847_v12 = vld [vmem:[%s10534_s0 + $0x328] sm:$0x3] }
  0x71   :  { %v413_v47 = vsel %vm258_vm1, %v410_v0, %v412_v11  ;;  %v7851_v19 = vpack.c.bf16 %v7658_v54, %v7650_v9  ;;  %v1368_v10 = vsel %vm1295_vm3, %v1366_v52, %v1367_v14  ;;  %v1370_v20 = vsel %vm1295_vm3, %v1367_v14, %v1369_v53  ;;  %v10804_v53 = vld [vmem:[#allocation36_spill] sm:$0xff] }
  0x72   :  { %v7859_v0 = vpack.c.bf16 %v7779_v28, %v7774_v26  ;;  %v7861_v11 = vpack.c.bf16 %v408_v57, %v406_v35  ;;  %v7865_v1 = vpack.c.bf16 %v413_v47, %v411_v24  ;;  %v415_v54 = vrot.slane %v7842_v27, 1  ;;  %v10805_v35 = vld [vmem:[#allocation37_spill] sm:$0xff] }
  0x73   :  { %5733 = vmatmul.mubr.msk.bf16.gmra.mrb[52].mxu1 %vm517_vm2, %v7802_v6  ;;  %v7837_v6 = vld [vmem:[%s10534_s0 + $0x318] sm:$0xff]  ;;  %10799 = vst [vmem:[#allocation27_spill] sm:$0xff] %v7851_v19  ;;  %v417_v52 = vrot.slane %v7847_v12, 1  ;;  %v2759_v57 = vrot.slane %v10805_v35, 2  ;;  %v10806_v19 = vld [vmem:[#allocation38_spill] sm:$0xff]  ;;  %v1384_v24 = vrot.slane %v7328_v50, 2  ;;  %v7890_v47 = vpack.c.bf16 %v7693_v15, %v7688_v23 }
  0x74   :  { %5736 = vmatprep.mubr.msk.bf16.mxu1 %vm517_vm2, %v7806_v55  ;;  %6031 = vmatmul.mubr.msk.bf16.gmra.mrb[20].mxu0 %vm517_vm2, %v7811_v31  ;;  %10800 = vst [vmem:[#allocation28_spill] sm:$0xff] %v7859_v0  ;;  %10801 = vst [vmem:[#allocation29_spill] sm:$0xff] %v7861_v11  ;;  %v1373_v55 = vsel %vm1295_vm3, %v1371_v49, %v1372_v46  ;;  %v1375_v31 = vsel %vm1295_vm3, %v1372_v46, %v1374_v48  ;;  %v414_v9 = vrot.slane %v7837_v6, 1  ;;  %v7907_v23 = vld [vmem:[%s10534_s0] sm:$0xff]  ;;  %v7912_v15 = vld [vmem:[%s10534_s0 + $0x8] sm:$0xff] }
  0x75   :  { %6034 = vmatprep.mubr.msk.bf16.mxu0 %vm517_vm2, %v7816_v29  ;;  %10802 = vst [vmem:[#allocation30_spill] sm:$0xff] %v7865_v1  ;;  %v7870_v29 = vpack.c.bf16 %v1370_v20, %v1368_v10  ;;  %v7872_v14 = vpack.c.bf16 %v1375_v31, %v1373_v55  ;;  %v2758_v0 = vrot.slane %v10804_v53, 2  ;;  %v2761_v49 = vrot.slane %v10806_v19, 2  ;;  %10807 = vst [vmem:[#allocation36_spill] sm:$0xff] %v7890_v47 }
  0x76   :  { %v1381_v46 = vrot.slane %v7318_v3, 2  ;;  %v1382_v48 = vrot.slane %v7323_v13, 2  ;;  %v416_v31 = vsel %vm258_vm1, %v414_v9, %v415_v54  ;;  %v418_v55 = vsel %vm258_vm1, %v415_v54, %v417_v52 }
  0x77   :  { %10803 = vst [vmem:[#allocation31_spill] sm:$0xff] %v7870_v29  ;;  %v2760_v19 = vsel %vm1295_vm3, %v2758_v0, %v2759_v57  ;;  %v2762_v50 = vsel %vm1295_vm3, %v2759_v57, %v2761_v49  ;;  %v7898_v10 = vpack.c.bf16 %v7842_v27, %v7837_v6  ;;  %v7900_v20 = vpack.c.bf16 %v418_v55, %v416_v31  ;;  %v10811_v31 = vld [vmem:[#allocation43_spill] sm:$0xff] }
  0x78   :  { %v1383_v9 = vsel %vm1295_vm3, %v1381_v46, %v1382_v48  ;;  %v1385_v54 = vsel %vm1295_vm3, %v1382_v48, %v1384_v24  ;;  %v129_v0 = vpack.c.bf16 %v7912_v15, %v7907_v23  ;;  %v7916_v52 = vpack.c.bf16 %v2762_v50, %v2760_v19 }
  0x79   :  { %10808 = vst [vmem:[#allocation37_spill] sm:$0xff] %v7898_v10  ;;  %10809 = vst [vmem:[#allocation38_spill] sm:$0xff] %v7900_v20  ;;  %v7918_v57 = vpack.c.bf16 %v1385_v54, %v1383_v9  ;;  %v1386_v49 = vrot.slane %v7337_v22, 2  ;;  %v1387_v46 = vrot.slane %v7342_v59, 2  ;;  %v1389_v48 = vrot.slane %v7347_v36, 2  ;;  %v6801_v54 = vld [vmem:[%s10534_s0 + $0x38] sm:$0xff] }
  0x7a   :  { %10810 = vst [vmem:[#allocation79_spill] sm:$0xff] %v7916_v52  ;;  %v1391_v24 = vrot.slane %v7372_v60, 2  ;;  %v1392_v55 = vrot.slane %v10811_v31, 2 }
  0x7b   :  { %5737 = vmatmul.mubr.msk.bf16.gmra.mrb[56].mxu1 %vm517_vm2, %v7861_v11  ;;  %v1388_v19 = vsel %vm1295_vm3, %v1386_v49, %v1387_v46  ;;  %v1390_v36 = vsel %vm1295_vm3, %v1387_v46, %v1389_v48  ;;  %v1396_v48 = vrot.slane %v7396_v5, 2 }
  0x7c   :  { %5740 = vmatprep.mubr.msk.bf16.mxu1 %vm517_vm2, %v7865_v1  ;;  %6035 = vmatmul.mubr.msk.bf16.gmra.mrb[24].mxu0 %vm517_vm2, %v7870_v29  ;;  %v10812_v1 = vld [vmem:[#allocation44_spill] sm:$0xff]  ;;  %v1393_v50 = vsel %vm1295_vm3, %v1391_v24, %v1392_v55  ;;  %v7947_v49 = vpack.c.bf16 %v1390_v36, %v1388_v19  ;;  %v1399_v24 = vrot.slane %v7412_v56, 2  ;;  %v1402_v19 = vrot.slane %v7435_v33, 2  ;;  %v10816_v36 = vld [vmem:[#allocation49_spill] sm:$0xff]  ;;  %v6802_v33 = vld [vmem:[%s10534_s0 + $0x48] sm:$0xff] }
  0x7d   :  { %6038 = vmatprep.mubr.msk.bf16.mxu0 %vm517_vm2, %v7872_v14  ;;  %v1394_v11 = vrot.slane %v10812_v1, 2  ;;  %v6800_v1 = vld [vmem:[%s10534_s0 + $0x30] sm:$0xff] }
  0x7f   :  { %v1395_v9 = vsel %vm1295_vm3, %v1392_v55, %v1394_v11  ;;  %v1397_v11 = vrot.slane %v7407_v4, 2  ;;  %v7957_v55 = vld [vmem:[%s10533_s1 + $0x6] sm:$0x3] }
  0x80   :  { %v7949_v46 = vpack.c.bf16 %v1395_v9, %v1393_v50  ;;  %v1404_v50 = vrot.slane %v10816_v36, 2 }
  0x81   :  { %v1398_v56 = vsel %vm1295_vm3, %v1396_v48, %v1397_v11  ;;  %v6804_v48 = vld [vmem:[%s10534_s0 + $0x60] sm:$0xff] }
  0x82   :  { %10814 = vst [vmem:[#allocation43_spill] sm:$0xff] %v7949_v46  ;;  %v1405_v36 = vsel %vm1295_vm3, %v1402_v19, %v1404_v50  ;;  %v1414_v50 = vrot.slane %v7516_v51, 2 }
  0x83   :  { %5741 = vmatmul.mubr.msk.bf16.gmra.mrb[60].mxu1 %vm517_vm2, %v7900_v20 }
  0x84   :  { %5746 = vmatprep.mubr.msk.bf16.mxu1 %vm517_vm2, %v129_v0  ;;  %6039 = vmatmul.mubr.msk.bf16.gmra.mrb[28].mxu0 %vm517_vm2, %v7916_v52  ;;  %v7943_v0 = vpack.c.bf16 %v6801_v54, %v6800_v1  ;;  %v10813_v52 = vld [vmem:[#allocation24_spill] sm:$0xff]  ;;  %v10815_v1 = vld [vmem:[#allocation3_spill] sm:$0xff] }
  0x85   :  { %6042 = vmatprep.mubr.msk.bf16.mxu0 %vm517_vm2, %v7918_v57  ;;  %v1651_v20 = vsel %vm614_vm0, %v10813_v52, 0  ;;  %v1401_v52 = vrot.slane %v7430_v7, 2  ;;  %v1400_v7 = vsel %vm1295_vm3, %v1397_v11, %v1399_v24  ;;  %v6805_v11 = vld [vmem:[%s10534_s0 + $0x68] sm:$0xff] }
  0x86   :  { %v7990_v24 = vpack.c.bf16 %v6805_v11, %v6804_v48  ;;  %v1421_v48 = vrot.slane %v7579_v25, 2  ;;  %v1422_v11 = vrot.slane %v7584_v17, 2  ;;  %v10823_v17 = vld [vmem:[#allocation12_spill] sm:$0xff] }
  0x87   :  { %v1403_v54 = vsel %vm1295_vm3, %v1401_v52, %v1402_v19  ;;  %v1411_v52 = vrot.slane %v7501_v32, 2  ;;  %v1412_v19 = vrot.slane %v7506_v63, 2  ;;  %v6807_v32 = vld [vmem:[%s10534_s0 + $0x80] sm:$0xff] }
  0x89   :  { %v1413_v51 = vsel %vm1295_vm3, %v1411_v52, %v1412_v19  ;;  %v10820_v52 = vld [vmem:[#allocation60_spill] sm:$0xff] }
  0x8b   :  { %5747 = vmatmul.mubr.msk.bf16.vlgmr.msra.gmra.mrb[0].mxu1 %vm517_vm2, %v10815_v1  ;;  %v7992_v1 = vpack.c.bf16 %v1400_v7, %v1398_v56  ;;  %v6806_v56 = vld [vmem:[%s10534_s0 + $0x78] sm:$0xff]  ;;  %v1415_v7 = vsel %vm1295_vm3, %v1412_v19, %v1414_v50  ;;  %v10821_v19 = vld [vmem:[#allocation8_spill] sm:$0xff] }
  0x8c   :  { %5811 = vmatpush3.bf16.msra.mxu1 %v1651_v20  ;;  %5750 = vmatprep.mubr.msk.bf16.mxu1 %vm517_vm2, %v7943_v0  ;;  %v6803_v20 = vld [vmem:[%s10534_s0 + $0x50] sm:$0xff]  ;;  %v8013_v63 = vpack.c.bf16 %v6807_v32, %v6806_v56  ;;  %v1424_v56 = vrot.slane %v7595_v30, 2  ;;  %v10822_v50 = vld [vmem:[#allocation9_spill] sm:$0xff] }
  0x8d   :  { %6043 = vmatmul.mubr.msk.bf16.gmra.mrb[32].mxu0 %vm517_vm2, %v7947_v49  ;;  %6789 = vmatprep.subr.msk.bf16.mxu1 %vm614_vm0, %v7957_v55  ;;  %v7980_v9 = vpack.c.bf16 %v6803_v20, %v6802_v33  ;;  %v10817_v33 = vld [vmem:[#allocation6_spill] sm:$0xff]  ;;  %v10818_v20 = vld [vmem:[#allocation7_spill] sm:$0xff]  ;;  %v8036_v32 = vpack.c.bf16 %v10822_v50, %v10821_v19  ;;  %v1434_v19 = vrot.slane %v7700_v58, 2 }
  0x8e   :  { %6046 = vmatprep.mubr.msk.bf16.mxu0 %vm517_vm2, %v7949_v46  ;;  %v7994_v46 = vpack.c.bf16 %v1405_v36, %v1403_v54  ;;  %v8019_v54 = vpack.c.bf16 %v10818_v20, %v10817_v33  ;;  %v8021_v36 = vpack.c.bf16 %v1415_v7, %v1413_v51  ;;  %v1423_v51 = vsel %vm1295_vm3, %v1421_v48, %v1422_v11  ;;  %v10824_v7 = vld [vmem:[#allocation13_spill] sm:$0xff] }
  0x8f   :  { %v1425_v25 = vsel %vm1295_vm3, %v1422_v11, %v1424_v56  ;;  %v8042_v30 = vpack.c.bf16 %v10824_v7, %v10823_v17  ;;  %v1431_v20 = vrot.slane %v7671_v38, 2  ;;  %v10826_v48 = vld [vmem:[#allocation61_spill] sm:$0xff]  ;;  %v10827_v11 = vld [vmem:[#allocation14_spill] sm:$0xff]  ;;  %v10828_v56 = vld [vmem:[#allocation15_spill] sm:$0xff]  ;;  %v1441_v7 = vrot.slane %v7774_v26, 2 }
  0x90   :  { %10819 = vst [vmem:[#allocation44_spill] sm:$0xff] %v8021_v36  ;;  %v8044_v33 = vpack.c.bf16 %v1425_v25, %v1423_v51  ;;  %v8059_v50 = vpack.c.bf16 %v10828_v56, %v10827_v11  ;;  %v10830_v25 = vld [vmem:[#allocation19_spill] sm:$0xff]  ;;  %v1444_v11 = vrot.slane %v7784_v8, 2 }
  0x92   :  { %10825 = vst [vmem:[#allocation24_spill] sm:$0xff] %v8044_v33 }
  0x93   :  { %5751 = vmatmul.mubr.msk.bf16.gmra.mrb[4].mxu1 %vm517_vm2, %v7980_v9 }
  0x94   :  { %5754 = vmatprep.mubr.msk.bf16.mxu1 %vm517_vm2, %v7990_v24 }
  0x95   :  { %6047 = vmatmul.mubr.msk.bf16.gmra.mrb[36].mxu0 %vm517_vm2, %v7992_v1 }
  0x96   :  { %6050 = vmatprep.mubr.msk.bf16.mxu0 %vm517_vm2, %v7994_v46 }
  0x9b   :  { %5755 = vmatmul.mubr.msk.bf16.gmra.mrb[8].mxu1 %vm517_vm2, %v8013_v63 }
  0x9c   :  { %5758 = vmatprep.mubr.msk.bf16.mxu1 %vm517_vm2, %v8019_v54 }
  0x9d   :  { %6051 = vmatmul.mubr.msk.bf16.gmra.mrb[40].mxu0 %vm517_vm2, %v10820_v52 }
  0x9e   :  { %6054 = vmatprep.mubr.msk.bf16.mxu0 %vm517_vm2, %v8021_v36  ;;  %v1432_v36 = vrot.slane %v7683_v39, 2  ;;  %v10829_v39 = vld [vmem:[#allocation18_spill] sm:$0xff] }
  0x9f   :  { %v8065_v58 = vpack.c.bf16 %v10830_v25, %v10829_v39  ;;  %v1452_v39 = vrot.slane %v7842_v27, 2  ;;  %v1454_v25 = vrot.slane %v7847_v12, 2  ;;  %v8112_v27 = vld [vmem:[%s10534_s0 + $0x330] sm:$0xff]  ;;  %v8117_v12 = vld [vmem:[%s10534_s0 + $0x338] sm:$0xff] }
  0xa0   :  { %v1433_v51 = vsel %vm1295_vm3, %v1431_v20, %v1432_v36  ;;  %v1435_v38 = vsel %vm1295_vm3, %v1432_v36, %v1434_v19  ;;  %v10831_v20 = vld [vmem:[#allocation65_spill] sm:$0xff]  ;;  %v10832_v36 = vld [vmem:[#allocation20_spill] sm:$0xff] }
  0xa1   :  { %v8067_v17 = vpack.c.bf16 %v1435_v38, %v1433_v51  ;;  %v10833_v19 = vld [vmem:[#allocation21_spill] sm:$0xff]  ;;  %v1451_v38 = vrot.slane %v7837_v6, 2  ;;  %v1455_v6 = vsel %vm1295_vm3, %v1452_v39, %v1454_v25 }
  0xa2   :  { %v8082_v56 = vpack.c.bf16 %v10833_v19, %v10832_v36  ;;  %v2764_v36 = vrot.slane %v8117_v12, 2 }
  0xa3   :  { %5759 = vmatmul.mubr.msk.bf16.gmra.mrb[12].mxu1 %vm517_vm2, %v8036_v32 }
  0xa4   :  { %5762 = vmatprep.mubr.msk.bf16.mxu1 %vm517_vm2, %v8042_v30 }
  0xa5   :  { %6055 = vmatmul.mubr.msk.bf16.gmra.mrb[44].mxu0 %vm517_vm2, %v10826_v48 }
  0xa6   :  { %6058 = vmatprep.mubr.msk.bf16.mxu0 %vm517_vm2, %v8044_v33  ;;  %v1442_v33 = vrot.slane %v7779_v28, 2  ;;  %v8088_v28 = vpack.c.bf16 %v7166_v41, %v7159_v21  ;;  %v8105_v21 = vpack.c.bf16 %v7181_v44, %v7176_v43  ;;  %v1453_v41 = vsel %vm1295_vm3, %v1451_v38, %v1452_v39  ;;  %v10836_v38 = vld [vmem:[#allocation35_spill] sm:$0xff] }
  0xa7   :  { %v8126_v43 = vpack.c.bf16 %v10794_v62, %v7220_v37  ;;  %v8128_v44 = vpack.c.bf16 %v1455_v6, %v1453_v41  ;;  %v10838_v41 = vld [vmem:[#allocation50_spill] sm:$0xff] }
  0xa8   :  { %v1443_v51 = vsel %vm1295_vm3, %v1441_v7, %v1442_v33  ;;  %v1445_v26 = vsel %vm1295_vm3, %v1442_v33, %v1444_v11  ;;  %v10834_v7 = vld [vmem:[#allocation66_spill] sm:$0xff]  ;;  %v2763_v11 = vrot.slane %v8112_v27, 2  ;;  %v3535_v6 = vsel %vm614_vm0, %v10838_v41, 0 }
  0xa9   :  { %v8090_v8 = vpack.c.bf16 %v1445_v26, %v1443_v51  ;;  %v8122_v33 = vld [vmem:[%s10534_s0 + $0x340] sm:$0x3]  ;;  %v8145_v51 = vpack.c.bf16 %v10797_v40, %v10796_v16  ;;  %v8160_v16 = vpack.c.bf16 %v7323_v13, %v7318_v3  ;;  %v8164_v40 = vpack.c.bf16 %v7342_v59, %v7337_v22  ;;  %v10839_v22 = vld [vmem:[#allocation73_spill] sm:$0xff] }
  0xaa   :  { %v2766_v19 = vrot.slane %v8122_v33, 2  ;;  %v2765_v37 = vsel %vm1295_vm3, %v2763_v11, %v2764_v36  ;;  %v10835_v26 = vld [vmem:[#allocation34_spill] sm:$0xff]  ;;  %v8175_v11 = vld [vmem:[%s10533_s1 + $0x10] sm:$0x3]  ;;  %v8183_v3 = vpack.c.bf16 %v10811_v31, %v7372_v60  ;;  %v8189_v13 = vpack.c.bf16 %v7407_v4, %v7396_v5  ;;  %v10841_v60 = vld [vmem:[#allocation27_spill] sm:$0xff] }
  0xab   :  { %5763 = vmatmul.mubr.msk.bf16.gmra.mrb[16].mxu1 %vm517_vm2, %v8059_v50  ;;  %v145_v39 = vpack.c.bf16 %v10836_v38, %v10835_v26  ;;  %v10840_v59 = vld [vmem:[#allocation74_spill] sm:$0xff]  ;;  %v1296_v5 = vrot.slane %v7907_v23, 2  ;;  %v1297_v4 = vrot.slane %v7912_v15, 2  ;;  %v6808_v31 = vld [vmem:[%s10534_s0 + $0x10] sm:$0x3]  ;;  %v8249_v23 = vld [vmem:[%s10534_s0 + $0x198] sm:$0xff] }
  0xac   :  { %5766 = vmatprep.mubr.msk.bf16.mxu1 %vm517_vm2, %v8065_v58  ;;  %v2767_v62 = vsel %vm1295_vm3, %v2764_v36, %v2766_v19  ;;  %v1299_v36 = vrot.slane %v6808_v31, 2  ;;  %v8238_v19 = vpack.c.bf16 %v10805_v35, %v10804_v53  ;;  %v8254_v15 = vld [vmem:[%s10534_s0 + $0x1a0] sm:$0xff]  ;;  %v8265_v38 = vld [vmem:[%s10534_s0 + $0x1a8] sm:$0x3] }
  0xad   :  { %6059 = vmatmul.mubr.msk.bf16.gmra.mrb[48].mxu0 %vm517_vm2, %v10831_v20  ;;  %v8149_v25 = vpack.c.bf16 %v2767_v62, %v2765_v37  ;;  %v10842_v37 = vld [vmem:[#allocation28_spill] sm:$0xff]  ;;  %v1298_v53 = vsel %vm1295_vm3, %v1296_v5, %v1297_v4  ;;  %v3510_v62 = vrot.slane %v8249_v23, 1  ;;  %v3511_v26 = vrot.slane %v8254_v15, 1  ;;  %v10853_v31 = vld [vmem:[#allocation70_spill] sm:$0xff] }
  0xae   :  { %6062 = vmatprep.mubr.msk.bf16.mxu0 %vm517_vm2, %v8067_v17  ;;  %v1300_v35 = vsel %vm1295_vm3, %v1297_v4, %v1299_v36  ;;  %v3513_v41 = vrot.slane %v8265_v38, 1  ;;  %v2017_v36 = vsel %vm614_vm0, %v7957_v55, 0  ;;  %v10845_v55 = vld [vmem:[#allocation48_spill] sm:$0xff] }
  0xaf   :  { %10837 = vst [vmem:[#allocation49_spill] sm:$0xff] %v8149_v25  ;;  %v8271_v5 = vsel %vm258_vm1, %v3510_v62, %v3511_v26  ;;  %v6809_v62 = vld [vmem:[%s10533_s1 + $0x8] sm:$0x3] }
  0xb0   :  { %v8274_v4 = vsel %vm258_vm1, %v3511_v26, %v3513_v41  ;;  %v10846_v26 = vld [vmem:[#allocation52_spill] sm:$0xff] }
  0xb1   :  { %v10848_v41 = vld [vmem:[#allocation56_spill] sm:$0xff] }
  0xb3   :  { %5767 = vmatmul.mubr.msk.bf16.gmra.mrb[20].mxu1 %vm517_vm2, %v8082_v56 }
  0xb4   :  { %5770 = vmatprep.mubr.msk.bf16.mxu1 %vm517_vm2, %v8088_v28 }
  0xb5   :  { %6063 = vmatmul.mubr.msk.bf16.gmra.mrb[52].mxu0 %vm517_vm2, %v10834_v7 }
  0xb6   :  { %6066 = vmatprep.mubr.msk.bf16.mxu0 %vm517_vm2, %v8090_v8 }
  0xbb   :  { %5771 = vmatmul.mubr.msk.bf16.gmra.mrb[24].mxu1 %vm517_vm2, %v8105_v21 }
  0xbc   :  { %5774 = vmatprep.mubr.msk.bf16.mxu1 %vm517_vm2, %v8126_v43 }
  0xbd   :  { %6067 = vmatmul.mubr.msk.bf16.gmra.mrb[56].mxu0 %vm517_vm2, %v7733_v2 }
  0xbe   :  { %6070 = vmatprep.mubr.msk.bf16.mxu0 %vm517_vm2, %v8128_v44 }
  0xc3   :  { %5775 = vmatmul.mubr.msk.bf16.gmra.mrb[28].mxu1 %vm517_vm2, %v8145_v51 }
  0xc4   :  { %5778 = vmatprep.mubr.msk.bf16.mxu1 %vm517_vm2, %v145_v39  ;;  %v1520_v39 = vpack.c.bf16 %v1300_v35, %v1298_v53  ;;  %v10843_v53 = vld [vmem:[#allocation42_spill] sm:$0xff]  ;;  %v10844_v35 = vld [vmem:[#allocation47_spill] sm:$0xff] }
  0xc5   :  { %6071 = vmatmul.mubr.msk.bf16.gmra.mrb[60].mxu0 %vm517_vm2, %v8149_v25  ;;  %v10854_v25 = vld [vmem:[#allocation77_spill] sm:$0xff] }
  0xc6   :  { %6076 = vmatprep.mubr.msk.bf16.mxu0 %vm517_vm2, %v7943_v0 }
  0xcb   :  { %5779 = vmatmul.mubr.msk.bf16.gmra.mrb[32].mxu1 %vm517_vm2, %v8160_v16 }
  0xcc   :  { %5782 = vmatprep.mubr.msk.bf16.mxu1 %vm517_vm2, %v8164_v40 }
  0xcd   :  { %6077 = vmatmul.mubr.msk.bf16.vlgmr.msra.gmra.mrb[0].mxu0 %vm517_vm2, %v7980_v9 }
  0xce   :  { %6141 = vmatpush3.bf16.msra.mxu0 %v3535_v6  ;;  %6080 = vmatprep.mubr.msk.bf16.mxu0 %vm517_vm2, %v7990_v24  ;;  %v3138_v6 = vpack.c.bf16 %v8254_v15, %v8249_v23 }
  0xcf   :  { %6795 = vmatprep.subr.msk.bf16.mxu0 %vm614_vm0, %v8175_v11 }
  0xd3   :  { %5783 = vmatmul.mubr.msk.bf16.gmra.mrb[36].mxu1 %vm517_vm2, %v8183_v3 }
  0xd4   :  { %5786 = vmatprep.mubr.msk.bf16.mxu1 %vm517_vm2, %v8189_v13 }
  0xd5   :  { %6081 = vmatmul.mubr.msk.bf16.gmra.mrb[4].mxu0 %vm517_vm2, %v8013_v63 }
  0xd6   :  { %6084 = vmatprep.mubr.msk.bf16.mxu0 %vm517_vm2, %v8019_v54 }
  0xdb   :  { %5787 = vmatmul.mubr.msk.bf16.gmra.mrb[40].mxu1 %vm517_vm2, %v7753_v45 }
  0xdc   :  { %5790 = vmatprep.mubr.msk.bf16.mxu1 %vm517_vm2, %v7757_v42 }
  0xdd   :  { %6085 = vmatmul.mubr.msk.bf16.gmra.mrb[8].mxu0 %vm517_vm2, %v8036_v32 }
  0xde   :  { %6088 = vmatprep.mubr.msk.bf16.mxu0 %vm517_vm2, %v8042_v30 }
  0xe3   :  { %5791 = vmatmul.mubr.msk.bf16.gmra.mrb[44].mxu1 %vm517_vm2, %v7761_v61 }
  0xe4   :  { %5794 = vmatprep.mubr.msk.bf16.mxu1 %vm517_vm2, %v7765_v18 }
  0xe5   :  { %6089 = vmatmul.mubr.msk.bf16.gmra.mrb[12].mxu0 %vm517_vm2, %v8059_v50 }
  0xe6   :  { %6092 = vmatprep.mubr.msk.bf16.mxu0 %vm517_vm2, %v8065_v58 }
  0xeb   :  { %5795 = vmatmul.mubr.msk.bf16.gmra.mrb[48].mxu1 %vm517_vm2, %v7788_v34 }
  0xec   :  { %5798 = vmatprep.mubr.msk.bf16.mxu1 %vm517_vm2, %v10839_v22 }
  0xed   :  { %6093 = vmatmul.mubr.msk.bf16.gmra.mrb[16].mxu0 %vm517_vm2, %v8082_v56 }
  0xee   :  { %6096 = vmatprep.mubr.msk.bf16.mxu0 %vm517_vm2, %v8088_v28 }
  0xf3   :  { %5799 = vmatmul.mubr.msk.bf16.gmra.mrb[52].mxu1 %vm517_vm2, %v10840_v59 }
  0xf4   :  { %5802 = vmatprep.mubr.msk.bf16.mxu1 %vm517_vm2, %v10841_v60 }
  0xf5   :  { %6097 = vmatmul.mubr.msk.bf16.gmra.mrb[20].mxu0 %vm517_vm2, %v8105_v21 }
  0xf6   :  { %6100 = vmatprep.mubr.msk.bf16.mxu0 %vm517_vm2, %v8126_v43 }
  0xfb   :  { %5803 = vmatmul.mubr.msk.bf16.gmra.mrb[56].mxu1 %vm517_vm2, %v10842_v37 }
  0xfc   :  { %5806 = vmatprep.mubr.msk.bf16.mxu1 %vm517_vm2, %v7890_v47 }
  0xfd   :  { %6101 = vmatmul.mubr.msk.bf16.gmra.mrb[24].mxu0 %vm517_vm2, %v8145_v51 }
  0xfe   :  { %6104 = vmatprep.mubr.msk.bf16.mxu0 %vm517_vm2, %v8238_v19 }
 0x103   :  { %5807 = vmatmul.mubr.msk.bf16.gmra.mrb[60].mxu1 %vm517_vm2, %v7898_v10 }
 0x104   :  { %5812 = vmatprep.mubr.msk.bf16.mxu1 %vm517_vm2, %v1520_v39  ;;  %v10847_v39 = vld [vmem:[#allocation54_spill] sm:$0xff] }
 0x105   :  { %6105 = vmatmul.mubr.msk.bf16.gmra.mrb[28].mxu0 %vm517_vm2, %v3138_v6  ;;  %v10849_v6 = vld [vmem:[#allocation58_spill] sm:$0xff] }
 0x106   :  { %6108 = vmatprep.mubr.msk.bf16.mxu0 %vm517_vm2, %v8164_v40 }
 0x10b   :  { %5813 = vmatmul.mubr.msk.bf16.vlgmr.msra.gmra.mrb[0].mxu1 %vm517_vm2, %v10843_v53  ;;  %v10851_v53 = vld [vmem:[#allocation64_spill] sm:$0xff] }
 0x10c   :  { %5877 = vmatpush3.bf16.msra.mxu1 %v2017_v36  ;;  %5816 = vmatprep.mubr.msk.bf16.mxu1 %vm517_vm2, %v10844_v35  ;;  %v10850_v36 = vld [vmem:[#allocation62_spill] sm:$0xff] }
 0x10d   :  { %6109 = vmatmul.mubr.msk.bf16.gmra.mrb[32].mxu0 %vm517_vm2, %v8183_v3  ;;  %6791 = vmatprep.subr.msk.bf16.mxu1 %vm614_vm0, %v6809_v62  ;;  %v10852_v62 = vld [vmem:[#allocation68_spill] sm:$0xff] }
 0x10e   :  { %6112 = vmatprep.mubr.msk.bf16.mxu0 %vm517_vm2, %v8189_v13 }
 0x113   :  { %5817 = vmatmul.mubr.msk.bf16.gmra.mrb[4].mxu1 %vm517_vm2, %v10845_v55 }
 0x114   :  { %5820 = vmatprep.mubr.msk.bf16.mxu1 %vm517_vm2, %v10846_v26 }
 0x115   :  { %6113 = vmatmul.mubr.msk.bf16.gmra.mrb[36].mxu0 %vm517_vm2, %v7753_v45 }
 0x116   :  { %6116 = vmatprep.mubr.msk.bf16.mxu0 %vm517_vm2, %v7757_v42 }
 0x11b   :  { %5821 = vmatmul.mubr.msk.bf16.gmra.mrb[8].mxu1 %vm517_vm2, %v10847_v39 }
 0x11c   :  { %5824 = vmatprep.mubr.msk.bf16.mxu1 %vm517_vm2, %v10848_v41 }
 0x11d   :  { %6117 = vmatmul.mubr.msk.bf16.gmra.mrb[40].mxu0 %vm517_vm2, %v7761_v61 }
 0x11e   :  { %6120 = vmatprep.mubr.msk.bf16.mxu0 %vm517_vm2, %v7765_v18 }
 0x123   :  { %5825 = vmatmul.mubr.msk.bf16.gmra.mrb[12].mxu1 %vm517_vm2, %v10849_v6 }
 0x124   :  { %5828 = vmatprep.mubr.msk.bf16.mxu1 %vm517_vm2, %v10850_v36 }
 0x125   :  { %6121 = vmatmul.mubr.msk.bf16.gmra.mrb[44].mxu0 %vm517_vm2, %v7788_v34 }
 0x126   :  { %6124 = vmatprep.mubr.msk.bf16.mxu0 %vm517_vm2, %v10839_v22  ;;  %v6810_v22 = vld [vmem:[%s10534_s0 + $0x1b0] sm:$0xff] }
 0x12b   :  { %5829 = vmatmul.mubr.msk.bf16.gmra.mrb[16].mxu1 %vm517_vm2, %v10851_v53  ;;  %v8376_v53 = vld [vmem:[%s10534_s0 + $0x358] sm:$0x3] }
 0x12c   :  { %5832 = vmatprep.mubr.msk.bf16.mxu1 %vm517_vm2, %v10852_v62  ;;  %v3518_v18 = vrot.slane %v8376_v53, 1 }
 0x12d   :  { %6125 = vmatmul.mubr.msk.bf16.gmra.mrb[48].mxu0 %vm517_vm2, %v10840_v59  ;;  %v1376_v59 = vrot.slane %v6810_v22, 2  ;;  %v8360_v22 = vld [vmem:[%s10534_s0 + $0x348] sm:$0xff] }
 0x12e   :  { %6128 = vmatprep.mubr.msk.bf16.mxu0 %vm517_vm2, %v10841_v60  ;;  %v6811_v60 = vld [vmem:[%s10534_s0 + $0x1b8] sm:$0xff] }
 0x12f   :  { %v1377_v62 = vrot.slane %v6811_v60, 2 }
 0x131   :  { %v1378_v60 = vsel %vm1295_vm3, %v1376_v59, %v1377_v62 }
 0x133   :  { %5833 = vmatmul.mubr.msk.bf16.gmra.mrb[20].mxu1 %vm517_vm2, %v10853_v31 }
 0x134   :  { %5836 = vmatprep.mubr.msk.bf16.mxu1 %vm517_vm2, %v10854_v25  ;;  %v6812_v25 = vld [vmem:[%s10534_s0 + $0x1c0] sm:$0x3] }
 0x135   :  { %6129 = vmatmul.mubr.msk.bf16.gmra.mrb[52].mxu0 %vm517_vm2, %v10842_v37  ;;  %v1379_v31 = vrot.slane %v6812_v25, 2  ;;  %v8349_v37 = vpack.c.bf16 %v8117_v12, %v8112_v27  ;;  %v8365_v25 = vld [vmem:[%s10534_s0 + $0x350] sm:$0xff] }
 0x136   :  { %6132 = vmatprep.mubr.msk.bf16.mxu0 %vm517_vm2, %v7890_v47  ;;  %v10856_v47 = vld [vmem:[#allocation78_spill] sm:$0xff]  ;;  %v3139_v59 = vpack.c.bf16 %v8365_v25, %v8360_v22 }
 0x137   :  { %10855 = vst [vmem:[#allocation6_spill] sm:$0xff] %v8349_v37 }
 0x13b   :  { %5837 = vmatmul.mubr.msk.bf16.gmra.mrb[24].mxu1 %vm517_vm2, %v10856_v47  ;;  %v1380_v47 = vsel %vm1295_vm3, %v1377_v62, %v1379_v31 }
 0x13c   :  { %5840 = vmatprep.mubr.msk.bf16.mxu1 %vm517_vm2, %v7870_v29  ;;  %v3515_v29 = vrot.slane %v8360_v22, 1  ;;  %v1536_v34 = vpack.c.bf16 %v1380_v47, %v1378_v60  ;;  %v10857_v47 = vld [vmem:[#allocation4_spill] sm:$0xff]  ;;  %v10863_v60 = vld [vmem:[#allocation17_spill] sm:$0xff] }
 0x13d   :  { %6133 = vmatmul.mubr.msk.bf16.gmra.mrb[56].mxu0 %vm517_vm2, %v7898_v10  ;;  %v3516_v10 = vrot.slane %v8365_v25, 1 }
 0x13e   :  { %6136 = vmatprep.mubr.msk.bf16.mxu0 %vm517_vm2, %v8349_v37 }
 0x13f   :  { %v8382_v31 = vsel %vm258_vm1, %v3515_v29, %v3516_v10  ;;  %v8385_v62 = vsel %vm258_vm1, %v3516_v10, %v3518_v18  ;;  %v3915_v18 = vsel %vm614_vm0, %v8175_v11, 0  ;;  %v10858_v29 = vld [vmem:[#allocation5_spill] sm:$0xff]  ;;  %v10859_v10 = vld [vmem:[#allocation10_spill] sm:$0xff]  ;;  %v10862_v11 = vld [vmem:[#allocation16_spill] sm:$0xff] }
 0x143   :  { %5841 = vmatmul.mubr.msk.bf16.gmra.mrb[28].mxu1 %vm517_vm2, %v7872_v14 }
 0x144   :  { %5844 = vmatprep.mubr.msk.bf16.mxu1 %vm517_vm2, %v1536_v34  ;;  %v10860_v34 = vld [vmem:[#allocation43_spill] sm:$0xff] }
 0x145   :  { %6137 = vmatmul.mubr.msk.bf16.gmra.mrb[60].mxu0 %vm517_vm2, %v3139_v59  ;;  %v10864_v59 = vld [vmem:[#allocation22_spill] sm:$0xff] }
 0x146   :  { %6142 = vmatprep.mubr.msk.bf16.mxu0 %vm517_vm2, %v10857_v47  ;;  %v10865_v47 = vld [vmem:[#allocation44_spill] sm:$0xff] }
 0x14b   :  { %5845 = vmatmul.mubr.msk.bf16.gmra.mrb[32].mxu1 %vm517_vm2, %v7918_v57  ;;  %v10861_v57 = vld [vmem:[#allocation11_spill] sm:$0xff] }
 0x14c   :  { %5848 = vmatprep.mubr.msk.bf16.mxu1 %vm517_vm2, %v7947_v49 }
 0x14d   :  { %6143 = vmatmul.mubr.msk.bf16.vlgmr.msra.gmra.mrb[0].mxu0 %vm517_vm2, %v10858_v29  ;;  %v10867_v29 = vld [vmem:[#allocation25_spill] sm:$0xff] }
 0x14e   :  { %6207 = vmatpush3.bf16.msra.mxu0 %v3915_v18  ;;  %6146 = vmatprep.mubr.msk.bf16.mxu0 %vm517_vm2, %v10859_v10  ;;  %v10866_v18 = vld [vmem:[#allocation23_spill] sm:$0xff]  ;;  %v10868_v10 = vld [vmem:[#allocation24_spill] sm:$0xff] }
 0x153   :  { %5849 = vmatmul.mubr.msk.bf16.gmra.mrb[36].mxu1 %vm517_vm2, %v10860_v34 }
 0x154   :  { %5852 = vmatprep.mubr.msk.bf16.mxu1 %vm517_vm2, %v7992_v1 }
 0x155   :  { %6147 = vmatmul.mubr.msk.bf16.gmra.mrb[4].mxu0 %vm517_vm2, %v10861_v57  ;;  %v10869_v57 = vld [vmem:[#allocation26_spill] sm:$0xff] }
 0x156   :  { %6150 = vmatprep.mubr.msk.bf16.mxu0 %vm517_vm2, %v10862_v11  ;;  %v10870_v11 = vld [vmem:[#allocation32_spill] sm:$0xff] }
 0x15b   :  { %5853 = vmatmul.mubr.msk.bf16.gmra.mrb[40].mxu1 %vm517_vm2, %v7994_v46 }
 0x15c   :  { %5856 = vmatprep.mubr.msk.bf16.mxu1 %vm517_vm2, %v10820_v52 }
 0x15d   :  { %6151 = vmatmul.mubr.msk.bf16.gmra.mrb[8].mxu0 %vm517_vm2, %v10863_v60  ;;  %v10871_v60 = vld [vmem:[#allocation33_spill] sm:$0xff] }
 0x15e   :  { %6154 = vmatprep.mubr.msk.bf16.mxu0 %vm517_vm2, %v10864_v59  ;;  %v10872_v59 = vld [vmem:[#allocation39_spill] sm:$0xff] }
 0x163   :  { %5857 = vmatmul.mubr.msk.bf16.gmra.mrb[44].mxu1 %vm517_vm2, %v10865_v47 }
 0x164   :  { %5860 = vmatprep.mubr.msk.bf16.mxu1 %vm517_vm2, %v10826_v48 }
 0x165   :  { %6155 = vmatmul.mubr.msk.bf16.gmra.mrb[12].mxu0 %vm517_vm2, %v10866_v18  ;;  %v10873_v18 = vld [vmem:[#allocation40_spill] sm:$0xff] }
 0x166   :  { %6158 = vmatprep.mubr.msk.bf16.mxu0 %vm517_vm2, %v10867_v29  ;;  %v3890_v29 = vrot.slane %v8249_v23, 2  ;;  %v10875_v23 = vld [vmem:[#allocation3_spill] sm:$0xff] }
 0x16b   :  { %5861 = vmatmul.mubr.msk.bf16.gmra.mrb[48].mxu1 %vm517_vm2, %v10868_v10 }
 0x16c   :  { %5864 = vmatprep.mubr.msk.bf16.mxu1 %vm517_vm2, %v10831_v20 }
 0x16d   :  { %6159 = vmatmul.mubr.msk.bf16.gmra.mrb[16].mxu0 %vm517_vm2, %v10869_v57  ;;  %v3891_v57 = vrot.slane %v8254_v15, 2  ;;  %v10876_v15 = vpack.c.bf16 %v8274_v4, %v8271_v5  ;;  %v10881_v5 = vld [vmem:[#allocation55_spill] sm:$0xff] }
 0x16e   :  { %6162 = vmatprep.mubr.msk.bf16.mxu0 %vm517_vm2, %v10870_v11  ;;  %v10874_v11 = vld [vmem:[#allocation41_spill] sm:$0xff]  ;;  %v10884_v4 = vld [vmem:[#allocation63_spill] sm:$0xff] }
 0x173   :  { %5865 = vmatmul.mubr.msk.bf16.gmra.mrb[52].mxu1 %vm517_vm2, %v8067_v17 }
 0x174   :  { %5868 = vmatprep.mubr.msk.bf16.mxu1 %vm517_vm2, %v10834_v7 }
 0x175   :  { %6163 = vmatmul.mubr.msk.bf16.gmra.mrb[20].mxu0 %vm517_vm2, %v10871_v60  ;;  %v3893_v60 = vrot.slane %v8265_v38, 2  ;;  %v10877_v38 = vld [vmem:[#allocation46_spill] sm:$0xff] }
 0x176   :  { %6166 = vmatprep.mubr.msk.bf16.mxu0 %vm517_vm2, %v10872_v59  ;;  %v8457_v59 = vsel %vm1295_vm3, %v3890_v29, %v3891_v57  ;;  %v10878_v29 = vld [vmem:[#allocation2_spill] sm:$0xff] }
 0x177   :  { %v8460_v37 = vsel %vm1295_vm3, %v3891_v57, %v3893_v60  ;;  %v10879_v57 = vld [vmem:[#allocation51_spill] sm:$0xff]  ;;  %v2386_v60 = vrot.slane %v8122_v33, 1  ;;  %v3898_v33 = vrot.slane %v8376_v53, 2  ;;  %v10908_v53 = vld [vmem:[#allocation6_spill] sm:$0xff] }
 0x17b   :  { %5869 = vmatmul.mubr.msk.bf16.gmra.mrb[56].mxu1 %vm517_vm2, %v8090_v8 }
 0x17c   :  { %5872 = vmatprep.mubr.msk.bf16.mxu1 %vm517_vm2, %v7733_v2 }
 0x17d   :  { %6167 = vmatmul.mubr.msk.bf16.gmra.mrb[24].mxu0 %vm517_vm2, %v10873_v18  ;;  %v3904_v18 = vpack.c.bf16 %v8460_v37, %v8457_v59 }
 0x17e   :  { %6170 = vmatprep.mubr.msk.bf16.mxu0 %vm517_vm2, %v10874_v11  ;;  %v10880_v11 = vld [vmem:[#allocation53_spill] sm:$0xff] }
 0x183   :  { %5873 = vmatmul.mubr.msk.bf16.gmra.mrb[60].mxu1 %vm517_vm2, %v8128_v44 }
 0x184   :  { %5878 = vmatprep.mubr.msk.bf16.mxu1 %vm517_vm2, %v10875_v23 }
 0x185   :  { %6171 = vmatmul.mubr.msk.bf16.gmra.mrb[28].mxu0 %vm517_vm2, %v10876_v15 }
 0x186   :  { %6174 = vmatprep.mubr.msk.bf16.mxu0 %vm517_vm2, %v10877_v38 }
 0x18b   :  { %5879 = vmatmul.mubr.msk.bf16.vlgmr.msra.gmra.mrb[0].mxu1 %vm517_vm2, %v7943_v0  ;;  %v10882_v0 = vld [vmem:[#allocation57_spill] sm:$0xff] }
 0x18c   :  { %6273 = vmatpush3.bf16.msra.mxu1 %v10878_v29  ;;  %5882 = vmatprep.mubr.msk.bf16.mxu1 %vm517_vm2, %v7980_v9  ;;  %v10883_v9 = vld [vmem:[#allocation59_spill] sm:$0xff] }
 0x18d   :  { %6175 = vmatmul.mubr.msk.bf16.gmra.mrb[32].mxu0 %vm517_vm2, %v10879_v57 }
 0x18e   :  { %6178 = vmatprep.mubr.msk.bf16.mxu0 %vm517_vm2, %v10880_v11 }
 0x193   :  { %5883 = vmatmul.mubr.msk.bf16.gmra.mrb[4].mxu1 %vm517_vm2, %v7990_v24  ;;  %v10885_v24 = vld [vmem:[#allocation67_spill] sm:$0xff] }
 0x194   :  { %5886 = vmatprep.mubr.msk.bf16.mxu1 %vm517_vm2, %v8013_v63  ;;  %v10886_v63 = vld [vmem:[#allocation69_spill] sm:$0xff] }
 0x195   :  { %6179 = vmatmul.mubr.msk.bf16.gmra.mrb[36].mxu0 %vm517_vm2, %v10881_v5 }
 0x196   :  { %6182 = vmatprep.mubr.msk.bf16.mxu0 %vm517_vm2, %v10882_v0 }
 0x19b   :  { %5887 = vmatmul.mubr.msk.bf16.gmra.mrb[8].mxu1 %vm517_vm2, %v8019_v54  ;;  %v10887_v54 = vld [vmem:[#allocation75_spill] sm:$0xff] }
 0x19c   :  { %5890 = vmatprep.mubr.msk.bf16.mxu1 %vm517_vm2, %v8036_v32  ;;  %v10888_v32 = vld [vmem:[#allocation76_spill] sm:$0xff] }
 0x19d   :  { %6183 = vmatmul.mubr.msk.bf16.gmra.mrb[40].mxu0 %vm517_vm2, %v10883_v9 }
 0x19e   :  { %6186 = vmatprep.mubr.msk.bf16.mxu0 %vm517_vm2, %v10884_v4 }
 0x1a3   :  { %5891 = vmatmul.mubr.msk.bf16.gmra.mrb[12].mxu1 %vm517_vm2, %v8042_v30  ;;  %v2383_v30 = vrot.slane %v8112_v27, 1  ;;  %v10891_v27 = vld [vmem:[#allocation38_spill] sm:$0xff] }
 0x1a4   :  { %5894 = vmatprep.mubr.msk.bf16.mxu1 %vm517_vm2, %v8059_v50  ;;  %v2384_v50 = vrot.slane %v8117_v12, 1  ;;  %v3896_v12 = vrot.slane %v8365_v25, 2  ;;  %v10909_v25 = vld [vmem:[#allocation45_spill] sm:$0xff] }
 0x1a5   :  { %6187 = vmatmul.mubr.msk.bf16.gmra.mrb[44].mxu0 %vm517_vm2, %v10885_v24 }
 0x1a6   :  { %6190 = vmatprep.mubr.msk.bf16.mxu0 %vm517_vm2, %v10886_v63  ;;  %v2385_v23 = vsel %vm258_vm1, %v2383_v30, %v2384_v50  ;;  %v2387_v15 = vsel %vm258_vm1, %v2384_v50, %v2386_v60 }
 0x1ab   :  { %5895 = vmatmul.mubr.msk.bf16.gmra.mrb[16].mxu1 %vm517_vm2, %v8065_v58  ;;  %v10889_v58 = vld [vmem:[#allocation29_spill] sm:$0xff] }
 0x1ac   :  { %5898 = vmatprep.mubr.msk.bf16.mxu1 %vm517_vm2, %v8082_v56  ;;  %v10890_v56 = vld [vmem:[#allocation30_spill] sm:$0xff] }
 0x1ad   :  { %6191 = vmatmul.mubr.msk.bf16.gmra.mrb[48].mxu0 %vm517_vm2, %v10887_v54 }
 0x1ae   :  { %6194 = vmatprep.mubr.msk.bf16.mxu0 %vm517_vm2, %v10888_v32 }
 0x1b3   :  { %5899 = vmatmul.mubr.msk.bf16.gmra.mrb[20].mxu1 %vm517_vm2, %v8088_v28  ;;  %v8528_v28 = vpack.c.bf16 %v2387_v15, %v2385_v23 }
 0x1b4   :  { %5902 = vmatprep.mubr.msk.bf16.mxu1 %vm517_vm2, %v8105_v21  ;;  %v3895_v21 = vrot.slane %v8360_v22, 2  ;;  %v10892_v22 = vpack.c.bf16 %v8385_v62, %v8382_v31 }
 0x1b5   :  { %6195 = vmatmul.mubr.msk.bf16.gmra.mrb[52].mxu0 %vm517_vm2, %v10889_v58 }
 0x1b6   :  { %6198 = vmatprep.mubr.msk.bf16.mxu0 %vm517_vm2, %v10890_v56  ;;  %v8542_v29 = vsel %vm1295_vm3, %v3895_v21, %v3896_v12 }
 0x1bb   :  { %5903 = vmatmul.mubr.msk.bf16.gmra.mrb[24].mxu1 %vm517_vm2, %v8126_v43  ;;  %v8545_v43 = vsel %vm1295_vm3, %v3896_v12, %v3898_v33 }
 0x1bc   :  { %5906 = vmatprep.mubr.msk.bf16.mxu1 %vm517_vm2, %v8145_v51  ;;  %v3905_v51 = vpack.c.bf16 %v8545_v43, %v8542_v29 }
 0x1bd   :  { %6199 = vmatmul.mubr.msk.bf16.gmra.mrb[56].mxu0 %vm517_vm2, %v10891_v27 }
 0x1be   :  { %6202 = vmatprep.mubr.msk.bf16.mxu0 %vm517_vm2, %v8528_v28 }
 0x1c3   :  { %5907 = vmatmul.mubr.msk.bf16.gmra.mrb[28].mxu1 %vm517_vm2, %v8238_v19  ;;  %v10900_v19 = vld [vmem:[#allocation77_spill] sm:$0xff] }
 0x1c4   :  { %5910 = vmatprep.mubr.msk.bf16.mxu1 %vm517_vm2, %v8160_v16  ;;  %v10893_v16 = vld [vmem:[#allocation71_spill] sm:$0xff] }
 0x1c5   :  { %6203 = vmatmul.mubr.msk.bf16.gmra.mrb[60].mxu0 %vm517_vm2, %v10892_v22 }
 0x1c6   :  { %6208 = vmatprep.mubr.msk.bf16.mxu0 %vm517_vm2, %v10844_v35  ;;  %v10901_v35 = vld [vmem:[#allocation27_spill] sm:$0xff] }
 0x1cb   :  { %5911 = vmatmul.mubr.msk.bf16.gmra.mrb[32].mxu1 %vm517_vm2, %v8164_v40  ;;  %v10895_v40 = vld [vmem:[#allocation64_spill] sm:$0xff] }
 0x1cc   :  { %5914 = vmatprep.mubr.msk.bf16.mxu1 %vm517_vm2, %v8183_v3  ;;  %v10896_v3 = vld [vmem:[#allocation68_spill] sm:$0xff] }
 0x1cd   :  { %6209 = vmatmul.mubr.msk.bf16.vlgmr.msra.gmra.mrb[0].mxu0 %vm517_vm2, %v10845_v55  ;;  %v10902_v55 = vld [vmem:[#allocation28_spill] sm:$0xff] }
 0x1ce   :  { %6212 = vmatprep.mubr.msk.bf16.mxu0 %vm517_vm2, %v10846_v26  ;;  %v10903_v26 = vld [vmem:[#allocation78_spill] sm:$0xff] }
 0x1d3   :  { %5915 = vmatmul.mubr.msk.bf16.gmra.mrb[36].mxu1 %vm517_vm2, %v8189_v13  ;;  %v10899_v13 = vld [vmem:[#allocation70_spill] sm:$0xff] }
 0x1d4   :  { %5918 = vmatprep.mubr.msk.bf16.mxu1 %vm517_vm2, %v7753_v45  ;;  %v10894_v45 = vld [vmem:[#allocation72_spill] sm:$0xff] }
 0x1d5   :  { %6213 = vmatmul.mubr.msk.bf16.gmra.mrb[4].mxu0 %vm517_vm2, %v10847_v39  ;;  %v10904_v39 = vld [vmem:[#allocation31_spill] sm:$0xff] }
 0x1d6   :  { %6216 = vmatprep.mubr.msk.bf16.mxu0 %vm517_vm2, %v10848_v41  ;;  %v10905_v41 = vld [vmem:[#allocation36_spill] sm:$0xff] }
 0x1db   :  { %5919 = vmatmul.mubr.msk.bf16.gmra.mrb[40].mxu1 %vm517_vm2, %v7757_v42  ;;  %v10897_v42 = vld [vmem:[#allocation73_spill] sm:$0xff] }
 0x1dc   :  { %5922 = vmatprep.mubr.msk.bf16.mxu1 %vm517_vm2, %v7761_v61  ;;  %v10898_v61 = vld [vmem:[#allocation74_spill] sm:$0xff] }
 0x1dd   :  { %6217 = vmatmul.mubr.msk.bf16.gmra.mrb[8].mxu0 %vm517_vm2, %v10849_v6  ;;  %v10906_v6 = vld [vmem:[#allocation37_spill] sm:$0xff] }
 0x1de   :  { %6220 = vmatprep.mubr.msk.bf16.mxu0 %vm517_vm2, %v10850_v36  ;;  %v10907_v36 = vld [vmem:[#allocation79_spill] sm:$0xff] }
 0x1e3   :  { %5923 = vmatmul.mubr.msk.bf16.gmra.mrb[44].mxu1 %vm517_vm2, %v10893_v16 }
 0x1e4   :  { %5926 = vmatprep.mubr.msk.bf16.mxu1 %vm517_vm2, %v10894_v45 }
 0x1e5   :  { %6221 = vmatmul.mubr.msk.bf16.gmra.mrb[12].mxu0 %vm517_vm2, %v10895_v40 }
 0x1e6   :  { %6224 = vmatprep.mubr.msk.bf16.mxu0 %vm517_vm2, %v10896_v3 }
 0x1eb   :  { %5927 = vmatmul.mubr.msk.bf16.gmra.mrb[48].mxu1 %vm517_vm2, %v10897_v42 }
 0x1ec   :  { %5930 = vmatprep.mubr.msk.bf16.mxu1 %vm517_vm2, %v10898_v61 }
 0x1ed   :  { %6225 = vmatmul.mubr.msk.bf16.gmra.mrb[16].mxu0 %vm517_vm2, %v10899_v13 }
 0x1ee   :  { %6228 = vmatprep.mubr.msk.bf16.mxu0 %vm517_vm2, %v10900_v19 }
 0x1f3   :  { %5931 = vmatmul.mubr.msk.bf16.gmra.mrb[52].mxu1 %vm517_vm2, %v10901_v35 }
 0x1f4   :  { %5934 = vmatprep.mubr.msk.bf16.mxu1 %vm517_vm2, %v10902_v55 }
 0x1f5   :  { %6229 = vmatmul.mubr.msk.bf16.gmra.mrb[20].mxu0 %vm517_vm2, %v10903_v26 }
 0x1f6   :  { %6232 = vmatprep.mubr.msk.bf16.mxu0 %vm517_vm2, %v10904_v39 }
 0x1fb   :  { %5935 = vmatmul.mubr.msk.bf16.gmra.mrb[56].mxu1 %vm517_vm2, %v10905_v41 }
 0x1fc   :  { %5938 = vmatprep.mubr.msk.bf16.mxu1 %vm517_vm2, %v10906_v6 }
 0x1fd   :  { %6233 = vmatmul.mubr.msk.bf16.gmra.mrb[24].mxu0 %vm517_vm2, %v7872_v14  ;;  %v10910_v14 = vld [vmem:[#allocation49_spill] sm:$0xff] }
 0x1fe   :  { %6236 = vmatprep.mubr.msk.bf16.mxu0 %vm517_vm2, %v10907_v36 }
 0x203   :  { %5939 = vmatmul.mubr.msk.bf16.gmra.mrb[60].mxu1 %vm517_vm2, %v10908_v53 }
 0x204   :  { %5976 = vmatprep.mubr.msk.bf16.mxu1 %vm517_vm2, %v10909_v25 }
 0x205   :  { %6237 = vmatmul.mubr.msk.bf16.gmra.mrb[28].mxu0 %vm517_vm2, %v3904_v18 }
 0x206   :  { %6240 = vmatprep.mubr.msk.bf16.mxu0 %vm517_vm2, %v7947_v49 }
 0x20b   :  { %5977 = vmatmul.mubr.msk.bf16.vlgmr.msra.gmra.mrb[32].mxu1 %vm517_vm2, %v10877_v38 }
 0x20c   :  { %5980 = vmatprep.mubr.msk.bf16.mxu1 %vm517_vm2, %v10879_v57 }
 0x20d   :  { %6241 = vmatmul.mubr.msk.bf16.gmra.mrb[32].mxu0 %vm517_vm2, %v10860_v34 }
 0x20e   :  { %6244 = vmatprep.mubr.msk.bf16.mxu0 %vm517_vm2, %v7992_v1 }
 0x213   :  { %5981 = vmatmul.mubr.msk.bf16.gmra.mrb[36].mxu1 %vm517_vm2, %v10880_v11 }
 0x214   :  { %5984 = vmatprep.mubr.msk.bf16.mxu1 %vm517_vm2, %v10881_v5 }
 0x215   :  { %6245 = vmatmul.mubr.msk.bf16.gmra.mrb[36].mxu0 %vm517_vm2, %v7994_v46 }
 0x216   :  { %6248 = vmatprep.mubr.msk.bf16.mxu0 %vm517_vm2, %v10820_v52 }
 0x21b   :  { %5985 = vmatmul.mubr.msk.bf16.gmra.mrb[40].mxu1 %vm517_vm2, %v10882_v0 }
 0x21c   :  { %5988 = vmatprep.mubr.msk.bf16.mxu1 %vm517_vm2, %v10883_v9 }
 0x21d   :  { %6249 = vmatmul.mubr.msk.bf16.gmra.mrb[40].mxu0 %vm517_vm2, %v10865_v47 }
 0x21e   :  { %6252 = vmatprep.mubr.msk.bf16.mxu0 %vm517_vm2, %v10826_v48 }
 0x223   :  { %5989 = vmatmul.mubr.msk.bf16.gmra.mrb[44].mxu1 %vm517_vm2, %v10884_v4 }
 0x224   :  { %5992 = vmatprep.mubr.msk.bf16.mxu1 %vm517_vm2, %v10885_v24 }
 0x225   :  { %6253 = vmatmul.mubr.msk.bf16.gmra.mrb[44].mxu0 %vm517_vm2, %v10868_v10 }
 0x226   :  { %6256 = vmatprep.mubr.msk.bf16.mxu0 %vm517_vm2, %v10831_v20 }
 0x22b   :  { %5993 = vmatmul.mubr.msk.bf16.gmra.mrb[48].mxu1 %vm517_vm2, %v10886_v63 }
 0x22c   :  { %5996 = vmatprep.mubr.msk.bf16.mxu1 %vm517_vm2, %v10887_v54 }
 0x22d   :  { %6257 = vmatmul.mubr.msk.bf16.gmra.mrb[48].mxu0 %vm517_vm2, %v8067_v17 }
 0x22e   :  { %6260 = vmatprep.mubr.msk.bf16.mxu0 %vm517_vm2, %v10834_v7 }
 0x233   :  { %5997 = vmatmul.mubr.msk.bf16.gmra.mrb[52].mxu1 %vm517_vm2, %v10888_v32 }
 0x234   :  { %6000 = vmatprep.mubr.msk.bf16.mxu1 %vm517_vm2, %v10889_v58  ;;  %v8740_v58 = vld [vmem:[%s10535_s2] ss:$0 sm:$0xff] }
 0x235   :  { %6261 = vmatmul.mubr.msk.bf16.gmra.mrb[52].mxu0 %vm517_vm2, %v8090_v8 }
 0x236   :  { %6264 = vmatprep.mubr.msk.bf16.mxu0 %vm517_vm2, %v7733_v2 }
 0x23b   :  { %6001 = vmatmul.mubr.msk.bf16.gmra.mrb[56].mxu1 %vm517_vm2, %v10890_v56 }
 0x23c   :  { %6004 = vmatprep.mubr.msk.bf16.mxu1 %vm517_vm2, %v10891_v27 }
 0x23d   :  { %6265 = vmatmul.mubr.msk.bf16.gmra.mrb[56].mxu0 %vm517_vm2, %v8128_v44 }
 0x23e   :  { %6268 = vmatprep.mubr.msk.bf16.mxu0 %vm517_vm2, %v10910_v14 }
 0x243   :  { %6005 = vmatmul.mubr.msk.bf16.gmra.mrb[60].mxu1 %vm517_vm2, %v8528_v28 }
 0x245   :  { %6269 = vmatmul.mubr.msk.bf16.gmra.mrb[60].mxu0 %vm517_vm2, %v3905_v51 }
 0x25e   :  { %v5880_v2 = vpop.f32.mrb[0].mxu1 }
 0x25f   :  { %v2053_v49 = vpop.f32.mrb[1].mxu1 }
 0x260   :  { %v5881_v46 = vpop.f32.mrb[2].mxu1 }
 0x261   :  { %v2056_v1 = vpop.f32.mrb[3].mxu1 }
 0x266   :  { %v5884_v52 = vpop.f32.mrb[4].mxu1 }
 0x267   :  { %v2069_v48 = vpop.f32.mrb[5].mxu1 }
 0x268   :  { %v5885_v17 = vpop.f32.mrb[6].mxu1 }
 0x269   :  { %v8687_v20 = vpop.f32.mrb[7].mxu1 }
 0x26e   :  { %v8689_v8 = vpop.f32.mrb[8].mxu1 }
 0x26f   :  { %v8691_v7 = vpop.f32.mrb[9].mxu1 }
 0x270   :  { %v8693_v44 = vpop.f32.mrb[10].mxu1 }
 0x271   :  { %v8695_v37 = vpop.f32.mrb[11].mxu1 }
 0x276   :  { %v8697_v31 = vpop.f32.mrb[12].mxu1 }
 0x277   :  { %v8699_v62 = vpop.f32.mrb[13].mxu1 }
 0x278   :  { %v8701_v34 = vpop.f32.mrb[14].mxu1 }
 0x279   :  { %v8703_v47 = vpop.f32.mrb[15].mxu1 }
 0x27e   :  { %v8705_v10 = vpop.f32.mrb[16].mxu1 }
 0x27f   :  { %v8707_v59 = vpop.f32.mrb[17].mxu1 }
 0x280   :  { %v8709_v18 = vpop.f32.mrb[18].mxu1 }
 0x281   :  { %v8711_v38 = vpop.f32.mrb[19].mxu1 }
 0x286   :  { %v8713_v57 = vpop.f32.mrb[20].mxu1 }
 0x287   :  { %v8715_v11 = vpop.f32.mrb[21].mxu1 }
 0x288   :  { %v8717_v5 = vpop.f32.mrb[22].mxu1 }
 0x289   :  { %v8719_v0 = vpop.f32.mrb[23].mxu1 }
 0x28e   :  { %v8721_v9 = vpop.f32.mrb[24].mxu1 }
 0x28f   :  { %v8723_v4 = vpop.f32.mrb[25].mxu1 }
 0x290   :  { %v8725_v24 = vpop.f32.mrb[26].mxu1 }
 0x291   :  { %v8727_v63 = vpop.f32.mrb[27].mxu1 }
 0x296   :  { %v8729_v54 = vpop.f32.mrb[28].mxu1 }
 0x297   :  { %v8731_v32 = vpop.f32.mrb[29].mxu1 }
 0x298   :  { %v8733_v30 = vpop.f32.mrb[30].mxu1 }
 0x299   :  { %v8735_v50 = vpop.f32.mrb[31].mxu1 }
 0x2a0   :  { %v6210_v60 = vpop.f32.mrb[0].mxu0 }
 0x2a1   :  { %v6274_v56 = vadd.f32 %v6210_v60, %v5880_v2  ;;  %v3951_v23 = vpop.f32.mrb[1].mxu0 }
 0x2a2   :  { %v6275_v15 = vadd.f32 %v3951_v23, %v2053_v49  ;;  %v6211_v28 = vpop.f32.mrb[2].mxu0 }
 0x2a3   :  { %v8743_v27 = vadd.f32 %v6274_v56, %v8740_v58  ;;  %v6276_v21 = vadd.f32 %v6211_v28, %v5881_v46  ;;  %v3954_v12 = vpop.f32.mrb[3].mxu0 }
 0x2a4   :  { %v8746_v33 = vadd.f32 %v6275_v15, %v8740_v58  ;;  %v6277_v29 = vadd.f32 %v3954_v12, %v2056_v1 }
 0x2a5   :  { %v8751_v51 = vadd.f32 %v6276_v21, %v8740_v58  ;;  %v4478_v16 = vmul.f32 %v8743_v27, %v8743_v27  ;;  %v4345_v61 = vsel %vm4341_vm4, %v8743_v27, 0.0 }
 0x2a6   :  { %v4476_v43 = vmul.f32 %v8746_v33, %v8746_v33  ;;  %v8754_v22 = vadd.f32 %v6277_v29, %v8740_v58  ;;  %v4342_v45 = vsel %vm4341_vm4, %v8746_v33, 0.0 }
 0x2a7   :  { %v4479_v26 = vmul.f32 %v8751_v51, %v8751_v51  ;;  %v4543_v36 = vsel %vm4341_vm4, %v4478_v16, 0.0  ;;  %v4347_v49 = vsel %vm4341_vm4, %v8751_v51, 0.0 }
 0x2a8   :  { %v4343_v40 = vsel %vm4341_vm4, %v8754_v22, 0.0  ;;  %v4477_v3 = vmul.f32 %v8754_v22, %v8754_v22  ;;  %v6214_v42 = vpop.f32.mrb[4].mxu0  ;;  %v4540_v55 = vsel %vm4341_vm4, %v4476_v43, 0.0 }
 0x2a9   :  { %v4344_v13 = vadd.f32 %v4343_v40, %v4342_v45  ;;  %v6278_v19 = vadd.f32 %v6214_v42, %v5884_v52  ;;  %v3967_v35 = vpop.f32.mrb[5].mxu0  ;;  %v4545_v56 = vsel %vm4341_vm4, %v4479_v26, 0.0 }
 0x2aa   :  { %v4541_v39 = vsel %vm4341_vm4, %v4477_v3, 0.0  ;;  %v6279_v41 = vadd.f32 %v3967_v35, %v2069_v48  ;;  %v6215_v6 = vpop.f32.mrb[6].mxu0 }
 0x2ab   :  { %v4346_v53 = vadd.f32 %v4345_v61, %v4344_v13  ;;  %v4542_v25 = vadd.f32 %v4541_v39, %v4540_v55  ;;  %v6280_v14 = vadd.f32 %v6215_v6, %v5885_v17  ;;  %v3970_v2 = vpop.f32.mrb[7].mxu0  ;;  %v8774_v46 = vadd.f32 %v6278_v19, %v8740_v58 }
 0x2ac   :  { %v8777_v1 = vadd.f32 %v6279_v41, %v8740_v58  ;;  %v6281_v52 = vadd.f32 %v3970_v2, %v8687_v20 }
 0x2ad   :  { %v4544_v60 = vadd.f32 %v4543_v36, %v4542_v25  ;;  %v4348_v48 = vadd.f32 %v4347_v49, %v4346_v53  ;;  %v8789_v12 = vadd.f32 %v6280_v14, %v8740_v58  ;;  %v4482_v20 = vmul.f32 %v8774_v46, %v8774_v46 }
 0x2ae   :  { %v4349_v23 = vsel %vm4341_vm4, %v8777_v1, 0.0  ;;  %v4480_v17 = vmul.f32 %v8777_v1, %v8777_v1  ;;  %v8786_v15 = vadd.f32 %v6281_v52, %v8740_v58  ;;  %v4353_v13 = vsel %vm4341_vm4, %v8774_v46, 0.0 }
 0x2af   :  { %v4350_v28 = vadd.f32 %v4349_v23, %v4348_v48  ;;  %v4546_v21 = vadd.f32 %v4545_v56, %v4544_v60  ;;  %v4483_v55 = vmul.f32 %v8789_v12, %v8789_v12  ;;  %v4355_v36 = vsel %vm4341_vm4, %v8789_v12, 0.0 }
 0x2b0   :  { %v4547_v29 = vsel %vm4341_vm4, %v4480_v17, 0.0  ;;  %v4351_v43 = vsel %vm4341_vm4, %v8786_v15, 0.0  ;;  %v6218_v16 = vpop.f32.mrb[8].mxu0  ;;  %v4481_v3 = vmul.f32 %v8786_v15, %v8786_v15 }
 0x2b1   :  { %v4548_v45 = vadd.f32 %v4547_v29, %v4546_v21  ;;  %v4352_v40 = vadd.f32 %v4351_v43, %v4350_v28  ;;  %v6282_v42 = vadd.f32 %v6218_v16, %v8689_v8  ;;  %v3983_v61 = vpop.f32.mrb[9].mxu0  ;;  %v4553_v48 = vsel %vm4341_vm4, %v4483_v55, 0.0 }
 0x2b2   :  { %v6283_v19 = vadd.f32 %v3983_v61, %v8691_v7  ;;  %v6219_v35 = vpop.f32.mrb[10].mxu0  ;;  %v4549_v39 = vsel %vm4341_vm4, %v4481_v3, 0.0  ;;  %v4551_v7 = vsel %vm4341_vm4, %v4482_v20, 0.0 }
 0x2b3   :  { %v4354_v26 = vadd.f32 %v4353_v13, %v4352_v40  ;;  %v6284_v41 = vadd.f32 %v6219_v35, %v8693_v44  ;;  %v3986_v6 = vpop.f32.mrb[11].mxu0  ;;  %v4550_v8 = vadd.f32 %v4549_v39, %v4548_v45  ;;  %v8814_v14 = vadd.f32 %v6282_v42, %v8740_v58 }
 0x2b4   :  { %v8809_v53 = vadd.f32 %v6283_v19, %v8740_v58  ;;  %v6285_v25 = vadd.f32 %v3986_v6, %v8695_v37 }
 0x2b5   :  { %v4356_v2 = vadd.f32 %v4355_v36, %v4354_v26  ;;  %v4552_v49 = vadd.f32 %v4551_v7, %v4550_v8  ;;  %v8825_v37 = vadd.f32 %v6284_v41, %v8740_v58  ;;  %v4486_v29 = vmul.f32 %v8814_v14, %v8814_v14 }
 0x2b6   :  { %v4357_v44 = vsel %vm4341_vm4, %v8809_v53, 0.0  ;;  %v4484_v52 = vmul.f32 %v8809_v53, %v8809_v53  ;;  %v8821_v60 = vadd.f32 %v6285_v25, %v8740_v58  ;;  %v4361_v40 = vsel %vm4341_vm4, %v8814_v14, 0.0 }
 0x2b7   :  { %v4358_v56 = vadd.f32 %v4357_v44, %v4356_v2  ;;  %v4554_v23 = vadd.f32 %v4553_v48, %v4552_v49  ;;  %v4487_v19 = vmul.f32 %v8825_v37, %v8825_v37  ;;  %v4559_v36 = vsel %vm4341_vm4, %v4486_v29, 0.0 }
 0x2b8   :  { %v4555_v17 = vsel %vm4341_vm4, %v4484_v52, 0.0  ;;  %v4359_v28 = vsel %vm4341_vm4, %v8821_v60, 0.0  ;;  %v4485_v21 = vmul.f32 %v8821_v60, %v8821_v60  ;;  %v6222_v20 = vpop.f32.mrb[12].mxu0 }
 0x2b9   :  { %v4360_v43 = vadd.f32 %v4359_v28, %v4358_v56  ;;  %v6286_v16 = vadd.f32 %v6222_v20, %v8697_v31  ;;  %v3999_v45 = vpop.f32.mrb[13].mxu0  ;;  %v4556_v3 = vadd.f32 %v4555_v17, %v4554_v23  ;;  %v4363_v31 = vsel %vm4341_vm4, %v8825_v37, 0.0 }
 0x2ba   :  { %v4557_v42 = vsel %vm4341_vm4, %v4485_v21, 0.0  ;;  %v6287_v61 = vadd.f32 %v3999_v45, %v8699_v62  ;;  %v6223_v13 = vpop.f32.mrb[14].mxu0  ;;  %v4561_v49 = vsel %vm4341_vm4, %v4487_v19, 0.0 }
 0x2bb   :  { %v4362_v35 = vadd.f32 %v4361_v40, %v4360_v43  ;;  %v6288_v55 = vadd.f32 %v6223_v13, %v8701_v34  ;;  %v4002_v26 = vpop.f32.mrb[15].mxu0  ;;  %v4558_v39 = vadd.f32 %v4557_v42, %v4556_v3  ;;  %v8850_v62 = vadd.f32 %v6286_v16, %v8740_v58 }
 0x2bc   :  { %v8845_v41 = vadd.f32 %v6287_v61, %v8740_v58  ;;  %v6289_v6 = vadd.f32 %v4002_v26, %v8703_v47 }
 0x2bd   :  { %v4364_v8 = vadd.f32 %v4363_v31, %v4362_v35  ;;  %v4560_v25 = vadd.f32 %v4559_v36, %v4558_v39  ;;  %v8861_v47 = vadd.f32 %v6288_v55, %v8740_v58  ;;  %v4490_v28 = vmul.f32 %v8850_v62, %v8850_v62 }
 0x2be   :  { %v4365_v34 = vsel %vm4341_vm4, %v8845_v41, 0.0  ;;  %v4488_v7 = vmul.f32 %v8845_v41, %v8845_v41  ;;  %v8857_v2 = vadd.f32 %v6289_v6, %v8740_v58  ;;  %v4369_v43 = vsel %vm4341_vm4, %v8850_v62, 0.0 }
 0x2bf   :  { %v4366_v44 = vadd.f32 %v4365_v34, %v4364_v8  ;;  %v4562_v52 = vadd.f32 %v4561_v49, %v4560_v25  ;;  %v4491_v42 = vmul.f32 %v8861_v47, %v8861_v47  ;;  %v4567_v31 = vsel %vm4341_vm4, %v4490_v28, 0.0 }
 0x2c0   :  { %v4563_v48 = vsel %vm4341_vm4, %v4488_v7, 0.0  ;;  %v4367_v56 = vsel %vm4341_vm4, %v8857_v2, 0.0  ;;  %v4489_v23 = vmul.f32 %v8857_v2, %v8857_v2  ;;  %v6226_v17 = vpop.f32.mrb[16].mxu0 }
 0x2c1   :  { %v4368_v21 = vadd.f32 %v4367_v56, %v4366_v44  ;;  %v6290_v20 = vadd.f32 %v6226_v17, %v8705_v10  ;;  %v4015_v29 = vpop.f32.mrb[17].mxu0  ;;  %v4564_v16 = vadd.f32 %v4563_v48, %v4562_v52  ;;  %v4371_v10 = vsel %vm4341_vm4, %v8861_v47, 0.0 }
 0x2c2   :  { %v4565_v45 = vsel %vm4341_vm4, %v4489_v23, 0.0  ;;  %v6291_v40 = vadd.f32 %v4015_v29, %v8707_v59  ;;  %v6227_v3 = vpop.f32.mrb[18].mxu0  ;;  %v4569_v25 = vsel %vm4341_vm4, %v4491_v42, 0.0 }
 0x2c3   :  { %v4370_v61 = vadd.f32 %v4369_v43, %v4368_v21  ;;  %v6292_v13 = vadd.f32 %v6227_v3, %v8709_v18  ;;  %v4018_v19 = vpop.f32.mrb[19].mxu0  ;;  %v4566_v35 = vadd.f32 %v4565_v45, %v4564_v16  ;;  %v8886_v59 = vadd.f32 %v6290_v20, %v8740_v58 }
 0x2c4   :  { %v8881_v55 = vadd.f32 %v6291_v40, %v8740_v58  ;;  %v6293_v26 = vadd.f32 %v4018_v19, %v8711_v38 }
 0x2c5   :  { %v4372_v39 = vadd.f32 %v4371_v10, %v4370_v61  ;;  %v4568_v6 = vadd.f32 %v4567_v31, %v4566_v35  ;;  %v8897_v38 = vadd.f32 %v6292_v13, %v8740_v58  ;;  %v4494_v56 = vmul.f32 %v8886_v59, %v8886_v59 }
 0x2c6   :  { %v4373_v18 = vsel %vm4341_vm4, %v8881_v55, 0.0  ;;  %v4492_v36 = vmul.f32 %v8881_v55, %v8881_v55  ;;  %v8893_v8 = vadd.f32 %v6293_v26, %v8740_v58  ;;  %v4377_v21 = vsel %vm4341_vm4, %v8886_v59, 0.0 }
 0x2c7   :  { %v4374_v34 = vadd.f32 %v4373_v18, %v4372_v39  ;;  %v4570_v7 = vadd.f32 %v4569_v25, %v4568_v6  ;;  %v4495_v45 = vmul.f32 %v8897_v38, %v8897_v38  ;;  %v4575_v10 = vsel %vm4341_vm4, %v4494_v56, 0.0 }
 0x2c8   :  { %v4571_v49 = vsel %vm4341_vm4, %v4492_v36, 0.0  ;;  %v4375_v44 = vsel %vm4341_vm4, %v8893_v8, 0.0  ;;  %v4493_v52 = vmul.f32 %v8893_v8, %v8893_v8  ;;  %v6230_v48 = vpop.f32.mrb[20].mxu0 }
 0x2c9   :  { %v4376_v23 = vadd.f32 %v4375_v44, %v4374_v34  ;;  %v6294_v17 = vadd.f32 %v6230_v48, %v8713_v57  ;;  %v4031_v28 = vpop.f32.mrb[21].mxu0  ;;  %v4572_v20 = vadd.f32 %v4571_v49, %v4570_v7  ;;  %v4379_v57 = vsel %vm4341_vm4, %v8897_v38, 0.0 }
 0x2ca   :  { %v4573_v29 = vsel %vm4341_vm4, %v4493_v52, 0.0  ;;  %v6295_v43 = vadd.f32 %v4031_v28, %v8715_v11  ;;  %v6231_v16 = vpop.f32.mrb[22].mxu0  ;;  %v4577_v6 = vsel %vm4341_vm4, %v4495_v45, 0.0 }
 0x2cb   :  { %v4378_v40 = vadd.f32 %v4377_v21, %v4376_v23  ;;  %v6296_v3 = vadd.f32 %v6231_v16, %v8717_v5  ;;  %v4034_v42 = vpop.f32.mrb[23].mxu0  ;;  %v4574_v61 = vadd.f32 %v4573_v29, %v4572_v20  ;;  %v8922_v11 = vadd.f32 %v6294_v17, %v8740_v58 }
 0x2cc   :  { %v8917_v13 = vadd.f32 %v6295_v43, %v8740_v58  ;;  %v6297_v19 = vadd.f32 %v4034_v42, %v8719_v0 }
 0x2cd   :  { %v4380_v35 = vadd.f32 %v4379_v57, %v4378_v40  ;;  %v4576_v26 = vadd.f32 %v4575_v10, %v4574_v61  ;;  %v8933_v0 = vadd.f32 %v6296_v3, %v8740_v58  ;;  %v4498_v44 = vmul.f32 %v8922_v11, %v8922_v11 }
 0x2ce   :  { %v4381_v5 = vsel %vm4341_vm4, %v8917_v13, 0.0  ;;  %v4496_v31 = vmul.f32 %v8917_v13, %v8917_v13  ;;  %v8929_v39 = vadd.f32 %v6297_v19, %v8740_v58  ;;  %v4385_v23 = vsel %vm4341_vm4, %v8922_v11, 0.0 }
 0x2cf   :  { %v4382_v18 = vadd.f32 %v4381_v5, %v4380_v35  ;;  %v4578_v36 = vadd.f32 %v4577_v6, %v4576_v26  ;;  %v4499_v29 = vmul.f32 %v8933_v0, %v8933_v0  ;;  %v4583_v57 = vsel %vm4341_vm4, %v4498_v44, 0.0 }
 0x2d0   :  { %v4579_v25 = vsel %vm4341_vm4, %v4496_v31, 0.0  ;;  %v4383_v34 = vsel %vm4341_vm4, %v8929_v39, 0.0  ;;  %v4497_v7 = vmul.f32 %v8929_v39, %v8929_v39  ;;  %v6234_v49 = vpop.f32.mrb[24].mxu0 }
 0x2d1   :  { %v4384_v52 = vadd.f32 %v4383_v34, %v4382_v18  ;;  %v6298_v48 = vadd.f32 %v6234_v49, %v8721_v9  ;;  %v4047_v56 = vpop.f32.mrb[25].mxu0  ;;  %v4580_v17 = vadd.f32 %v4579_v25, %v4578_v36  ;;  %v4387_v9 = vsel %vm4341_vm4, %v8933_v0, 0.0 }
 0x2d2   :  { %v4581_v28 = vsel %vm4341_vm4, %v4497_v7, 0.0  ;;  %v6299_v21 = vadd.f32 %v4047_v56, %v8723_v4  ;;  %v6235_v20 = vpop.f32.mrb[26].mxu0  ;;  %v4585_v26 = vsel %vm4341_vm4, %v4499_v29, 0.0 }
 0x2d3   :  { %v4386_v43 = vadd.f32 %v4385_v23, %v4384_v52  ;;  %v6300_v16 = vadd.f32 %v6235_v20, %v8725_v24  ;;  %v4050_v45 = vpop.f32.mrb[27].mxu0  ;;  %v4582_v40 = vadd.f32 %v4581_v28, %v4580_v17  ;;  %v8958_v4 = vadd.f32 %v6298_v48, %v8740_v58 }
 0x2d4   :  { %v8953_v3 = vadd.f32 %v6299_v21, %v8740_v58  ;;  %v6301_v42 = vadd.f32 %v4050_v45, %v8727_v63 }
 0x2d5   :  { %v4388_v61 = vadd.f32 %v4387_v9, %v4386_v43  ;;  %v4584_v19 = vadd.f32 %v4583_v57, %v4582_v40  ;;  %v8969_v63 = vadd.f32 %v6300_v16, %v8740_v58  ;;  %v4502_v34 = vmul.f32 %v8958_v4, %v8958_v4 }
 0x2d6   :  { %v4389_v24 = vsel %vm4341_vm4, %v8953_v3, 0.0  ;;  %v4500_v10 = vmul.f32 %v8953_v3, %v8953_v3  ;;  %v8965_v35 = vadd.f32 %v6301_v42, %v8740_v58  ;;  %v4393_v52 = vsel %vm4341_vm4, %v8958_v4, 0.0 }
 0x2d7   :  { %v4390_v5 = vadd.f32 %v4389_v24, %v4388_v61  ;;  %v4586_v31 = vadd.f32 %v4585_v26, %v4584_v19  ;;  %v4503_v28 = vmul.f32 %v8969_v63, %v8969_v63  ;;  %v4591_v9 = vsel %vm4341_vm4, %v4502_v34, 0.0 }
 0x2d8   :  { %v4587_v6 = vsel %vm4341_vm4, %v4500_v10, 0.0  ;;  %v4391_v18 = vsel %vm4341_vm4, %v8965_v35, 0.0  ;;  %v4501_v36 = vmul.f32 %v8965_v35, %v8965_v35  ;;  %v6238_v25 = vpop.f32.mrb[28].mxu0 }
 0x2d9   :  { %v4392_v7 = vadd.f32 %v4391_v18, %v4390_v5  ;;  %v6302_v49 = vadd.f32 %v6238_v25, %v8729_v54  ;;  %v4063_v44 = vpop.f32.mrb[29].mxu0  ;;  %v4588_v48 = vadd.f32 %v4587_v6, %v4586_v31  ;;  %v4395_v54 = vsel %vm4341_vm4, %v8969_v63, 0.0 }
 0x2da   :  { %v4589_v56 = vsel %vm4341_vm4, %v4501_v36, 0.0  ;;  %v6303_v23 = vadd.f32 %v4063_v44, %v8731_v32  ;;  %v6239_v17 = vpop.f32.mrb[30].mxu0  ;;  %v4593_v24 = vsel %vm4341_vm4, %v4503_v28, 0.0 }
 0x2db   :  { %v4394_v21 = vadd.f32 %v4393_v52, %v4392_v7  ;;  %v6304_v20 = vadd.f32 %v6239_v17, %v8733_v30  ;;  %v4066_v29 = vpop.f32.mrb[31].mxu0  ;;  %v4590_v43 = vadd.f32 %v4589_v56, %v4588_v48  ;;  %v8994_v32 = vadd.f32 %v6302_v49, %v8740_v58 }
 0x2dc   :  { %v8989_v16 = vadd.f32 %v6303_v23, %v8740_v58  ;;  %v6305_v45 = vadd.f32 %v4066_v29, %v8735_v50 }
 0x2dd   :  { %v4396_v40 = vadd.f32 %v4395_v54, %v4394_v21  ;;  %v4592_v42 = vadd.f32 %v4591_v9, %v4590_v43  ;;  %v9005_v10 = vadd.f32 %v6304_v20, %v8740_v58  ;;  %v4506_v34 = vmul.f32 %v8994_v32, %v8994_v32 }
 0x2de   :  { %v4397_v30 = vsel %vm4341_vm4, %v8989_v16, 0.0  ;;  %v4504_v57 = vmul.f32 %v8989_v16, %v8989_v16  ;;  %v9001_v61 = vadd.f32 %v6305_v45, %v8740_v58  ;;  %v5978_v19 = vpop.f32.mrb[32].mxu1  ;;  %v4401_v48 = vsel %vm4341_vm4, %v8994_v32, 0.0 }
 0x2df   :  { %v4398_v50 = vadd.f32 %v4397_v30, %v4396_v40  ;;  %v2567_v26 = vpop.f32.mrb[33].mxu1  ;;  %v4594_v5 = vadd.f32 %v4593_v24, %v4592_v42  ;;  %v4507_v21 = vmul.f32 %v9005_v10, %v9005_v10  ;;  %v4403_v43 = vsel %vm4341_vm4, %v9005_v10, 0.0 }
 0x2e0   :  { %v4595_v31 = vsel %vm4341_vm4, %v4504_v57, 0.0  ;;  %v4399_v6 = vsel %vm4341_vm4, %v9001_v61, 0.0  ;;  %v4505_v18 = vmul.f32 %v9001_v61, %v9001_v61  ;;  %v6242_v36 = vpop.f32.mrb[32].mxu0  ;;  %v5979_v25 = vpop.f32.mrb[34].mxu1  ;;  %v4599_v42 = vsel %vm4341_vm4, %v4506_v34, 0.0 }
 0x2e1   :  { %v4400_v7 = vadd.f32 %v4399_v6, %v4398_v50  ;;  %v6306_v49 = vadd.f32 %v6242_v36, %v5978_v19  ;;  %v4079_v44 = vpop.f32.mrb[33].mxu0  ;;  %v2570_v52 = vpop.f32.mrb[35].mxu1  ;;  %v4596_v56 = vadd.f32 %v4595_v31, %v4594_v5  ;;  %v4601_v31 = vsel %vm4341_vm4, %v4507_v21, 0.0 }
 0x2e2   :  { %v4597_v23 = vsel %vm4341_vm4, %v4505_v18, 0.0  ;;  %v6307_v17 = vadd.f32 %v4079_v44, %v2567_v26  ;;  %v6243_v28 = vpop.f32.mrb[34].mxu0 }
 0x2e3   :  { %v4402_v20 = vadd.f32 %v4401_v48, %v4400_v7  ;;  %v6308_v29 = vadd.f32 %v6243_v28, %v5979_v25  ;;  %v4082_v54 = vpop.f32.mrb[35].mxu0  ;;  %v4598_v45 = vadd.f32 %v4597_v23, %v4596_v56  ;;  %v9026_v30 = vadd.f32 %v6306_v49, %v8740_v58 }
 0x2e4   :  { %v9022_v9 = vadd.f32 %v6307_v17, %v8740_v58  ;;  %v6309_v40 = vadd.f32 %v4082_v54, %v2570_v52 }
 0x2e5   :  { %v4404_v57 = vadd.f32 %v4403_v43, %v4402_v20  ;;  %v4600_v19 = vadd.f32 %v4599_v42, %v4598_v45  ;;  %v9037_v18 = vadd.f32 %v6308_v29, %v8740_v58  ;;  %v4510_v48 = vmul.f32 %v9026_v30, %v9026_v30 }
 0x2e6   :  { %v4405_v24 = vsel %vm4341_vm4, %v9022_v9, 0.0  ;;  %v4508_v50 = vmul.f32 %v9022_v9, %v9022_v9  ;;  %v9033_v26 = vadd.f32 %v6309_v40, %v8740_v58  ;;  %v5982_v5 = vpop.f32.mrb[36].mxu1  ;;  %v4409_v21 = vsel %vm4341_vm4, %v9026_v30, 0.0 }
 0x2e7   :  { %v4406_v6 = vadd.f32 %v4405_v24, %v4404_v57  ;;  %v2583_v36 = vpop.f32.mrb[37].mxu1  ;;  %v4602_v25 = vadd.f32 %v4601_v31, %v4600_v19  ;;  %v4511_v45 = vmul.f32 %v9037_v18, %v9037_v18  ;;  %v4411_v19 = vsel %vm4341_vm4, %v9037_v18, 0.0 }
 0x2e8   :  { %v4603_v34 = vsel %vm4341_vm4, %v4508_v50, 0.0  ;;  %v4407_v7 = vsel %vm4341_vm4, %v9033_v26, 0.0  ;;  %v4509_v49 = vmul.f32 %v9033_v26, %v9033_v26  ;;  %v6246_v44 = vpop.f32.mrb[36].mxu0  ;;  %v5983_v52 = vpop.f32.mrb[38].mxu1  ;;  %v4607_v31 = vsel %vm4341_vm4, %v4510_v48, 0.0 }
 0x2e9   :  { %v4408_v56 = vadd.f32 %v4407_v7, %v4406_v6  ;;  %v6310_v23 = vadd.f32 %v6246_v44, %v5982_v5  ;;  %v4095_v17 = vpop.f32.mrb[37].mxu0  ;;  %v2586_v28 = vpop.f32.mrb[39].mxu1  ;;  %v4604_v20 = vadd.f32 %v4603_v34, %v4602_v25 }
 0x2ea   :  { %v4605_v29 = vsel %vm4341_vm4, %v4509_v49, 0.0  ;;  %v6311_v54 = vadd.f32 %v4095_v17, %v2583_v36  ;;  %v6247_v43 = vpop.f32.mrb[38].mxu0 }
 0x2eb   :  { %v4410_v40 = vadd.f32 %v4409_v21, %v4408_v56  ;;  %v6312_v42 = vadd.f32 %v6247_v43, %v5983_v52  ;;  %v4098_v57 = vpop.f32.mrb[39].mxu0  ;;  %v4606_v24 = vadd.f32 %v4605_v29, %v4604_v20  ;;  %v9058_v6 = vadd.f32 %v6310_v23, %v8740_v58 }
 0x2ec   :  { %v9054_v50 = vadd.f32 %v6311_v54, %v8740_v58  ;;  %v6313_v5 = vadd.f32 %v4098_v57, %v2586_v28  ;;  %v4609_v52 = vsel %vm4341_vm4, %v4511_v45, 0.0 }
 0x2ed   :  { %10911 = vst [vmem:[#allocation7_spill] sm:$0xff] %v9058_v6  ;;  %v4412_v36 = vadd.f32 %v4411_v19, %v4410_v40  ;;  %v4608_v25 = vadd.f32 %v4607_v31, %v4606_v24  ;;  %v9069_v48 = vadd.f32 %v6312_v42, %v8740_v58  ;;  %v4514_v43 = vmul.f32 %v9058_v6, %v9058_v6 }
 0x2ee   :  { %v4413_v34 = vsel %vm4341_vm4, %v9054_v50, 0.0  ;;  %v4512_v7 = vmul.f32 %v9054_v50, %v9054_v50  ;;  %v9065_v49 = vadd.f32 %v6313_v5, %v8740_v58  ;;  %v5986_v44 = vpop.f32.mrb[40].mxu1  ;;  %v4417_v19 = vsel %vm4341_vm4, %v9058_v6, 0.0 }
 0x2ef   :  { %v4414_v56 = vadd.f32 %v4413_v34, %v4412_v36  ;;  %10912 = vst [vmem:[#allocation60_spill] sm:$0xff] %v9069_v48  ;;  %v2599_v23 = vpop.f32.mrb[41].mxu1  ;;  %v4610_v17 = vadd.f32 %v4609_v52, %v4608_v25  ;;  %v4515_v25 = vmul.f32 %v9069_v48, %v9069_v48 }
 0x2f0   :  { %v4611_v28 = vsel %vm4341_vm4, %v4512_v7, 0.0  ;;  %v4415_v21 = vsel %vm4341_vm4, %v9065_v49, 0.0  ;;  %v4513_v20 = vmul.f32 %v9065_v49, %v9065_v49  ;;  %v6250_v29 = vpop.f32.mrb[40].mxu0  ;;  %v5987_v54 = vpop.f32.mrb[42].mxu1 }
 0x2f1   :  { %v4416_v45 = vadd.f32 %v4415_v21, %v4414_v56  ;;  %v6314_v40 = vadd.f32 %v6250_v29, %v5986_v44  ;;  %v4111_v57 = vpop.f32.mrb[41].mxu0  ;;  %v2602_v42 = vpop.f32.mrb[43].mxu1  ;;  %v4612_v24 = vadd.f32 %v4611_v28, %v4610_v17  ;;  %v4419_v56 = vsel %vm4341_vm4, %v9069_v48, 0.0 }
 0x2f2   :  { %v4613_v5 = vsel %vm4341_vm4, %v4513_v20, 0.0  ;;  %v6315_v31 = vadd.f32 %v4111_v57, %v2599_v23  ;;  %v6251_v36 = vpop.f32.mrb[42].mxu0  ;;  %v4615_v17 = vsel %vm4341_vm4, %v4514_v43, 0.0 }
 0x2f3   :  { %v4418_v34 = vadd.f32 %v4417_v19, %v4416_v45  ;;  %v6316_v7 = vadd.f32 %v6251_v36, %v5987_v54  ;;  %v4114_v52 = vpop.f32.mrb[43].mxu0  ;;  %v4614_v44 = vadd.f32 %v4613_v5, %v4612_v24  ;;  %v9090_v28 = vadd.f32 %v6314_v40, %v8740_v58 }
 0x2f4   :  { %v9086_v21 = vadd.f32 %v6315_v31, %v8740_v58  ;;  %v6317_v29 = vadd.f32 %v4114_v52, %v2602_v42  ;;  %v4617_v24 = vsel %vm4341_vm4, %v4515_v25, 0.0 }
 0x2f5   :  { %10914 = vst [vmem:[#allocation9_spill] sm:$0xff] %v9090_v28  ;;  %v4420_v23 = vadd.f32 %v4419_v56, %v4418_v34  ;;  %v4616_v20 = vadd.f32 %v4615_v17, %v4614_v44  ;;  %v9101_v43 = vadd.f32 %v6316_v7, %v8740_v58  ;;  %v4518_v44 = vmul.f32 %v9090_v28, %v9090_v28 }
 0x2f6   :  { %10913 = vst [vmem:[#allocation8_spill] sm:$0xff] %v9086_v21  ;;  %v4421_v45 = vsel %vm4341_vm4, %v9086_v21, 0.0  ;;  %v4516_v54 = vmul.f32 %v9086_v21, %v9086_v21  ;;  %v9097_v57 = vadd.f32 %v6317_v29, %v8740_v58  ;;  %v5990_v19 = vpop.f32.mrb[44].mxu1 }
 0x2f7   :  { %v4422_v42 = vadd.f32 %v4421_v45, %v4420_v23  ;;  %10916 = vst [vmem:[#allocation13_spill] sm:$0xff] %v9101_v43  ;;  %v2615_v40 = vpop.f32.mrb[45].mxu1  ;;  %v4618_v5 = vadd.f32 %v4617_v24, %v4616_v20  ;;  %v4425_v23 = vsel %vm4341_vm4, %v9090_v28, 0.0 }
 0x2f8   :  { %10915 = vst [vmem:[#allocation12_spill] sm:$0xff] %v9097_v57  ;;  %v4619_v31 = vsel %vm4341_vm4, %v4516_v54, 0.0  ;;  %v4423_v36 = vsel %vm4341_vm4, %v9097_v57, 0.0  ;;  %v4517_v34 = vmul.f32 %v9097_v57, %v9097_v57  ;;  %v6254_v52 = vpop.f32.mrb[44].mxu0  ;;  %v5991_v56 = vpop.f32.mrb[46].mxu1  ;;  %v4519_v57 = vmul.f32 %v9101_v43, %v9101_v43 }
 0x2f9   :  { %v4424_v25 = vadd.f32 %v4423_v36, %v4422_v42  ;;  %v6318_v29 = vadd.f32 %v6254_v52, %v5990_v19  ;;  %v4127_v17 = vpop.f32.mrb[45].mxu0  ;;  %v2618_v7 = vpop.f32.mrb[47].mxu1  ;;  %v4620_v20 = vadd.f32 %v4619_v31, %v4618_v5  ;;  %v4427_v42 = vsel %vm4341_vm4, %v9101_v43, 0.0 }
 0x2fa   :  { %v4621_v45 = vsel %vm4341_vm4, %v4517_v34, 0.0  ;;  %v6319_v54 = vadd.f32 %v4127_v17, %v2615_v40  ;;  %v6255_v24 = vpop.f32.mrb[46].mxu0  ;;  %v4623_v5 = vsel %vm4341_vm4, %v4518_v44, 0.0 }
 0x2fb   :  { %v4426_v21 = vadd.f32 %v4425_v23, %v4424_v25  ;;  %v6320_v48 = vadd.f32 %v6255_v24, %v5991_v56  ;;  %v4130_v6 = vpop.f32.mrb[47].mxu0  ;;  %v4622_v19 = vadd.f32 %v4621_v45, %v4620_v20  ;;  %v9122_v31 = vadd.f32 %v6318_v29, %v8740_v58 }
 0x2fc   :  { %v9118_v36 = vadd.f32 %v6319_v54, %v8740_v58  ;;  %v6321_v52 = vadd.f32 %v4130_v6, %v2618_v7  ;;  %v4625_v20 = vsel %vm4341_vm4, %v4519_v57, 0.0 }
 0x2fd   :  { %10918 = vst [vmem:[#allocation14_spill] sm:$0xff] %v9122_v31  ;;  %v4428_v40 = vadd.f32 %v4427_v42, %v4426_v21  ;;  %v4624_v34 = vadd.f32 %v4623_v5, %v4622_v19  ;;  %v9133_v44 = vadd.f32 %v6320_v48, %v8740_v58  ;;  %v4522_v19 = vmul.f32 %v9122_v31, %v9122_v31 }
 0x2fe   :  { %10917 = vst [vmem:[#allocation61_spill] sm:$0xff] %v9118_v36  ;;  %v4429_v25 = vsel %vm4341_vm4, %v9118_v36, 0.0  ;;  %v4520_v56 = vmul.f32 %v9118_v36, %v9118_v36  ;;  %v9129_v17 = vadd.f32 %v6321_v52, %v8740_v58  ;;  %v5994_v23 = vpop.f32.mrb[48].mxu1 }
 0x2ff   :  { %v4430_v6 = vadd.f32 %v4429_v25, %v4428_v40  ;;  %10920 = vst [vmem:[#allocation18_spill] sm:$0xff] %v9133_v44  ;;  %v2631_v29 = vpop.f32.mrb[49].mxu1  ;;  %v4626_v7 = vadd.f32 %v4625_v20, %v4624_v34  ;;  %v4433_v40 = vsel %vm4341_vm4, %v9122_v31, 0.0 }
 0x300   :  { %10919 = vst [vmem:[#allocation15_spill] sm:$0xff] %v9129_v17  ;;  %v4627_v21 = vsel %vm4341_vm4, %v4520_v56, 0.0  ;;  %v4431_v45 = vsel %vm4341_vm4, %v9129_v17, 0.0  ;;  %v4521_v54 = vmul.f32 %v9129_v17, %v9129_v17  ;;  %v6258_v24 = vpop.f32.mrb[48].mxu0  ;;  %v5995_v42 = vpop.f32.mrb[50].mxu1  ;;  %v4523_v17 = vmul.f32 %v9133_v44, %v9133_v44 }
 0x301   :  { %v4432_v57 = vadd.f32 %v4431_v45, %v4430_v6  ;;  %v6322_v52 = vadd.f32 %v6258_v24, %v5994_v23  ;;  %v4143_v5 = vpop.f32.mrb[49].mxu0  ;;  %v2634_v48 = vpop.f32.mrb[51].mxu1  ;;  %v4628_v34 = vadd.f32 %v4627_v21, %v4626_v7  ;;  %v4435_v6 = vsel %vm4341_vm4, %v9133_v44, 0.0 }
 0x302   :  { %v4629_v25 = vsel %vm4341_vm4, %v4521_v54, 0.0  ;;  %v6323_v56 = vadd.f32 %v4143_v5, %v2631_v29  ;;  %v6259_v20 = vpop.f32.mrb[50].mxu0  ;;  %v4631_v7 = vsel %vm4341_vm4, %v4522_v19, 0.0 }
 0x303   :  { %v4434_v36 = vadd.f32 %v4433_v40, %v4432_v57  ;;  %v6324_v43 = vadd.f32 %v6259_v20, %v5995_v42  ;;  %v4146_v28 = vpop.f32.mrb[51].mxu0  ;;  %v4630_v23 = vadd.f32 %v4629_v25, %v4628_v34  ;;  %v9154_v21 = vadd.f32 %v6322_v52, %v8740_v58 }
 0x304   :  { %v9150_v45 = vadd.f32 %v6323_v56, %v8740_v58  ;;  %v6325_v24 = vadd.f32 %v4146_v28, %v2634_v48  ;;  %v4633_v34 = vsel %vm4341_vm4, %v4523_v17, 0.0 }
 0x305   :  { %10922 = vst [vmem:[#allocation65_spill] sm:$0xff] %v9154_v21  ;;  %v4436_v29 = vadd.f32 %v4435_v6, %v4434_v36  ;;  %v4632_v54 = vadd.f32 %v4631_v7, %v4630_v23  ;;  %v9165_v19 = vadd.f32 %v6324_v43, %v8740_v58  ;;  %v4526_v23 = vmul.f32 %v9154_v21, %v9154_v21 }
 0x306   :  { %10921 = vst [vmem:[#allocation19_spill] sm:$0xff] %v9150_v45  ;;  %v4437_v57 = vsel %vm4341_vm4, %v9150_v45, 0.0  ;;  %v4524_v42 = vmul.f32 %v9150_v45, %v9150_v45  ;;  %v9161_v5 = vadd.f32 %v6325_v24, %v8740_v58  ;;  %v5998_v40 = vpop.f32.mrb[52].mxu1 }
 0x307   :  { %v4438_v28 = vadd.f32 %v4437_v57, %v4436_v29  ;;  %10924 = vst [vmem:[#allocation21_spill] sm:$0xff] %v9165_v19  ;;  %v2647_v52 = vpop.f32.mrb[53].mxu1  ;;  %v4634_v48 = vadd.f32 %v4633_v34, %v4632_v54  ;;  %v4441_v29 = vsel %vm4341_vm4, %v9154_v21, 0.0 }
 0x308   :  { %10923 = vst [vmem:[#allocation20_spill] sm:$0xff] %v9161_v5  ;;  %v4635_v36 = vsel %vm4341_vm4, %v4524_v42, 0.0  ;;  %v4439_v25 = vsel %vm4341_vm4, %v9161_v5, 0.0  ;;  %v4525_v56 = vmul.f32 %v9161_v5, %v9161_v5  ;;  %v6262_v20 = vpop.f32.mrb[52].mxu0  ;;  %v5999_v6 = vpop.f32.mrb[54].mxu1  ;;  %v4527_v5 = vmul.f32 %v9165_v19, %v9165_v19 }
 0x309   :  { %v4440_v17 = vadd.f32 %v4439_v25, %v4438_v28  ;;  %v6326_v24 = vadd.f32 %v6262_v20, %v5998_v40  ;;  %v4159_v7 = vpop.f32.mrb[53].mxu0  ;;  %v2650_v43 = vpop.f32.mrb[55].mxu1  ;;  %v4636_v54 = vadd.f32 %v4635_v36, %v4634_v48  ;;  %v4443_v28 = vsel %vm4341_vm4, %v9165_v19, 0.0 }
 0x30a   :  { %v4637_v57 = vsel %vm4341_vm4, %v4525_v56, 0.0  ;;  %v6327_v42 = vadd.f32 %v4159_v7, %v2647_v52  ;;  %v6263_v34 = vpop.f32.mrb[54].mxu0  ;;  %v4639_v48 = vsel %vm4341_vm4, %v4526_v23, 0.0 }
 0x30b   :  { %v4442_v45 = vadd.f32 %v4441_v29, %v4440_v17  ;;  %v6328_v44 = vadd.f32 %v6263_v34, %v5999_v6  ;;  %v4162_v31 = vpop.f32.mrb[55].mxu0  ;;  %v4638_v40 = vadd.f32 %v4637_v57, %v4636_v54  ;;  %v9186_v36 = vadd.f32 %v6326_v24, %v8740_v58 }
 0x30c   :  { %v9182_v25 = vadd.f32 %v6327_v42, %v8740_v58  ;;  %v6329_v20 = vadd.f32 %v4162_v31, %v2650_v43  ;;  %v4641_v54 = vsel %vm4341_vm4, %v4527_v5, 0.0 }
 0x30d   :  { %10926 = vst [vmem:[#allocation34_spill] sm:$0xff] %v9186_v36  ;;  %v4444_v52 = vadd.f32 %v4443_v28, %v4442_v45  ;;  %v4640_v56 = vadd.f32 %v4639_v48, %v4638_v40  ;;  %v9197_v23 = vadd.f32 %v6328_v44, %v8740_v58  ;;  %v4530_v40 = vmul.f32 %v9186_v36, %v9186_v36 }
 0x30e   :  { %10925 = vst [vmem:[#allocation66_spill] sm:$0xff] %v9182_v25  ;;  %v4445_v17 = vsel %vm4341_vm4, %v9182_v25, 0.0  ;;  %v4528_v6 = vmul.f32 %v9182_v25, %v9182_v25  ;;  %v9193_v7 = vadd.f32 %v6329_v20, %v8740_v58  ;;  %v6002_v29 = vpop.f32.mrb[56].mxu1 }
 0x30f   :  { %v4446_v31 = vadd.f32 %v4445_v17, %v4444_v52  ;;  %10928 = vst [vmem:[#allocation50_spill] sm:$0xff] %v9197_v23  ;;  %v2663_v24 = vpop.f32.mrb[57].mxu1  ;;  %v4642_v43 = vadd.f32 %v4641_v54, %v4640_v56  ;;  %v4449_v52 = vsel %vm4341_vm4, %v9186_v36, 0.0 }
 0x310   :  { %10927 = vst [vmem:[#allocation35_spill] sm:$0xff] %v9193_v7  ;;  %v4643_v45 = vsel %vm4341_vm4, %v4528_v6, 0.0  ;;  %v4447_v57 = vsel %vm4341_vm4, %v9193_v7, 0.0  ;;  %v4529_v42 = vmul.f32 %v9193_v7, %v9193_v7  ;;  %v6266_v34 = vpop.f32.mrb[56].mxu0  ;;  %v6003_v28 = vpop.f32.mrb[58].mxu1  ;;  %v4531_v7 = vmul.f32 %v9197_v23, %v9197_v23 }
 0x311   :  { %v4448_v5 = vadd.f32 %v4447_v57, %v4446_v31  ;;  %v6330_v20 = vadd.f32 %v6266_v34, %v6002_v29  ;;  %v4175_v48 = vpop.f32.mrb[57].mxu0  ;;  %v2666_v44 = vpop.f32.mrb[59].mxu1  ;;  %v4644_v56 = vadd.f32 %v4643_v45, %v4642_v43  ;;  %v4451_v31 = vsel %vm4341_vm4, %v9197_v23, 0.0 }
 0x312   :  { %v4645_v17 = vsel %vm4341_vm4, %v4529_v42, 0.0  ;;  %v6331_v6 = vadd.f32 %v4175_v48, %v2663_v24  ;;  %v6267_v54 = vpop.f32.mrb[58].mxu0  ;;  %v4647_v43 = vsel %vm4341_vm4, %v4530_v40, 0.0 }
 0x313   :  { %v4450_v25 = vadd.f32 %v4449_v52, %v4448_v5  ;;  %v6332_v19 = vadd.f32 %v6267_v54, %v6003_v28  ;;  %v4178_v21 = vpop.f32.mrb[59].mxu0  ;;  %v4646_v29 = vadd.f32 %v4645_v17, %v4644_v56  ;;  %v9218_v45 = vadd.f32 %v6330_v20, %v8740_v58 }
 0x314   :  { %v9214_v57 = vadd.f32 %v6331_v6, %v8740_v58  ;;  %v6333_v34 = vadd.f32 %v4178_v21, %v2666_v44  ;;  %v4649_v56 = vsel %vm4341_vm4, %v4531_v7, 0.0 }
 0x315   :  { %10930 = vst [vmem:[#allocation47_spill] sm:$0xff] %v9218_v45  ;;  %v4452_v24 = vadd.f32 %v4451_v31, %v4450_v25  ;;  %v4648_v42 = vadd.f32 %v4647_v43, %v4646_v29  ;;  %v9229_v40 = vadd.f32 %v6332_v19, %v8740_v58  ;;  %v4534_v29 = vmul.f32 %v9218_v45, %v9218_v45 }
 0x316   :  { %10929 = vst [vmem:[#allocation42_spill] sm:$0xff] %v9214_v57  ;;  %v4453_v5 = vsel %vm4341_vm4, %v9214_v57, 0.0  ;;  %v4532_v28 = vmul.f32 %v9214_v57, %v9214_v57  ;;  %v9225_v48 = vadd.f32 %v6333_v34, %v8740_v58  ;;  %v6006_v52 = vpop.f32.mrb[60].mxu1  ;;  %v4457_v19 = vsel %vm4341_vm4, %v9218_v45, 0.0 }
 0x317   :  { %v4454_v21 = vadd.f32 %v4453_v5, %v4452_v24  ;;  %10932 = vst [vmem:[#allocation52_spill] sm:$0xff] %v9229_v40  ;;  %v2679_v20 = vpop.f32.mrb[61].mxu1  ;;  %v4650_v44 = vadd.f32 %v4649_v56, %v4648_v42  ;;  %v4535_v56 = vmul.f32 %v9229_v40, %v9229_v40 }
 0x318   :  { %10931 = vst [vmem:[#allocation48_spill] sm:$0xff] %v9225_v48  ;;  %v4651_v25 = vsel %vm4341_vm4, %v4532_v28, 0.0  ;;  %v4455_v17 = vsel %vm4341_vm4, %v9225_v48, 0.0  ;;  %v4533_v6 = vmul.f32 %v9225_v48, %v9225_v48  ;;  %v6270_v54 = vpop.f32.mrb[60].mxu0  ;;  %v6007_v31 = vpop.f32.mrb[62].mxu1 }
 0x319   :  { %v4456_v7 = vadd.f32 %v4455_v17, %v4454_v21  ;;  %v6334_v34 = vadd.f32 %v6270_v54, %v6006_v52  ;;  %v4191_v43 = vpop.f32.mrb[61].mxu0  ;;  %v2682_v58 = vpop.f32.mrb[63].mxu1  ;;  %v4652_v24 = vadd.f32 %v4651_v25, %v4650_v44  ;;  %v4459_v21 = vsel %vm4341_vm4, %v9229_v40, 0.0  ;;  %v6813_v17 = vld [vmem:[%s10535_s2] ss:$0 sm:$0xff] }
 0x31a   :  { %v4653_v42 = vsel %vm4341_vm4, %v4533_v6, 0.0  ;;  %v6335_v5 = vadd.f32 %v4191_v43, %v2679_v20  ;;  %v6271_v28 = vpop.f32.mrb[62].mxu0  ;;  %v4655_v20 = vsel %vm4341_vm4, %v4534_v29, 0.0 }
 0x31b   :  { %v4458_v48 = vadd.f32 %v4457_v19, %v4456_v7  ;;  %v6336_v57 = vadd.f32 %v6271_v28, %v6007_v31  ;;  %v4194_v23 = vpop.f32.mrb[63].mxu0  ;;  %v4654_v52 = vadd.f32 %v4653_v42, %v4652_v24  ;;  %v9251_v25 = vadd.f32 %v6813_v17, %v6334_v34 }
 0x31c   :  { %v9248_v54 = vadd.f32 %v6813_v17, %v6335_v5  ;;  %v6337_v44 = vadd.f32 %v4194_v23, %v2682_v58  ;;  %v4657_v24 = vsel %vm4341_vm4, %v4535_v56, 0.0 }
 0x31d   :  { %10933 = vst [vmem:[#allocation54_spill] sm:$0xff] %v9251_v25  ;;  %v4460_v6 = vadd.f32 %v4459_v21, %v4458_v48  ;;  %v4656_v43 = vadd.f32 %v4655_v20, %v4654_v52  ;;  %v9260_v5 = vadd.f32 %v6813_v17, %v6336_v57  ;;  %v4538_v58 = vmul.f32 %v9251_v25, %v9251_v25 }
 0x31e   :  { %v4461_v31 = vsel %vm4341_vm4, %v9248_v54, 0.0  ;;  %v4536_v7 = vmul.f32 %v9248_v54, %v9248_v54  ;;  %v9257_v19 = vadd.f32 %v6813_v17, %v6337_v44  ;;  %v4465_v21 = vsel %vm4341_vm4, %v9251_v25, 0.0 }
 0x31f   :  { %v4462_v42 = vadd.f32 %v4461_v31, %v4460_v6  ;;  %10934 = vst [vmem:[#allocation56_spill] sm:$0xff] %v9260_v5  ;;  %v4658_v23 = vadd.f32 %v4657_v24, %v4656_v43  ;;  %v4539_v52 = vmul.f32 %v9260_v5, %v9260_v5  ;;  %v4467_v44 = vsel %vm4341_vm4, %v9260_v5, 0.0 }
 0x320   :  { %v4659_v29 = vsel %vm4341_vm4, %v4536_v7, 0.0  ;;  %v4463_v48 = vsel %vm4341_vm4, %v9257_v19, 0.0  ;;  %v4537_v34 = vmul.f32 %v9257_v19, %v9257_v19  ;;  %v4663_v6 = vsel %vm4341_vm4, %v4538_v58, 0.0 }
 0x321   :  { %v4464_v28 = vadd.f32 %v4463_v48, %v4462_v42  ;;  %v4660_v56 = vadd.f32 %v4659_v29, %v4658_v23  ;;  %v4665_v7 = vsel %vm4341_vm4, %v4539_v52, 0.0  ;;  %v4685_v52 = vlaneseq }
 0x322   :  { %v4661_v57 = vsel %vm4341_vm4, %v4537_v34, 0.0 }
 0x323   :  { %v4466_v17 = vadd.f32 %v4465_v21, %v4464_v28  ;;  %v4662_v20 = vadd.f32 %v4661_v57, %v4660_v56 }
 0x325   :  { %v4468_v43 = vadd.f32 %v4467_v44, %v4466_v17  ;;  %v4664_v31 = vadd.f32 %v4663_v6, %v4662_v20  ;;  %v9278_v6 = vshrl.u32 %v4685_v52, 7  ;;  %v10942_v52 = vld [vmem:[#allocation15_spill] sm:$0xff] }
 0x327   :  { %v4469_v24 = vrot.slane %v4468_v43, 4  ;;  %v4666_v42 = vadd.f32 %v4665_v7, %v4664_v31  ;;  %v10693_v31 = vsub.s32 0, %v9278_v6 }
 0x329   :  { %v4470_v48 = vadd.f32 %v4469_v24, %v4468_v43  ;;  %v4667_v23 = vrot.slane %v4666_v42, 4  ;;  %v4679_v43 = vld [vmem:[%s10536_s3] sm:$0x1] }
 0x32b   :  { %v4471_v29 = vrot.slane %v4470_v48, 2  ;;  %v4668_v34 = vadd.f32 %v4667_v23, %v4666_v42 }
 0x32d   :  { %v4472_v40 = vadd.f32 %v4471_v29, %v4470_v48  ;;  %v4669_v45 = vrot.slane %v4668_v34, 2 }
 0x32f   :  { %v4473_v36 = vrot.slane %v4472_v40, 1  ;;  %v4670_v28 = vadd.f32 %v4669_v45, %v4668_v34  ;;  %v10935_v34 = vld [vmem:[#allocation7_spill] sm:$0xff] }
 0x331   :  { %v4474_v21 = vadd.f32 %v4473_v36, %v4472_v40  ;;  %v4671_v25 = vrot.slane %v4670_v28, 1  ;;  %v9287_v40 = vld [vmem:[%s10537_s4] sm:$0x1] }
 0x333   :  { %v4475_v5 = vmul.f32 0.001953125, %v4474_v21  ;;  %v4672_v56 = vadd.f32 %v4671_v25, %v4670_v28  ;;  %v10936_v28 = vld [vmem:[#allocation60_spill] sm:$0xff] }
 0x334   :  { %v10937_v21 = vld [vmem:[#allocation8_spill] sm:$0xff] }
 0x335   :  { %v4674_v57 = vmul.f32 %v4475_v5, %v4475_v5  ;;  %v4673_v58 = vmul.f32 0.001953125, %v4672_v56  ;;  %v10938_v56 = vld [vmem:[#allocation12_spill] sm:$0xff] }
 0x337   :  { %v4675_v17 = vsub.f32 %v4673_v58, %v4674_v57  ;;  %v10939_v57 = vld [vmem:[#allocation9_spill] sm:$0xff] }
 0x338   :  { %v10940_v58 = vld [vmem:[#allocation13_spill] sm:$0xff] }
 0x339   :  { %v4676_v44 = vmax.f32 %v4675_v17, 0.0 }
 0x33b   :  { %v4677_v20 = vadd.f32 1e-05, %v4676_v44  ;;  %v10941_v44 = vld [vmem:[#allocation61_spill] sm:$0xff] }
 0x33d   :  { %6796 = vrsqrt.f32 %v4677_v20 }
 0x347   :  { %v6797_v45 = vpop.eup %6796 }
 0x348   :  { %v4680_v36 = vmul.f32 %v6797_v45, %v4679_v43  ;;  %v10943_v45 = vld [vmem:[#allocation14_spill] sm:$0xff] }
 0x34a   :  { %v9289_v25 = vmul.f32 %v4680_v36, %v4475_v5  ;;  %v9293_v7 = vrot.slane %v4680_v36, %v10693_v31  ;;  %v10956_v31 = vld [vmem:[#allocation35_spill] sm:$0xff] }
 0x34c   :  { %v4683_v24 = vsub.f32 %v9287_v40, %v9289_v25  ;;  %v9299_v42 = vmul.f32 %v9293_v7, %v8746_v33  ;;  %v9303_v48 = vmul.f32 %v9293_v7, %v8754_v22  ;;  %v9307_v23 = vmul.f32 %v9293_v7, %v8743_v27  ;;  %v10944_v40 = vld [vmem:[#allocation18_spill] sm:$0xff] }
 0x34d   :  { %v9311_v5 = vmul.f32 %v9293_v7, %v8751_v51  ;;  %v9315_v29 = vmul.f32 %v9293_v7, %v8777_v1  ;;  %v9319_v33 = vmul.f32 %v9293_v7, %v8786_v15  ;;  %v9323_v22 = vmul.f32 %v9293_v7, %v8774_v46 }
 0x34e   :  { %v9327_v27 = vmul.f32 %v9293_v7, %v8789_v12  ;;  %v9331_v51 = vmul.f32 %v9293_v7, %v8809_v53  ;;  %v9335_v1 = vmul.f32 %v9293_v7, %v8821_v60  ;;  %v9339_v15 = vmul.f32 %v9293_v7, %v8814_v14 }
 0x34f   :  { %v9343_v46 = vmul.f32 %v9293_v7, %v8825_v37  ;;  %v9347_v12 = vmul.f32 %v9293_v7, %v8845_v41  ;;  %v9351_v53 = vmul.f32 %v9293_v7, %v8857_v2  ;;  %v9355_v60 = vmul.f32 %v9293_v7, %v8850_v62 }
 0x350   :  { %v9359_v14 = vmul.f32 %v9293_v7, %v8861_v47  ;;  %v9363_v37 = vmul.f32 %v9293_v7, %v8881_v55  ;;  %v9367_v41 = vmul.f32 %v9293_v7, %v8893_v8  ;;  %v9371_v2 = vmul.f32 %v9293_v7, %v8886_v59 }
 0x351   :  { %v9375_v62 = vmul.f32 %v9293_v7, %v8897_v38  ;;  %v9379_v47 = vmul.f32 %v9293_v7, %v8917_v13  ;;  %v9383_v55 = vmul.f32 %v9293_v7, %v8929_v39  ;;  %v9387_v8 = vmul.f32 %v9293_v7, %v8922_v11 }
 0x352   :  { %v9391_v59 = vmul.f32 %v9293_v7, %v8933_v0  ;;  %v9395_v38 = vmul.f32 %v9293_v7, %v8953_v3  ;;  %v9399_v13 = vmul.f32 %v9293_v7, %v8965_v35  ;;  %v9403_v39 = vmul.f32 %v9293_v7, %v8958_v4 }
 0x353   :  { %v9407_v11 = vmul.f32 %v9293_v7, %v8969_v63  ;;  %v9411_v0 = vmul.f32 %v9293_v7, %v8989_v16  ;;  %v9415_v3 = vmul.f32 %v9293_v7, %v9001_v61  ;;  %v9419_v35 = vmul.f32 %v9293_v7, %v8994_v32 }
 0x354   :  { %v9423_v4 = vmul.f32 %v9293_v7, %v9005_v10  ;;  %v9427_v63 = vmul.f32 %v9293_v7, %v9022_v9  ;;  %v9431_v16 = vmul.f32 %v9293_v7, %v9033_v26  ;;  %v9435_v61 = vmul.f32 %v9293_v7, %v9026_v30 }
 0x355   :  { %v9439_v32 = vmul.f32 %v9293_v7, %v9037_v18  ;;  %v9443_v10 = vmul.f32 %v9293_v7, %v9054_v50  ;;  %v9447_v9 = vmul.f32 %v9293_v7, %v9065_v49  ;;  %v9451_v26 = vmul.f32 %v9293_v7, %v10935_v34  ;;  %v10946_v34 = vld [vmem:[#allocation19_spill] sm:$0xff] }
 0x356   :  { %v9455_v30 = vmul.f32 %v9293_v7, %v10936_v28  ;;  %v9459_v18 = vmul.f32 %v9293_v7, %v10937_v21  ;;  %v9463_v50 = vmul.f32 %v9293_v7, %v10938_v56  ;;  %v9467_v49 = vmul.f32 %v9293_v7, %v10939_v57  ;;  %v10948_v21 = vld [vmem:[#allocation20_spill] sm:$0xff]  ;;  %v10950_v57 = vld [vmem:[#allocation65_spill] sm:$0xff] }
 0x357   :  { %v9471_v17 = vmul.f32 %v9293_v7, %v10940_v58  ;;  %v9475_v20 = vmul.f32 %v9293_v7, %v10941_v44  ;;  %v9479_v43 = vmul.f32 %v9293_v7, %v10942_v52  ;;  %v9483_v36 = vmul.f32 %v9293_v7, %v10943_v45  ;;  %v10952_v44 = vld [vmem:[#allocation21_spill] sm:$0xff]  ;;  %v10954_v45 = vld [vmem:[#allocation66_spill] sm:$0xff] }
 0x358   :  { %v9487_v25 = vmul.f32 %v9293_v7, %v10944_v40  ;;  %v9491_v28 = vmul.f32 %v9293_v7, %v10946_v34  ;;  %v9495_v56 = vmul.f32 %v9293_v7, %v10948_v21  ;;  %v9499_v58 = vmul.f32 %v9293_v7, %v10950_v57 }
 0x359   :  { %v9503_v52 = vmul.f32 %v9293_v7, %v10952_v44  ;;  %v9507_v40 = vmul.f32 %v9293_v7, %v10954_v45  ;;  %v9511_v34 = vmul.f32 %v9293_v7, %v10956_v31  ;;  %v9515_v21 = vmul.f32 %v9293_v7, %v9248_v54  ;;  %v10964_v31 = vld [vmem:[#allocation56_spill] sm:$0xff] }
 0x35a   :  { %10945 = vst [vmem:[#allocation58_spill] sm:$0xff] %v9487_v25  ;;  %10947 = vst [vmem:[#allocation62_spill] sm:$0xff] %v9491_v28  ;;  %v9519_v57 = vmul.f32 %v9293_v7, %v9257_v19  ;;  %v10965_v54 = vsub.s32 0, %v9278_v6  ;;  %v10966_v19 = vld [vmem:[#allocation42_spill] sm:$0xff]  ;;  %v10967_v28 = vld [vmem:[#allocation48_spill] sm:$0xff] }
 0x35b   :  { %10949 = vst [vmem:[#allocation4_spill] sm:$0xff] %v9495_v56  ;;  %10951 = vst [vmem:[#allocation5_spill] sm:$0xff] %v9499_v58  ;;  %v10960_v58 = vld [vmem:[#allocation54_spill] sm:$0xff]  ;;  %v10969_v25 = vld [vmem:[#allocation52_spill] sm:$0xff] }
 0x35c   :  { %10953 = vst [vmem:[#allocation10_spill] sm:$0xff] %v9503_v52  ;;  %10955 = vst [vmem:[#allocation43_spill] sm:$0xff] %v9507_v40  ;;  %v9523_v44 = vmul.f32 %v9293_v7, %v10960_v58  ;;  %v10962_v52 = vld [vmem:[#allocation34_spill] sm:$0xff]  ;;  %v4747_v58 = vmul.f32 %v9293_v7, %v10967_v28 }
 0x35d   :  { %10957 = vst [vmem:[#allocation11_spill] sm:$0xff] %v9511_v34  ;;  %10958 = vst [vmem:[#allocation16_spill] sm:$0xff] %v9515_v21  ;;  %v4744_v45 = vmul.f32 %v9293_v7, %v10962_v52  ;;  %v10963_v40 = vld [vmem:[#allocation50_spill] sm:$0xff]  ;;  %v9531_v34 = vmul.f32 %v9293_v7, %v10964_v31  ;;  %v9535_v21 = vrot.slane %v4683_v24, %v10965_v54 }
 0x35e   :  { %10959 = vst [vmem:[#allocation17_spill] sm:$0xff] %v9519_v57  ;;  %10961 = vst [vmem:[#allocation22_spill] sm:$0xff] %v9523_v44  ;;  %v4745_v56 = vmul.f32 %v9293_v7, %v10963_v40  ;;  %v4746_v57 = vmul.f32 %v9293_v7, %v10966_v19  ;;  %v10968_v44 = vld [vmem:[#allocation47_spill] sm:$0xff]  ;;  %v4749_v40 = vmul.f32 %v9293_v7, %v10969_v25 }
 0x35f   :  { %v4748_v52 = vmul.f32 %v9293_v7, %v10968_v44  ;;  %v9547_v31 = vadd.f32 %v9535_v21, %v9299_v42  ;;  %v9551_v6 = vadd.f32 %v9535_v21, %v9303_v48  ;;  %v9555_v24 = vadd.f32 %v9535_v21, %v9307_v23 }
 0x360   :  { %v9559_v28 = vadd.f32 %v9535_v21, %v9311_v5  ;;  %v9563_v44 = vadd.f32 %v9535_v21, %v9315_v29  ;;  %v9567_v7 = vadd.f32 %v9535_v21, %v9319_v33  ;;  %v9571_v42 = vadd.f32 %v9535_v21, %v9323_v22 }
 0x361   :  { %v9575_v48 = vadd.f32 %v9535_v21, %v9327_v27  ;;  %v9579_v23 = vadd.f32 %v9535_v21, %v9331_v51  ;;  %v9583_v5 = vadd.f32 %v9535_v21, %v9335_v1  ;;  %v9587_v29 = vadd.f32 %v9535_v21, %v9339_v15  ;;  %v10974_v25 = vld [vmem:[#allocation62_spill] sm:$0xff] }
 0x362   :  { %v9591_v33 = vadd.f32 %v9535_v21, %v9343_v46  ;;  %v9595_v22 = vadd.f32 %v9535_v21, %v9347_v12  ;;  %v9599_v27 = vadd.f32 %v9535_v21, %v9351_v53  ;;  %v9603_v51 = vadd.f32 %v9535_v21, %v9355_v60  ;;  %v10976_v54 = vld [vmem:[#allocation4_spill] sm:$0xff]  ;;  %v10978_v19 = vld [vmem:[#allocation5_spill] sm:$0xff] }
 0x363   :  { %v9607_v1 = vadd.f32 %v9535_v21, %v9359_v14  ;;  %v9611_v15 = vadd.f32 %v9535_v21, %v9363_v37  ;;  %v9615_v46 = vadd.f32 %v9535_v21, %v9367_v41  ;;  %v9619_v12 = vadd.f32 %v9535_v21, %v9371_v2 }
 0x364   :  { %v9623_v53 = vadd.f32 %v9535_v21, %v9375_v62  ;;  %v9627_v60 = vadd.f32 %v9535_v21, %v9379_v47  ;;  %v9631_v14 = vadd.f32 %v9535_v21, %v9383_v55  ;;  %v9635_v37 = vadd.f32 %v9535_v21, %v9387_v8 }
 0x365   :  { %v9639_v41 = vadd.f32 %v9535_v21, %v9391_v59  ;;  %v9643_v2 = vadd.f32 %v9535_v21, %v9395_v38  ;;  %v9647_v62 = vadd.f32 %v9535_v21, %v9399_v13  ;;  %v9651_v47 = vadd.f32 %v9535_v21, %v9403_v39 }
 0x366   :  { %v9655_v55 = vadd.f32 %v9535_v21, %v9407_v11  ;;  %v9659_v8 = vadd.f32 %v9535_v21, %v9411_v0  ;;  %v9663_v59 = vadd.f32 %v9535_v21, %v9415_v3  ;;  %v9667_v38 = vadd.f32 %v9535_v21, %v9419_v35 }
 0x367   :  { %v9671_v13 = vadd.f32 %v9535_v21, %v9423_v4  ;;  %v9675_v39 = vadd.f32 %v9535_v21, %v9427_v63  ;;  %v9679_v11 = vadd.f32 %v9535_v21, %v9431_v16  ;;  %v9683_v0 = vadd.f32 %v9535_v21, %v9435_v61 }
 0x368   :  { %v9687_v3 = vadd.f32 %v9535_v21, %v9439_v32  ;;  %v9691_v35 = vadd.f32 %v9535_v21, %v9443_v10  ;;  %v9695_v4 = vadd.f32 %v9535_v21, %v9447_v9  ;;  %v9699_v63 = vadd.f32 %v9535_v21, %v9451_v26 }
 0x369   :  { %v9703_v16 = vadd.f32 %v9535_v21, %v9455_v30  ;;  %v9707_v61 = vadd.f32 %v9535_v21, %v9459_v18  ;;  %v9711_v32 = vadd.f32 %v9535_v21, %v9463_v50  ;;  %v9715_v10 = vadd.f32 %v9535_v21, %v9467_v49  ;;  %v10972_v50 = vld [vmem:[#allocation58_spill] sm:$0xff] }
 0x36a   :  { %v9719_v9 = vadd.f32 %v9535_v21, %v9471_v17  ;;  %v9723_v26 = vadd.f32 %v9535_v21, %v9475_v20  ;;  %v9727_v30 = vadd.f32 %v9535_v21, %v9479_v43  ;;  %v9731_v18 = vadd.f32 %v9535_v21, %v9483_v36 }
 0x36b   :  { %v9735_v49 = vadd.f32 %v9535_v21, %v10972_v50  ;;  %v9739_v17 = vadd.f32 %v9535_v21, %v10974_v25  ;;  %v9743_v20 = vadd.f32 %v9535_v21, %v10976_v54  ;;  %v9747_v43 = vadd.f32 %v9535_v21, %v10978_v19 }
 0x36c   :  { %10970 = vst [vmem:[#allocation44_spill] sm:$0xff] %v9727_v30  ;;  %10971 = vst [vmem:[#allocation23_spill] sm:$0xff] %v9731_v18  ;;  %v10979_v30 = vld [vmem:[#allocation10_spill] sm:$0xff]  ;;  %v10981_v18 = vld [vmem:[#allocation43_spill] sm:$0xff]  ;;  %v9765_v54 = vadd.f32 %v9535_v21, %v4745_v56  ;;  %v9768_v19 = vadd.f32 %v9535_v21, %v4746_v57  ;;  %vm4824_vm5 = vcmp.ge.f32.partialorder %v9547_v31, 0.0  ;;  %vm4825_vm6 = vcmp.ge.f32.partialorder %v9551_v6, 0.0 }
 0x36d   :  { %10973 = vst [vmem:[#allocation25_spill] sm:$0xff] %v9735_v49  ;;  %10975 = vst [vmem:[#allocation24_spill] sm:$0xff] %v9739_v17  ;;  %v9751_v36 = vadd.f32 %v9535_v21, %v10979_v30  ;;  %v9755_v50 = vadd.f32 %v9535_v21, %v10981_v18  ;;  %v10982_v49 = vld [vmem:[#allocation11_spill] sm:$0xff]  ;;  %v9762_v17 = vadd.f32 %v9535_v21, %v4744_v45  ;;  %v10992_v45 = vld [vmem:[#allocation17_spill] sm:$0xff]  ;;  %vm4826_vm7 = vcmp.ge.f32.partialorder %v9555_v24, 0.0 }
 0x36e   :  { %10977 = vst [vmem:[#allocation26_spill] sm:$0xff] %v9743_v20  ;;  %v9759_v25 = vadd.f32 %v9535_v21, %v10982_v49  ;;  %10985 = vst [vmem:[#allocation40_spill] sm:$0xff] %v9765_v54  ;;  %v9771_v30 = vadd.f32 %v9535_v21, %v4747_v58  ;;  %v9777_v18 = vadd.f32 %v9535_v21, %v4749_v40  ;;  %v10990_v49 = vld [vmem:[#allocation16_spill] sm:$0xff]  ;;  %v10994_v54 = vld [vmem:[#allocation22_spill] sm:$0xff]  ;;  %vm4827_vm8 = vcmp.ge.f32.partialorder %v9559_v28, 0.0 }
 0x36f   :  { %10980 = vst [vmem:[#allocation32_spill] sm:$0xff] %v9751_v36  ;;  %10984 = vst [vmem:[#allocation39_spill] sm:$0xff] %v9762_v17  ;;  %v9774_v36 = vadd.f32 %v9535_v21, %v4748_v52  ;;  %v9785_v56 = vadd.f32 %v9535_v21, %v10992_v45  ;;  %v9789_v57 = vadd.f32 %v9535_v21, %v10994_v54  ;;  %vm4828_vm9 = vcmp.ge.f32.partialorder %v9563_v44, 0.0 }
 0x370   :  { %10983 = vst [vmem:[#allocation33_spill] sm:$0xff] %v9759_v25  ;;  %10986 = vst [vmem:[#allocation41_spill] sm:$0xff] %v9768_v19  ;;  %v9781_v25 = vadd.f32 %v9535_v21, %v10990_v49  ;;  %v9793_v58 = vadd.f32 %v9535_v21, %v9531_v34  ;;  %vm4829_vm10 = vcmp.ge.f32.partialorder %v9567_v7, 0.0  ;;  %vm4830_vm11 = vcmp.ge.f32.partialorder %v9571_v42, 0.0 }
 0x371   :  { %10987 = vst [vmem:[#allocation3_spill] sm:$0xff] %v9771_v30  ;;  %10988 = vst [vmem:[#allocation46_spill] sm:$0xff] %v9774_v36  ;;  %vm4831_vm12 = vcmp.ge.f32.partialorder %v9575_v48, 0.0  ;;  %vm4832_vm13 = vcmp.ge.f32.partialorder %v9579_v23, 0.0  ;;  %vm4833_vm14 = vcmp.ge.f32.partialorder %v9583_v5, 0.0  ;;  %vm4834_vm15 = vcmp.ge.f32.partialorder %v9587_v29, 0.0 }
 0x372   :  { %10989 = vst [vmem:[#allocation2_spill] sm:$0xff] %v9777_v18  ;;  %10991 = vst [vmem:[#allocation51_spill] sm:$0xff] %v9781_v25  ;;  %v4888_v34 = vmul.f32 0.01, %v9547_v31  ;;  %v4889_v21 = vmul.f32 0.01, %v9551_v6 }
 0x373   :  { %10993 = vst [vmem:[#allocation53_spill] sm:$0xff] %v9785_v56  ;;  %10995 = vst [vmem:[#allocation55_spill] sm:$0xff] %v9789_v57  ;;  %v4890_v52 = vmul.f32 0.01, %v9555_v24  ;;  %v4891_v40 = vmul.f32 0.01, %v9559_v28 }
 0x374   :  { %10996 = vst [vmem:[#allocation57_spill] sm:$0xff] %v9793_v58  ;;  %v4892_v54 = vmul.f32 0.01, %v9563_v44  ;;  %v4893_v49 = vmul.f32 0.01, %v9567_v7  ;;  %vm4835_vm0 = vcmp.ge.f32.partialorder %v9591_v33, 0.0  ;;  %v4952_v56 = vsel %vm4824_vm5, %v9547_v31, %v4888_v34 }
 0x375   :  { %v4894_v45 = vmul.f32 0.01, %v9571_v42  ;;  %v4895_v58 = vmul.f32 0.01, %v9575_v48  ;;  %v4896_v57 = vmul.f32 0.01, %v9579_v23  ;;  %v4953_v30 = vsel %vm4825_vm6, %v9551_v6, %v4889_v21 }
 0x376   :  { %vm4836_vm1 = vcmp.ge.f32.partialorder %v9595_v22, 0.0  ;;  %v4897_v25 = vmul.f32 0.01, %v9583_v5  ;;  %v9822_v18 = vmul.f32 0.01, %v9587_v29  ;;  %5016 = vst.msk [vmem:[%s10538_s5] sm:$0xff] %vm4341_vm4, %v4952_v56  ;;  %v4954_v6 = vsel %vm4826_vm7, %v9555_v24, %v4890_v52 }
 0x377   :  { %v9825_v36 = vmul.f32 0.01, %v9591_v33  ;;  %vm4837_vm2 = vcmp.ge.f32.partialorder %v9599_v27, 0.0  ;;  %v9836_v31 = vmul.f32 0.01, %v9595_v22  ;;  %5017 = vst.msk [vmem:[%s10538_s5 + $0x8] sm:$0xff] %vm4341_vm4, %v4953_v30  ;;  %v4955_v24 = vsel %vm4827_vm8, %v9559_v28, %v4891_v40 }
 0x378   :  { %v9839_v34 = vmul.f32 0.01, %v9599_v27  ;;  %v9842_v19 = vmul.f32 0.01, %v9603_v51  ;;  %vm4838_vm3 = vcmp.ge.f32.partialorder %v9603_v51, 0.0  ;;  %5018 = vst.msk [vmem:[%s10538_s5 + $0x10] sm:$0xff] %vm4341_vm4, %v4954_v6  ;;  %v4956_v28 = vsel %vm4828_vm9, %v9563_v44, %v4892_v54 }
 0x379   :  { %v9853_v56 = vmul.f32 0.01, %v9607_v1  ;;  %v9856_v21 = vmul.f32 0.01, %v9611_v15  ;;  %v9859_v17 = vmul.f32 0.01, %v9615_v46  ;;  %v4957_v44 = vsel %vm4829_vm10, %v9567_v7, %v4893_v49 }
 0x37a   :  { %vm4839_vm5 = vcmp.ge.f32.partialorder %v9607_v1, 0.0  ;;  %v9870_v30 = vmul.f32 0.01, %v9619_v12  ;;  %v9873_v52 = vmul.f32 0.01, %v9623_v53  ;;  %5019 = vst.msk [vmem:[%s10538_s5 + $0x18] sm:$0xff] %vm4341_vm4, %v4955_v24  ;;  %v4958_v7 = vsel %vm4830_vm11, %v9571_v42, %v4894_v45 }
 0x37b   :  { %10997 = vst [vmem:[#allocation59_spill] sm:$0xff] %v9856_v21  ;;  %v9876_v21 = vmul.f32 0.01, %v9627_v60  ;;  %vm4840_vm6 = vcmp.ge.f32.partialorder %v9611_v15, 0.0  ;;  %v9887_v40 = vmul.f32 0.01, %v9631_v14  ;;  %v4959_v42 = vsel %vm4831_vm12, %v9575_v48, %v4895_v58 }
 0x37c   :  { %10998 = vst [vmem:[#allocation63_spill] sm:$0xff] %v9873_v52  ;;  %v9890_v6 = vmul.f32 0.01, %v9635_v37  ;;  %v9893_v52 = vmul.f32 0.01, %v9639_v41  ;;  %5020 = vst.msk [vmem:[%s10538_s5 + $0x20] sm:$0xff] %vm4341_vm4, %v4956_v28  ;;  %v4960_v48 = vsel %vm4832_vm13, %v9579_v23, %v4896_v57  ;;  %v4961_v57 = vsel %vm4833_vm14, %v9583_v5, %v4897_v25 }
 0x37d   :  { %vm4841_vm7 = vcmp.ge.f32.partialorder %v9615_v46, 0.0  ;;  %v9904_v54 = vmul.f32 0.01, %v9643_v2  ;;  %v9907_v24 = vmul.f32 0.01, %v9647_v62  ;;  %5021 = vst.msk [vmem:[%s10538_s5 + $0x28] sm:$0xff] %vm4341_vm4, %v4957_v44  ;;  %v4962_v25 = vsel %vm4834_vm15, %v9587_v29, %v9822_v18 }
 0x37e   :  { %10999 = vst [vmem:[#allocation67_spill] sm:$0xff] %v9890_v6  ;;  %v9910_v6 = vmul.f32 0.01, %v9651_v47  ;;  %vm4842_vm8 = vcmp.ge.f32.partialorder %v9619_v12, 0.0  ;;  %v9921_v49 = vmul.f32 0.01, %v9655_v55  ;;  %v4963_v18 = vsel %vm4835_vm0, %v9591_v33, %v9825_v36 }
 0x37f   :  { %11000 = vst [vmem:[#allocation69_spill] sm:$0xff] %v9907_v24  ;;  %v9924_v28 = vmul.f32 0.01, %v9659_v8  ;;  %v9927_v24 = vmul.f32 0.01, %v9663_v59  ;;  %5022 = vst.msk [vmem:[%s10538_s5 + $0x30] sm:$0xff] %vm4341_vm4, %v4958_v7  ;;  %v4964_v36 = vsel %vm4836_vm1, %v9595_v22, %v9836_v31 }
 0x380   :  { %v9940_v45 = vmul.f32 0.01, %v9667_v38  ;;  %v9943_v44 = vmul.f32 0.01, %v9671_v13  ;;  %5023 = vst.msk [vmem:[%s10538_s5 + $0x38] sm:$0xff] %vm4341_vm4, %v4959_v42  ;;  %vm4846_vm12 = vcmp.ge.f32.partialorder %v9635_v37, 0.0 }
 0x381   :  { %11001 = vst [vmem:[#allocation75_spill] sm:$0xff] %v9927_v24  ;;  %v9946_v24 = vmul.f32 0.01, %v9675_v39  ;;  %v9960_v58 = vmul.f32 0.01, %v9679_v11  ;;  %5024 = vst.msk [vmem:[%s10538_s5 + $0x40] sm:$0xff] %vm4341_vm4, %v4960_v48 }
 0x382   :  { %v9963_v7 = vmul.f32 0.01, %v9683_v0  ;;  %v9966_v23 = vmul.f32 0.01, %v9687_v3  ;;  %vm4850_vm13 = vcmp.ge.f32.partialorder %v9651_v47, 0.0  ;;  %5025 = vst.msk [vmem:[%s10538_s5 + $0x48] sm:$0xff] %vm4341_vm4, %v4961_v57 }
 0x383   :  { %v9980_v42 = vmul.f32 0.01, %v9691_v35  ;;  %v9986_v5 = vmul.f32 0.01, %v9699_v63  ;;  %vm4854_vm14 = vcmp.ge.f32.partialorder %v9667_v38, 0.0  ;;  %5026 = vst.msk [vmem:[%s10538_s5 + $0x50] sm:$0xff] %vm4341_vm4, %v4962_v25 }
 0x384   :  { %11002 = vst [vmem:[#allocation76_spill] sm:$0xff] %v9966_v23  ;;  %v9983_v23 = vmul.f32 0.01, %v9695_v4  ;;  %v10001_v48 = vmul.f32 0.01, %v9703_v16  ;;  %vm4858_vm15 = vcmp.ge.f32.partialorder %v9683_v0, 0.0 }
 0x385   :  { %11003 = vst [vmem:[#allocation29_spill] sm:$0xff] %v9986_v5  ;;  %v10004_v5 = vmul.f32 0.01, %v9707_v61  ;;  %v10007_v29 = vmul.f32 0.01, %v9711_v32  ;;  %5027 = vst.msk [vmem:[%s10538_s5 + $0x58] sm:$0xff] %vm4341_vm4, %v4963_v18  ;;  %v4965_v18 = vsel %vm4837_vm2, %v9599_v27, %v9839_v34  ;;  %v4966_v34 = vsel %vm4838_vm3, %v9603_v51, %v9842_v19 }
 0x386   :  { %v10022_v57 = vmul.f32 0.01, %v9715_v10  ;;  %v10028_v33 = vmul.f32 0.01, %v9723_v26  ;;  %vm4862_vm0 = vcmp.ge.f32.partialorder %v9699_v63, 0.0  ;;  %v11008_v25 = vld [vmem:[#allocation44_spill] sm:$0xff] }
 0x387   :  { %11004 = vst [vmem:[#allocation30_spill] sm:$0xff] %v10007_v29  ;;  %v10025_v29 = vmul.f32 0.01, %v9719_v9  ;;  %v11012_v22 = vld [vmem:[#allocation25_spill] sm:$0xff]  ;;  %5028 = vst.msk [vmem:[%s10538_s5 + $0x60] sm:$0xff] %vm4341_vm4, %v4964_v36  ;;  %vm4866_vm1 = vcmp.ge.f32.partialorder %v9715_v10, 0.0 }
 0x388   :  { %11005 = vst [vmem:[#allocation38_spill] sm:$0xff] %v10022_v57  ;;  %11007 = vst [vmem:[#allocation72_spill] sm:$0xff] %v10028_v33  ;;  %v10043_v33 = vmul.f32 0.01, %v11008_v25  ;;  %v10049_v31 = vmul.f32 0.01, %v11012_v22 }
 0x389   :  { %11006 = vst [vmem:[#allocation71_spill] sm:$0xff] %v10025_v29  ;;  %v11010_v29 = vld [vmem:[#allocation23_spill] sm:$0xff]  ;;  %v10070_v27 = vmul.f32 0.01, %v9747_v43  ;;  %5029 = vst.msk [vmem:[%s10538_s5 + $0x68] sm:$0xff] %vm4341_vm4, %v4965_v18  ;;  %v11017_v36 = vld [vmem:[#allocation32_spill] sm:$0xff]  ;;  %v4967_v18 = vsel %vm4839_vm5, %v9607_v1, %v9853_v56 }
 0x38a   :  { %11009 = vst [vmem:[#allocation64_spill] sm:$0xff] %v10043_v33  ;;  %v10046_v57 = vmul.f32 0.01, %v11010_v29  ;;  %11013 = vst [vmem:[#allocation73_spill] sm:$0xff] %v10049_v31  ;;  %v10067_v33 = vmul.f32 0.01, %v9743_v20 }
 0x38b   :  { %11016 = vst [vmem:[#allocation70_spill] sm:$0xff] %v10070_v27  ;;  %vm4870_vm2 = vcmp.ge.f32.partialorder %v11010_v29, 0.0  ;;  %v10085_v27 = vmul.f32 0.01, %v11017_v36  ;;  %v11020_v51 = vld [vmem:[#allocation33_spill] sm:$0xff]  ;;  %5030 = vst.msk [vmem:[%s10538_s5 + $0x70] sm:$0xff] %vm4341_vm4, %v4966_v34 }
 0x38c   :  { %11011 = vst [vmem:[#allocation68_spill] sm:$0xff] %v10046_v57  ;;  %v11014_v57 = vld [vmem:[#allocation24_spill] sm:$0xff]  ;;  %11015 = vst [vmem:[#allocation74_spill] sm:$0xff] %v10067_v33  ;;  %v10088_v33 = vmul.f32 0.01, %v9755_v50  ;;  %vm4874_vm3 = vcmp.ge.f32.partialorder %v9747_v43, 0.0 }
 0x38d   :  { %v10064_v31 = vmul.f32 0.01, %v11014_v57  ;;  %11018 = vst [vmem:[#allocation77_spill] sm:$0xff] %v10085_v27  ;;  %v10091_v19 = vmul.f32 0.01, %v11020_v51  ;;  %v11024_v27 = vld [vmem:[#allocation40_spill] sm:$0xff] }
 0x38e   :  { %11019 = vst [vmem:[#allocation27_spill] sm:$0xff] %v10088_v33  ;;  %v11022_v33 = vld [vmem:[#allocation39_spill] sm:$0xff]  ;;  %v10109_v20 = vmul.f32 0.01, %v11024_v27  ;;  %v11026_v1 = vld [vmem:[#allocation41_spill] sm:$0xff]  ;;  %5031 = vst.msk [vmem:[%s10538_s5 + $0x78] sm:$0xff] %vm4341_vm4, %v4967_v18  ;;  %v4969_v18 = vsel %vm4841_vm7, %v9615_v46, %v9859_v17 }
 0x38f   :  { %11021 = vst [vmem:[#allocation28_spill] sm:$0xff] %v10091_v19  ;;  %v10106_v19 = vmul.f32 0.01, %v11022_v33  ;;  %v10112_v56 = vmul.f32 0.01, %v11026_v1  ;;  %v11028_v57 = vld [vmem:[#allocation59_spill] sm:$0xff] }
 0x390   :  { %11025 = vst [vmem:[#allocation31_spill] sm:$0xff] %v10109_v20  ;;  %v4968_v34 = vsel %vm4840_vm6, %v9611_v15, %v11028_v57  ;;  %vm4878_vm5 = vcmp.ge.f32.partialorder %v11022_v33, 0.0  ;;  %v11029_v20 = vld [vmem:[#allocation3_spill] sm:$0xff]  ;;  %v11033_v15 = vld [vmem:[#allocation2_spill] sm:$0xff]  ;;  %5033 = vst.msk [vmem:[%s10538_s5 + $0x88] sm:$0xff] %vm4341_vm4, %v4969_v18  ;;  %vm11042_vm10 = vcmp.ge.f32.partialorder %v9623_v53, 0.0 }
 0x391   :  { %11023 = vst [vmem:[#allocation78_spill] sm:$0xff] %v10106_v19  ;;  %11027 = vst [vmem:[#allocation36_spill] sm:$0xff] %v10112_v56  ;;  %v10127_v56 = vmul.f32 0.01, %v11029_v20  ;;  %v11031_v19 = vld [vmem:[#allocation46_spill] sm:$0xff]  ;;  %v11035_v20 = vld [vmem:[#allocation51_spill] sm:$0xff] }
 0x392   :  { %v10130_v51 = vmul.f32 0.01, %v11031_v19  ;;  %v10133_v57 = vmul.f32 0.01, %v11033_v15  ;;  %5032 = vst.msk [vmem:[%s10538_s5 + $0x80] sm:$0xff] %vm4341_vm4, %v4968_v34  ;;  %vm4882_vm6 = vcmp.ge.f32.partialorder %v11031_v19, 0.0  ;;  %v4970_v34 = vsel %vm4842_vm8, %v9619_v12, %v9870_v30 }
 0x393   :  { %11030 = vst [vmem:[#allocation37_spill] sm:$0xff] %v10127_v56  ;;  %v11038_v46 = vld [vmem:[#allocation55_spill] sm:$0xff]  ;;  %vm11043_vm8 = vcmp.ge.f32.partialorder %v9627_v60, 0.0  ;;  %vm11044_vm9 = vcmp.ge.f32.partialorder %v9631_v14, 0.0  ;;  %5034 = vst.msk [vmem:[%s10538_s5 + $0x90] sm:$0xff] %vm4341_vm4, %v4970_v34 }
 0x394   :  { %11032 = vst [vmem:[#allocation79_spill] sm:$0xff] %v10130_v51  ;;  %11034 = vst [vmem:[#allocation6_spill] sm:$0xff] %v10133_v57  ;;  %v11036_v51 = vld [vmem:[#allocation53_spill] sm:$0xff]  ;;  %v10148_v57 = vmul.f32 0.01, %v11035_v20  ;;  %vm4886_vm7 = vcmp.ge.f32.partialorder %v11038_v46, 0.0  ;;  %v4972_v12 = vsel %vm11043_vm8, %v9627_v60, %v9876_v21  ;;  %v4973_v30 = vsel %vm11044_vm9, %v9631_v14, %v9887_v40 }
 0x395   :  { %v10151_v56 = vmul.f32 0.01, %v11036_v51  ;;  %v10154_v17 = vmul.f32 0.01, %v11038_v46  ;;  %v11040_v20 = vld [vmem:[#allocation57_spill] sm:$0xff]  ;;  %v11045_v18 = vld [vmem:[#allocation67_spill] sm:$0xff] }
 0x396   :  { %vm4887_vm11 = vcmp.ge.f32.partialorder %v11040_v20, 0.0  ;;  %v10167_v51 = vmul.f32 0.01, %v11040_v20  ;;  %vm11047_vm8 = vcmp.ge.f32.partialorder %v9643_v2, 0.0  ;;  %v11048_v21 = vld [vmem:[#allocation69_spill] sm:$0xff]  ;;  %vm11049_vm9 = vcmp.ge.f32.partialorder %v9647_v62, 0.0 }
 0x397   :  { %11037 = vst [vmem:[#allocation45_spill] sm:$0xff] %v10151_v56  ;;  %11039 = vst [vmem:[#allocation49_spill] sm:$0xff] %v10154_v17  ;;  %v11041_v56 = vld [vmem:[#allocation63_spill] sm:$0xff]  ;;  %v4976_v14 = vsel %vm11047_vm8, %v9643_v2, %v9904_v54  ;;  %v4977_v40 = vsel %vm11049_vm9, %v9647_v62, %v11048_v21  ;;  %vm11053_vm8 = vcmp.ge.f32.partialorder %v9663_v59, 0.0  ;;  %vm11055_vm9 = vcmp.ge.f32.partialorder %v9675_v39, 0.0  ;;  %v11064_v54 = vld [vmem:[#allocation30_spill] sm:$0xff] }
 0x398   :  { %v4971_v17 = vsel %vm11042_vm10, %v9623_v53, %v11041_v56  ;;  %v4974_v53 = vsel %vm4846_vm12, %v9635_v37, %v11045_v18  ;;  %vm11046_vm10 = vcmp.ge.f32.partialorder %v9639_v41, 0.0  ;;  %5036 = vst.msk [vmem:[%s10538_s5 + $0xa0] sm:$0xff] %vm4341_vm4, %v4972_v12  ;;  %5037 = vst.msk [vmem:[%s10538_s5 + $0xa8] sm:$0xff] %vm4341_vm4, %v4973_v30  ;;  %v4978_v37 = vsel %vm4850_vm13, %v9651_v47, %v9910_v6  ;;  %v11052_v62 = vld [vmem:[#allocation75_spill] sm:$0xff]  ;;  %v11086_v34 = vld [vmem:[#allocation28_spill] sm:$0xff] }
 0x399   :  { %v4975_v60 = vsel %vm11046_vm10, %v9639_v41, %v9893_v52  ;;  %5035 = vst.msk [vmem:[%s10538_s5 + $0x98] sm:$0xff] %vm4341_vm4, %v4971_v17  ;;  %vm11050_vm12 = vcmp.ge.f32.partialorder %v9655_v55, 0.0  ;;  %vm11051_vm10 = vcmp.ge.f32.partialorder %v9659_v8, 0.0  ;;  %v4981_v52 = vsel %vm11053_vm8, %v9663_v59, %v11052_v62  ;;  %5038 = vst.msk [vmem:[%s10538_s5 + $0xb0] sm:$0xff] %vm4341_vm4, %v4974_v53  ;;  %v11084_v56 = vld [vmem:[#allocation27_spill] sm:$0xff]  ;;  %v11087_v12 = vld [vmem:[#allocation33_spill] sm:$0xff] }
 0x39a   :  { %v4979_v41 = vsel %vm11050_vm12, %v9655_v55, %v9921_v49  ;;  %v4980_v2 = vsel %vm11051_vm10, %v9659_v8, %v9924_v28  ;;  %5039 = vst.msk [vmem:[%s10538_s5 + $0xb8] sm:$0xff] %vm4341_vm4, %v4975_v60  ;;  %5040 = vst.msk [vmem:[%s10538_s5 + $0xc0] sm:$0xff] %vm4341_vm4, %v4976_v14  ;;  %v4982_v47 = vsel %vm4854_vm14, %v9667_v38, %v9940_v45  ;;  %vm11054_vm13 = vcmp.ge.f32.partialorder %v9671_v13, 0.0  ;;  %v11069_v49 = vld [vmem:[#allocation72_spill] sm:$0xff]  ;;  %v11094_v14 = vld [vmem:[#allocation37_spill] sm:$0xff] }
 0x39b   :  { %5041 = vst.msk [vmem:[%s10538_s5 + $0xc8] sm:$0xff] %vm4341_vm4, %v4977_v40  ;;  %v4983_v55 = vsel %vm11054_vm13, %v9671_v13, %v9943_v44  ;;  %v4984_v8 = vsel %vm11055_vm9, %v9675_v39, %v9946_v24  ;;  %vm11056_vm12 = vcmp.ge.f32.partialorder %v9679_v11, 0.0  ;;  %5042 = vst.msk [vmem:[%s10538_s5 + $0xd0] sm:$0xff] %vm4341_vm4, %v4978_v37  ;;  %v4986_v38 = vsel %vm4858_vm15, %v9683_v0, %v9963_v7  ;;  %v11057_v13 = vld [vmem:[#allocation76_spill] sm:$0xff]  ;;  %v11061_v0 = vld [vmem:[#allocation29_spill] sm:$0xff] }
 0x39c   :  { %v4985_v59 = vsel %vm11056_vm12, %v9679_v11, %v9960_v58  ;;  %5043 = vst.msk [vmem:[%s10538_s5 + $0xd8] sm:$0xff] %vm4341_vm4, %v4979_v41  ;;  %5044 = vst.msk [vmem:[%s10538_s5 + $0xe0] sm:$0xff] %vm4341_vm4, %v4980_v2  ;;  %vm11058_vm14 = vcmp.ge.f32.partialorder %v9687_v3, 0.0  ;;  %vm11059_vm10 = vcmp.ge.f32.partialorder %v9691_v35, 0.0  ;;  %vm11060_vm8 = vcmp.ge.f32.partialorder %v9695_v4, 0.0  ;;  %v11071_v45 = vld [vmem:[#allocation64_spill] sm:$0xff] }
 0x39d   :  { %5045 = vst.msk [vmem:[%s10538_s5 + $0xe8] sm:$0xff] %vm4341_vm4, %v4981_v52  ;;  %v4987_v39 = vsel %vm11058_vm14, %v9687_v3, %v11057_v13  ;;  %v4988_v11 = vsel %vm11059_vm10, %v9691_v35, %v9980_v42  ;;  %v4989_v6 = vsel %vm11060_vm8, %v9695_v4, %v9983_v23  ;;  %5046 = vst.msk [vmem:[%s10538_s5 + $0xf0] sm:$0xff] %vm4341_vm4, %v4982_v47  ;;  %vm11062_vm15 = vcmp.ge.f32.partialorder %v9703_v16, 0.0  ;;  %v11076_v7 = vld [vmem:[#allocation24_spill] sm:$0xff]  ;;  %v11078_v42 = vld [vmem:[#allocation74_spill] sm:$0xff] }
 0x39e   :  { %5047 = vst.msk [vmem:[%s10538_s5 + $0xf8] sm:$0xff] %vm4341_vm4, %v4983_v55  ;;  %5048 = vst.msk [vmem:[%s10538_s5 + $0x100] sm:$0xff] %vm4341_vm4, %v4984_v8  ;;  %v4990_v3 = vsel %vm4862_vm0, %v9699_v63, %v11061_v0  ;;  %v4991_v35 = vsel %vm11062_vm15, %v9703_v16, %v10001_v48  ;;  %vm11063_vm13 = vcmp.ge.f32.partialorder %v9707_v61, 0.0  ;;  %vm11065_vm9 = vcmp.ge.f32.partialorder %v9711_v32, 0.0  ;;  %v11066_v63 = vld [vmem:[#allocation38_spill] sm:$0xff]  ;;  %v11092_v53 = vld [vmem:[#allocation36_spill] sm:$0xff] }
 0x39f   :  { %5049 = vst.msk [vmem:[%s10538_s5 + $0x108] sm:$0xff] %vm4341_vm4, %v4985_v59  ;;  %v4992_v4 = vsel %vm11063_vm13, %v9707_v61, %v10004_v5  ;;  %v4993_v24 = vsel %vm11065_vm9, %v9711_v32, %v11064_v54  ;;  %5050 = vst.msk [vmem:[%s10538_s5 + $0x110] sm:$0xff] %vm4341_vm4, %v4986_v38  ;;  %v4994_v16 = vsel %vm4866_vm1, %v9715_v10, %v11066_v63  ;;  %v11067_v61 = vld [vmem:[#allocation71_spill] sm:$0xff]  ;;  %vm11068_vm0 = vcmp.ge.f32.partialorder %v9719_v9, 0.0  ;;  %v11073_v10 = vld [vmem:[#allocation68_spill] sm:$0xff] }
 0x3a0   :  { %5051 = vst.msk [vmem:[%s10538_s5 + $0x118] sm:$0xff] %vm4341_vm4, %v4987_v39  ;;  %5052 = vst.msk [vmem:[%s10538_s5 + $0x120] sm:$0xff] %vm4341_vm4, %v4988_v11  ;;  %v4995_v32 = vsel %vm11068_vm0, %v9719_v9, %v11067_v61  ;;  %vm11070_vm12 = vcmp.ge.f32.partialorder %v9723_v26, 0.0  ;;  %vm11072_vm14 = vcmp.ge.f32.partialorder %v11008_v25, 0.0  ;;  %v4998_v9 = vsel %vm4870_vm2, %v11010_v29, %v11073_v10  ;;  %v11079_v5 = vld [vmem:[#allocation26_spill] sm:$0xff]  ;;  %v11095_v21 = vld [vmem:[#allocation3_spill] sm:$0xff] }
 0x3a1   :  { %5053 = vst.msk [vmem:[%s10538_s5 + $0x128] sm:$0xff] %vm4341_vm4, %v4989_v6  ;;  %v4996_v28 = vsel %vm11070_vm12, %v9723_v26, %v11069_v49  ;;  %v4997_v44 = vsel %vm11072_vm14, %v11008_v25, %v11071_v45  ;;  %5054 = vst.msk [vmem:[%s10538_s5 + $0x130] sm:$0xff] %vm4341_vm4, %v4990_v3  ;;  %v11074_v26 = vld [vmem:[#allocation73_spill] sm:$0xff]  ;;  %vm11075_vm1 = vcmp.ge.f32.partialorder %v11012_v22, 0.0  ;;  %vm11077_vm10 = vcmp.ge.f32.partialorder %v11076_v7, 0.0  ;;  %v11081_v29 = vld [vmem:[#allocation70_spill] sm:$0xff] }
 0x3a2   :  { %5055 = vst.msk [vmem:[%s10538_s5 + $0x138] sm:$0xff] %vm4341_vm4, %v4991_v35  ;;  %5056 = vst.msk [vmem:[%s10538_s5 + $0x140] sm:$0xff] %vm4341_vm4, %v4992_v4  ;;  %v4999_v58 = vsel %vm11075_vm1, %v11012_v22, %v11074_v26  ;;  %v5000_v23 = vsel %vm11077_vm10, %v11076_v7, %v10064_v31  ;;  %vm11080_vm8 = vcmp.ge.f32.partialorder %v11079_v5, 0.0  ;;  %v5002_v25 = vsel %vm4874_vm3, %v9747_v43, %v11081_v29  ;;  %v11082_v22 = vld [vmem:[#allocation77_spill] sm:$0xff]  ;;  %v11089_v43 = vld [vmem:[#allocation78_spill] sm:$0xff] }
 0x3a3   :  { %5057 = vst.msk [vmem:[%s10538_s5 + $0x148] sm:$0xff] %vm4341_vm4, %v4993_v24  ;;  %v5001_v48 = vsel %vm11080_vm8, %v11079_v5, %v11078_v42  ;;  %5058 = vst.msk [vmem:[%s10538_s5 + $0x150] sm:$0xff] %vm4341_vm4, %v4994_v16  ;;  %vm11083_vm2 = vcmp.ge.f32.partialorder %v11017_v36, 0.0  ;;  %vm11085_vm15 = vcmp.ge.f32.partialorder %v9755_v50, 0.0  ;;  %vm11088_vm13 = vcmp.ge.f32.partialorder %v11087_v12, 0.0  ;;  %v11100_v41 = vld [vmem:[#allocation51_spill] sm:$0xff] }
 0x3a4   :  { %5059 = vst.msk [vmem:[%s10538_s5 + $0x158] sm:$0xff] %vm4341_vm4, %v4995_v32  ;;  %5060 = vst.msk [vmem:[%s10538_s5 + $0x160] sm:$0xff] %vm4341_vm4, %v4996_v28  ;;  %v5003_v31 = vsel %vm11083_vm2, %v11017_v36, %v11082_v22  ;;  %v5004_v17 = vsel %vm11085_vm15, %v9755_v50, %v11084_v56  ;;  %v5005_v30 = vsel %vm11088_vm13, %v11087_v12, %v11086_v34  ;;  %v11090_v36 = vld [vmem:[#allocation31_spill] sm:$0xff]  ;;  %vm11091_vm3 = vcmp.ge.f32.partialorder %v11024_v27, 0.0  ;;  %v11102_v62 = vld [vmem:[#allocation45_spill] sm:$0xff] }
 0x3a5   :  { %5061 = vst.msk [vmem:[%s10538_s5 + $0x168] sm:$0xff] %vm4341_vm4, %v4997_v44  ;;  %5062 = vst.msk [vmem:[%s10538_s5 + $0x170] sm:$0xff] %vm4341_vm4, %v4998_v9  ;;  %v5006_v50 = vsel %vm4878_vm5, %v11022_v33, %v11089_v43  ;;  %v5007_v18 = vsel %vm11091_vm3, %v11024_v27, %v11090_v36  ;;  %vm11093_vm9 = vcmp.ge.f32.partialorder %v11026_v1, 0.0  ;;  %vm11096_vm0 = vcmp.ge.f32.partialorder %v11095_v21, 0.0  ;;  %v11097_v33 = vld [vmem:[#allocation79_spill] sm:$0xff]  ;;  %v11103_v52 = vld [vmem:[#allocation53_spill] sm:$0xff] }
 0x3a6   :  { %5063 = vst.msk [vmem:[%s10538_s5 + $0x178] sm:$0xff] %vm4341_vm4, %v4999_v58  ;;  %5064 = vst.msk [vmem:[%s10538_s5 + $0x180] sm:$0xff] %vm4341_vm4, %v5000_v23  ;;  %v5008_v60 = vsel %vm11093_vm9, %v11026_v1, %v11092_v53  ;;  %v5009_v40 = vsel %vm11096_vm0, %v11095_v21, %v11094_v14  ;;  %v5010_v27 = vsel %vm4882_vm6, %v11031_v19, %v11097_v33  ;;  %v11098_v1 = vld [vmem:[#allocation6_spill] sm:$0xff]  ;;  %vm11099_vm5 = vcmp.ge.f32.partialorder %v11033_v15, 0.0  ;;  %v11105_v19 = vld [vmem:[#allocation49_spill] sm:$0xff] }
 0x3a7   :  { %5065 = vst.msk [vmem:[%s10538_s5 + $0x188] sm:$0xff] %vm4341_vm4, %v5001_v48  ;;  %5066 = vst.msk [vmem:[%s10538_s5 + $0x190] sm:$0xff] %vm4341_vm4, %v5002_v25  ;;  %v5011_v37 = vsel %vm11099_vm5, %v11033_v15, %v11098_v1  ;;  %vm11101_vm12 = vcmp.ge.f32.partialorder %v11100_v41, 0.0  ;;  %vm11104_vm14 = vcmp.ge.f32.partialorder %v11103_v52, 0.0  ;;  %v5014_v15 = vsel %vm4886_vm7, %v11038_v46, %v11105_v19 }
 0x3a8   :  { %5067 = vst.msk [vmem:[%s10538_s5 + $0x198] sm:$0xff] %vm4341_vm4, %v5003_v31  ;;  %5068 = vst.msk [vmem:[%s10538_s5 + $0x1a0] sm:$0xff] %vm4341_vm4, %v5004_v17  ;;  %v5012_v2 = vsel %vm11101_vm12, %v11100_v41, %v10148_v57  ;;  %v5013_v47 = vsel %vm11104_vm14, %v11103_v52, %v11102_v62  ;;  %v5015_v57 = vsel %vm4887_vm11, %v11040_v20, %v10167_v51 }
 0x3a9   :  { %5069 = vst.msk [vmem:[%s10538_s5 + $0x1a8] sm:$0xff] %vm4341_vm4, %v5005_v30  ;;  %5070 = vst.msk [vmem:[%s10538_s5 + $0x1b0] sm:$0xff] %vm4341_vm4, %v5006_v50 }
 0x3aa   :  { %5071 = vst.msk [vmem:[%s10538_s5 + $0x1b8] sm:$0xff] %vm4341_vm4, %v5007_v18  ;;  %5072 = vst.msk [vmem:[%s10538_s5 + $0x1c0] sm:$0xff] %vm4341_vm4, %v5008_v60 }
 0x3ab   :  { %5073 = vst.msk [vmem:[%s10538_s5 + $0x1c8] sm:$0xff] %vm4341_vm4, %v5009_v40  ;;  %5074 = vst.msk [vmem:[%s10538_s5 + $0x1d0] sm:$0xff] %vm4341_vm4, %v5010_v27 }
 0x3ac   :  { %5075 = vst.msk [vmem:[%s10538_s5 + $0x1d8] sm:$0xff] %vm4341_vm4, %v5011_v37  ;;  %5076 = vst.msk [vmem:[%s10538_s5 + $0x1e0] sm:$0xff] %vm4341_vm4, %v5012_v2 }
 0x3ad   :  { %5077 = vst.msk [vmem:[%s10538_s5 + $0x1e8] sm:$0xff] %vm4341_vm4, %v5013_v47  ;;  %5078 = vst.msk [vmem:[%s10538_s5 + $0x1f0] sm:$0xff] %vm4341_vm4, %v5014_v15 }
 0x3ae   :  { %5079 = vst.msk [vmem:[%s10538_s5 + $0x1f8] sm:$0xff] %vm4341_vm4, %v5015_v57 }

</bundles_post_ra>
